<compile_context>
chip_gen: v5e
topology: v5e:2x2
jax: 0.10.0
libtpu: 0.0.40
codegen_flags: <defaults>
</compile_context>

<pallas_src>
import numpy as np
import jax
import jax.numpy as jnp
from jax.experimental import pallas as pl
from jax.experimental.pallas import tpu as pltpu

SQRT2_INV = 0.7071067811865476
LN_EPS = 1e-5
MSG_SCALE = 30.0          # DecLayer(scale=30)


def _gelu(x):
    # exact (erf-based) GELU, matching torch.nn.GELU() default
    return 0.5 * x * (1.0 + jax.lax.erf(x * SQRT2_INV))


def _layer_norm(x, gamma, beta):
    mu = jnp.mean(x, axis=-1, keepdims=True)
    xc = x - mu
    var = jnp.mean(xc * xc, axis=-1, keepdims=True)
    return xc * jax.lax.rsqrt(var + LN_EPS) * gamma + beta


# ------------------------------ Pallas kernel -------------------------------

def dec_layer_kernel(hV_ref, he2_ref, dyn_ref, mask_ref,
                     w1v_ref, w1e_ref, w1g_ref, b1_ref,
                     w2_ref, b2_ref, w3_ref, b3_ref,
                     wi_ref, bi_ref, wo_ref, bo_ref,
                     g1_ref, be1_ref, g2_ref, be2_ref,
                     out_ref):
    _, K, tL, C2 = he2_ref.shape            # C2 = 2H, neighbor-major block
    H = hV_ref.shape[2]

    hv = hV_ref[0]                                            # (tL, H)  f32

    # ---- message MLP, layer 1.  W1 split by input rows:
    #   [0:H]    self node features       -> computed once per node,
    #   [H:3H]   layer-invariant stream   (mask*h_E, mask_bw*gather(h_S)),
    #   [3H:4H]  per-layer blended gathered h_V stream.
    mv = jnp.dot(hv.astype(jnp.bfloat16), w1v_ref[...],
                 preferred_element_type=jnp.float32) + b1_ref[...]           # (tL, H)

    he2 = he2_ref[0].reshape(K * tL, C2)                      # (K*tL, 2H) bf16
    dyn = dyn_ref[0].reshape(K * tL, H)                       # (K*tL, H)  bf16
    me = (jnp.dot(he2, w1e_ref[...], preferred_element_type=jnp.float32)
          + jnp.dot(dyn, w1g_ref[...], preferred_element_type=jnp.float32))  # (K*tL, H)

    # broadcast the node term over K directly (no materialized broadcast copy),
    # cast GELU output to bf16 immediately (it only feeds the W2 matmul).
    m1 = _gelu(me.reshape(K, tL, H) + mv[None]).astype(jnp.bfloat16)

    m2 = jnp.dot(m1.reshape(K * tL, H), w2_ref[...],
                 preferred_element_type=jnp.float32) + b2_ref[...]
    m2 = _gelu(m2)                                            # (K*tL, H) f32

    # ---- neighbor sum hoisted ABOVE W3.  1/scale folded into w3, K*b3/scale
    #      folded into b3 at weight-prep time.
    msum = jnp.sum(m2.reshape(K, tL, H), axis=0)              # (tL, H) f32
    dh = jnp.dot(msum.astype(jnp.bfloat16), w3_ref[...],
                 preferred_element_type=jnp.float32) + b3_ref[...]

    # ---- residual + LayerNorm1 (dropout = identity in eval mode)
    x = _layer_norm(hv + dh, g1_ref[...], be1_ref[...])

    # ---- position-wise feed-forward: H -> 4H -> H
    f = _gelu(jnp.dot(x.astype(jnp.bfloat16), wi_ref[...],
                      preferred_element_type=jnp.float32) + bi_ref[...])
    y = x + jnp.dot(f.astype(jnp.bfloat16), wo_ref[...],
                    preferred_element_type=jnp.float32) + bo_ref[...]
    y = _layer_norm(y, g2_ref[...], be2_ref[...])

    # ---- node mask (mask_V)
    out_ref[0] = mask_ref[0] * y


def dec_layer_pallas(h_V, static2h_t, dyn_t, mask3, weights, tile_l, vmem_limit):
    """h_V [B,L,H] f32, static2h_t [B,K,L,2H] bf16, dyn_t [B,K,L,H] bf16."""
    B, L, H = h_V.shape
    K = static2h_t.shape[1]
    C2 = static2h_t.shape[3]
    in_specs = [
        pl.BlockSpec((1, tile_l, H), lambda b, j: (b, j, 0)),
        pl.BlockSpec((1, K, tile_l, C2), lambda b, j: (b, 0, j, 0)),
        pl.BlockSpec((1, K, tile_l, H), lambda b, j: (b, 0, j, 0)),
        pl.BlockSpec((1, tile_l, 1), lambda b, j: (b, j, 0)),
    ] + [pl.BlockSpec(w.shape, lambda b, j: (0, 0)) for w in weights]
    return pl.pallas_call(
        dec_layer_kernel,
        out_shape=jax.ShapeDtypeStruct((B, L, H), jnp.float32),
        grid_spec=pltpu.PrefetchScalarGridSpec(
            num_scalar_prefetch=0,
            grid=(B, L // tile_l),      # keep >= 2 steps so v7x megacore is fed
            in_specs=in_specs,
            out_specs=pl.BlockSpec((1, tile_l, H), lambda b, j: (b, j, 0)),
        ),
        compiler_params=pltpu.CompilerParams(
            dimension_semantics=("parallel", "parallel"),
            vmem_limit_bytes=int(vmem_limit)),
    )(h_V, static2h_t, dyn_t, mask3, *weights)


# --------------------------- tile / VMEM budgeting ---------------------------

def _vmem_capacity_bytes():
    cap = 64 << 20                      # conservative default (v7x-sized)
    try:
        info = pltpu.get_tpu_info()
        cap = int(getattr(info, "vmem_capacity_bytes", cap))
    except Exception:
        pass
    return cap


def _kernel_vmem_estimate(tile_l, K, H):
    bf, f32 = 2, 4
    io = 2 * (tile_l * H * f32               # h_V block (double-buffered)
              + K * tile_l * 2 * H * bf      # static 2H stream
              + K * tile_l * H * bf          # dynamic H stream
              + tile_l * f32                 # mask
              + tile_l * H * f32)            # output
    tmp = K * tile_l * H * (f32 + bf + f32) + 2 * tile_l * 4 * H * f32
    w = 2 * (13 * H * H * bf + 16 * H * f32)
    return io + tmp + w


def _choose_tile_l(L, K, H, budget):
    """Largest 16-aligned divisor of L whose kernel footprint fits the budget."""
    if L <= 16:
        return L
    divisors = [t for t in range(16, L + 1, 16) if L % t == 0]
    if not divisors:
        return L
    tile = divisors[0]
    for t in divisors:
        if _kernel_vmem_estimate(t, K, H) <= budget:
            tile = t
    return tile


# ----------------------------- plain-JAX glue --------------------------------

def _gather_nodes_t(nodes, idx_flat, K):
    # nodes [B,L,H], idx_flat [B,K*L] (neighbor-major) -> [B,K,L,H]
    B, L, H = nodes.shape
    g = jnp.take_along_axis(nodes, idx_flat[:, :, None], axis=1)
    return g.reshape(B, K, L, H)


def _prep_layer_weights(p, K, H):
    """Split W1, fold 1/scale (and K*b3) into W3/b3, cast matmul weights to bf16."""
    inv = 1.0 / MSG_SCALE
    W1 = p["W1"]                                  # (4H, H), [in, out] layout
    return [
        W1[:H, :].astype(jnp.bfloat16),           # W1_v : self node rows
        W1[H:3 * H, :].astype(jnp.bfloat16),      # W1_e : static 2H rows
        W1[3 * H:, :].astype(jnp.bfloat16),       # W1_g : gathered-h_V rows
        p["b1"],
        p["W2"].astype(jnp.bfloat16), p["b2"],
        (p["W3"] * inv).astype(jnp.bfloat16), p["b3"] * (K * inv),
        p["Win"].astype(jnp.bfloat16), p["bin"],
        p["Wout"].astype(jnp.bfloat16), p["bout"],
        p["g1"], p["be1"], p["g2"], p["be2"],
    ]


def mpnn_decoder_forward(params, h_S, h_V, h_E, E_idx, mask, randn, tile_l=None):
    B, L, K, H = h_E.shape

    # ---- decoding-order masks via rank comparison (O(B*L*K), no [B,L,L]).
    # Equivalent to the one_hot + einsum formulation:
    #   mask_attend[b,q,k] = 1  iff  rank(E_idx[b,q,k]) < rank(q),
    # where rank = inverse permutation of the decoding order.
    chain_mask = jnp.ones((B, L), jnp.float32) * mask
    decoding_order = jnp.argsort((chain_mask + 0.0001) * jnp.abs(randn), axis=-1)
    rank = jnp.argsort(decoding_order, axis=-1)            # [B,L] decode step of node
    E_idx_t = jnp.transpose(E_idx, (0, 2, 1))              # [B,K,L] neighbor-major
    idx_flat = E_idx_t.reshape(B, K * L)
    rank_nb = jnp.take_along_axis(rank, idx_flat, axis=1).reshape(B, K, L)
    mask_attend_t = (rank_nb < rank[:, None, :]).astype(jnp.float32)     # [B,K,L]
    mask1_t = mask[:, None, :]
    mask_bw_t = (mask1_t * mask_attend_t)[..., None]                     # [B,K,L,1]
    mask_fw_t = (mask1_t * (1.0 - mask_attend_t))[..., None]             # [B,K,L,1]

    # ---- layer-invariant streams, built ONCE (hoisted out of the layer loop):
    #   h_ESV[..., :2H] = mask_bw*[h_E, gS] + mask_fw*[h_E, 0] = [mask*h_E, mask_bw*gS]
    #   h_ESV[..., 2H:] = mask_bw*gather(h_V_cur) + mask_fw*gather(h_V_encoder)
    h_E_t = jnp.transpose(h_E, (0, 2, 1, 3))                             # [B,K,L,H]
    gS = _gather_nodes_t(h_S, idx_flat, K)
    gVin = _gather_nodes_t(h_V, idx_flat, K)                             # encoder h_V
    static2h_t = jnp.concatenate(
        [mask[:, None, :, None] * h_E_t, mask_bw_t * gS], axis=-1
    ).astype(jnp.bfloat16)                                               # [B,K,L,2H]
    static_g = (mask_fw_t * gVin).astype(jnp.bfloat16)                   # [B,K,L,H]

    mask3 = mask[:, :, None]                                             # [B,L,1]

    cap = _vmem_capacity_bytes()
    vmem_limit = int(min(cap * 0.85, 100 * (1 << 20)))
    if (tile_l is None or L % tile_l != 0
            or (tile_l % 16 != 0 and tile_l != L)):
        tile_l = _choose_tile_l(L, K, H, int(cap * 0.5))

    layer_ws = [_prep_layer_weights(p, K, H) for p in params["layers"]]
    for ws in layer_ws:
        # per-layer dynamic slice only: gather current h_V, blend with mask_bw
        # (gather + blend + cast fuse into one XLA pass writing an H-wide slab).
        gV = _gather_nodes_t(h_V, idx_flat, K)
        dyn_t = (mask_bw_t * gV + static_g).astype(jnp.bfloat16)         # [B,K,L,H]
        h_V = dec_layer_pallas(h_V, static2h_t, dyn_t, mask3, ws, tile_l, vmem_limit)
    return h_V


# ------------------------ deterministic parameter init ----------------------

def xavier_uniform(key, fan_in, fan_out):
    a = float(np.sqrt(6.0 / (fan_in + fan_out)))
    return jax.random.uniform(key, (fan_in, fan_out), jnp.float32, -a, a)


def init_params(key, H, num_layers):
    layers = []
    for l in range(num_layers):
        k = jax.random.fold_in(key, l)
        ks = jax.random.split(k, 5)
        # weights stored transposed relative to torch ([in, out])
        layers.append(dict(
            W1=xavier_uniform(ks[0], 4 * H, H),
            b1=jnp.zeros((1, H), jnp.float32),
            W2=xavier_uniform(ks[1], H, H),
            b2=jnp.zeros((1, H), jnp.float32),
            W3=xavier_uniform(ks[2], H, H),
            b3=jnp.zeros((1, H), jnp.float32),
            Win=xavier_uniform(ks[3], H, 4 * H),
            bin=jnp.zeros((1, 4 * H), jnp.float32),
            Wout=xavier_uniform(ks[4], 4 * H, H),
            bout=jnp.zeros((1, H), jnp.float32),
            g1=jnp.ones((1, H), jnp.float32), be1=jnp.zeros((1, H), jnp.float32),
            g2=jnp.ones((1, H), jnp.float32), be2=jnp.zeros((1, H), jnp.float32),
        ))
    return {"layers": layers}


if __name__ == "__main__":
    # NOTE: demo shapes are small (H=32 < 128 lanes); real ProteinMPNN uses
    # H=128, K=30-64, where the layout here is lane-dense.
    B, L, K, H = 2, 32, 4, 32
    num_layers = 3

    key = jax.random.PRNGKey(0)
    keys = jax.random.split(key, 8)
    h_S = jax.random.normal(keys[0], (B, L, H), jnp.float32)
    h_V = jax.random.normal(keys[1], (B, L, H), jnp.float32)
    h_E = jax.random.normal(keys[2], (B, L, K, H), jnp.float32)
    E_idx = jax.random.randint(keys[3], (B, L, K), 0, L, jnp.int32)
    mask = (jax.random.uniform(keys[4], (B, L)) > 0.2).astype(jnp.float32)
    randn = jax.random.normal(keys[5], (B, L), jnp.float32)  # deterministic decoding order

    params = init_params(keys[6], H, num_layers)

    # tile_l=16 exercises the (batch, L-tile) grid (grid = (2, 2))
    fwd = jax.jit(mpnn_decoder_forward, static_argnames=("tile_l",))
    out = fwd(params, h_S, h_V, h_E, E_idx, mask, randn, tile_l=16)
    out = jax.block_until_ready(out)
    assert out.shape == (B, L, H) and out.dtype == jnp.float32
    assert bool(jnp.all(jnp.isfinite(out)))
    print("KERNEL_OK")
</pallas_src>

<mosaic_0001>
module attributes {stable_mosaic.version = 11 : i64} {
  func.func @dec_layer_kernel(%arg0: i32, %arg1: i32, %arg2: memref<1x16x32xf32, #tpu.memory_space<vmem>>, %arg3: memref<1x4x16x64xbf16, #tpu.memory_space<vmem>>, %arg4: memref<1x4x16x32xbf16, #tpu.memory_space<vmem>>, %arg5: memref<1x16x1xf32, #tpu.memory_space<vmem>>, %arg6: memref<32x32xbf16, #tpu.memory_space<vmem>>, %arg7: memref<64x32xbf16, #tpu.memory_space<vmem>>, %arg8: memref<32x32xbf16, #tpu.memory_space<vmem>>, %arg9: memref<1x32xf32, #tpu.memory_space<vmem>>, %arg10: memref<32x32xbf16, #tpu.memory_space<vmem>>, %arg11: memref<1x32xf32, #tpu.memory_space<vmem>>, %arg12: memref<32x32xbf16, #tpu.memory_space<vmem>>, %arg13: memref<1x32xf32, #tpu.memory_space<vmem>>, %arg14: memref<32x128xbf16, #tpu.memory_space<vmem>>, %arg15: memref<1x128xf32, #tpu.memory_space<vmem>>, %arg16: memref<128x32xbf16, #tpu.memory_space<vmem>>, %arg17: memref<1x32xf32, #tpu.memory_space<vmem>>, %arg18: memref<1x32xf32, #tpu.memory_space<vmem>>, %arg19: memref<1x32xf32, #tpu.memory_space<vmem>>, %arg20: memref<1x32xf32, #tpu.memory_space<vmem>>, %arg21: memref<1x32xf32, #tpu.memory_space<vmem>>, %arg22: memref<1x16x32xf32, #tpu.memory_space<vmem>>) attributes {dimension_semantics = [#tpu.dimension_semantics<parallel>, #tpu.dimension_semantics<parallel>], iteration_bounds = array<i64: 2, 2>, scalar_prefetch = 0 : i64, scratch_operands = 0 : i64, tpu.core_type = #tpu.core_type<tc>, window_params = [{transform_indices = @transform_0, window_bounds = array<i64: 1, 16, 32>}, {transform_indices = @transform_1, window_bounds = array<i64: 1, 4, 16, 64>}, {transform_indices = @transform_2, window_bounds = array<i64: 1, 4, 16, 32>}, {transform_indices = @transform_3, window_bounds = array<i64: 1, 16, 1>}, {pipeline_mode = #tpu.pipeline_mode<synchronous>, transform_indices = @transform_4, window_bounds = array<i64: 32, 32>}, {pipeline_mode = #tpu.pipeline_mode<synchronous>, transform_indices = @transform_5, window_bounds = array<i64: 64, 32>}, {pipeline_mode = #tpu.pipeline_mode<synchronous>, transform_indices = @transform_6, window_bounds = array<i64: 32, 32>}, {pipeline_mode = #tpu.pipeline_mode<synchronous>, transform_indices = @transform_7, window_bounds = array<i64: 1, 32>}, {pipeline_mode = #tpu.pipeline_mode<synchronous>, transform_indices = @transform_8, window_bounds = array<i64: 32, 32>}, {pipeline_mode = #tpu.pipeline_mode<synchronous>, transform_indices = @transform_9, window_bounds = array<i64: 1, 32>}, {pipeline_mode = #tpu.pipeline_mode<synchronous>, transform_indices = @transform_10, window_bounds = array<i64: 32, 32>}, {pipeline_mode = #tpu.pipeline_mode<synchronous>, transform_indices = @transform_11, window_bounds = array<i64: 1, 32>}, {pipeline_mode = #tpu.pipeline_mode<synchronous>, transform_indices = @transform_12, window_bounds = array<i64: 32, 128>}, {pipeline_mode = #tpu.pipeline_mode<synchronous>, transform_indices = @transform_13, window_bounds = array<i64: 1, 128>}, {pipeline_mode = #tpu.pipeline_mode<synchronous>, transform_indices = @transform_14, window_bounds = array<i64: 128, 32>}, {pipeline_mode = #tpu.pipeline_mode<synchronous>, transform_indices = @transform_15, window_bounds = array<i64: 1, 32>}, {pipeline_mode = #tpu.pipeline_mode<synchronous>, transform_indices = @transform_16, window_bounds = array<i64: 1, 32>}, {pipeline_mode = #tpu.pipeline_mode<synchronous>, transform_indices = @transform_17, window_bounds = array<i64: 1, 32>}, {pipeline_mode = #tpu.pipeline_mode<synchronous>, transform_indices = @transform_18, window_bounds = array<i64: 1, 32>}, {pipeline_mode = #tpu.pipeline_mode<synchronous>, transform_indices = @transform_19, window_bounds = array<i64: 1, 32>}, {transform_indices = @transform_20, window_bounds = array<i64: 1, 16, 32>}]} {
    %c0 = arith.constant 0 : index
    %c0_0 = arith.constant 0 : index
    %c0_1 = arith.constant 0 : index
    %0 = vector.load %arg2[%c0, %c0_0, %c0_1] : memref<1x16x32xf32, #tpu.memory_space<vmem>>, vector<1x16x32xf32>
    %1 = vector.shape_cast %0 : vector<1x16x32xf32> to vector<16x32xf32>
    %2 = arith.truncf %1 : vector<16x32xf32> to vector<16x32xbf16>
    %c0_2 = arith.constant 0 : index
    %c0_3 = arith.constant 0 : index
    %3 = vector.load %arg6[%c0_2, %c0_3] : memref<32x32xbf16, #tpu.memory_space<vmem>>, vector<32x32xbf16>
    %cst = arith.constant dense<0.000000e+00> : vector<16x32xf32>
    %4 = tpu.matmul %2, %3, %cst {dimension_numbers = #tpu.dot_dimension_numbers<[1], [0], [0], [1], [0, 0, 1, 1], [], []>} : vector<16x32xbf16>, vector<32x32xbf16>, vector<16x32xf32> -> vector<16x32xf32>
    %c0_4 = arith.constant 0 : index
    %c0_5 = arith.constant 0 : index
    %5 = vector.load %arg9[%c0_4, %c0_5] : memref<1x32xf32, #tpu.memory_space<vmem>>, vector<1x32xf32>
    %6 = vector.broadcast %5 : vector<1x32xf32> to vector<16x32xf32>
    %7 = arith.addf %4, %6 : vector<16x32xf32>
    %c0_6 = arith.constant 0 : index
    %c0_7 = arith.constant 0 : index
    %c0_8 = arith.constant 0 : index
    %c0_9 = arith.constant 0 : index
    %8 = vector.load %arg3[%c0_6, %c0_7, %c0_8, %c0_9] : memref<1x4x16x64xbf16, #tpu.memory_space<vmem>>, vector<1x4x16x64xbf16>
    %9 = vector.shape_cast %8 : vector<1x4x16x64xbf16> to vector<4x16x64xbf16>
    %10 = vector.shape_cast %9 : vector<4x16x64xbf16> to vector<64x64xbf16>
    %c0_10 = arith.constant 0 : index
    %c0_11 = arith.constant 0 : index
    %c0_12 = arith.constant 0 : index
    %c0_13 = arith.constant 0 : index
    %11 = vector.load %arg4[%c0_10, %c0_11, %c0_12, %c0_13] : memref<1x4x16x32xbf16, #tpu.memory_space<vmem>>, vector<1x4x16x32xbf16>
    %12 = vector.shape_cast %11 : vector<1x4x16x32xbf16> to vector<4x16x32xbf16>
    %13 = vector.shape_cast %12 : vector<4x16x32xbf16> to vector<64x32xbf16>
    %c0_14 = arith.constant 0 : index
    %c0_15 = arith.constant 0 : index
    %14 = vector.load %arg7[%c0_14, %c0_15] : memref<64x32xbf16, #tpu.memory_space<vmem>>, vector<64x32xbf16>
    %cst_16 = arith.constant dense<0.000000e+00> : vector<64x32xf32>
    %15 = tpu.matmul %10, %14, %cst_16 {dimension_numbers = #tpu.dot_dimension_numbers<[1], [0], [0], [1], [0, 0, 1, 1], [], []>} : vector<64x64xbf16>, vector<64x32xbf16>, vector<64x32xf32> -> vector<64x32xf32>
    %c0_17 = arith.constant 0 : index
    %c0_18 = arith.constant 0 : index
    %16 = vector.load %arg8[%c0_17, %c0_18] : memref<32x32xbf16, #tpu.memory_space<vmem>>, vector<32x32xbf16>
    %cst_19 = arith.constant dense<0.000000e+00> : vector<64x32xf32>
    %17 = tpu.matmul %13, %16, %cst_19 {dimension_numbers = #tpu.dot_dimension_numbers<[1], [0], [0], [1], [0, 0, 1, 1], [], []>} : vector<64x32xbf16>, vector<32x32xbf16>, vector<64x32xf32> -> vector<64x32xf32>
    %18 = arith.addf %15, %17 : vector<64x32xf32>
    %19 = vector.shape_cast %18 : vector<64x32xf32> to vector<4x16x32xf32>
    %20 = vector.shape_cast %7 : vector<16x32xf32> to vector<1x16x32xf32>
    %21 = vector.broadcast %20 : vector<1x16x32xf32> to vector<4x16x32xf32>
    %22 = arith.addf %19, %21 : vector<4x16x32xf32>
    %cst_20 = arith.constant 5.000000e-01 : f32
    %23 = vector.broadcast %cst_20 : f32 to vector<4x16x32xf32>
    %24 = arith.mulf %23, %22 : vector<4x16x32xf32>
    %cst_21 = arith.constant 0.707106769 : f32
    %25 = vector.broadcast %cst_21 : f32 to vector<4x16x32xf32>
    %26 = arith.mulf %22, %25 : vector<4x16x32xf32>
    %27 = math.erf %26 : vector<4x16x32xf32>
    %cst_22 = arith.constant 1.000000e+00 : f32
    %28 = vector.broadcast %cst_22 : f32 to vector<4x16x32xf32>
    %29 = arith.addf %28, %27 : vector<4x16x32xf32>
    %30 = arith.mulf %24, %29 : vector<4x16x32xf32>
    %31 = arith.truncf %30 : vector<4x16x32xf32> to vector<4x16x32xbf16>
    %32 = vector.shape_cast %31 : vector<4x16x32xbf16> to vector<64x32xbf16>
    %c0_23 = arith.constant 0 : index
    %c0_24 = arith.constant 0 : index
    %33 = vector.load %arg10[%c0_23, %c0_24] : memref<32x32xbf16, #tpu.memory_space<vmem>>, vector<32x32xbf16>
    %cst_25 = arith.constant dense<0.000000e+00> : vector<64x32xf32>
    %34 = tpu.matmul %32, %33, %cst_25 {dimension_numbers = #tpu.dot_dimension_numbers<[1], [0], [0], [1], [0, 0, 1, 1], [], []>} : vector<64x32xbf16>, vector<32x32xbf16>, vector<64x32xf32> -> vector<64x32xf32>
    %c0_26 = arith.constant 0 : index
    %c0_27 = arith.constant 0 : index
    %35 = vector.load %arg11[%c0_26, %c0_27] : memref<1x32xf32, #tpu.memory_space<vmem>>, vector<1x32xf32>
    %36 = vector.broadcast %35 : vector<1x32xf32> to vector<64x32xf32>
    %37 = arith.addf %34, %36 : vector<64x32xf32>
    %cst_28 = arith.constant 5.000000e-01 : f32
    %38 = vector.broadcast %cst_28 : f32 to vector<64x32xf32>
    %39 = arith.mulf %38, %37 : vector<64x32xf32>
    %cst_29 = arith.constant 0.707106769 : f32
    %40 = vector.broadcast %cst_29 : f32 to vector<64x32xf32>
    %41 = arith.mulf %37, %40 : vector<64x32xf32>
    %42 = math.erf %41 : vector<64x32xf32>
    %cst_30 = arith.constant 1.000000e+00 : f32
    %43 = vector.broadcast %cst_30 : f32 to vector<64x32xf32>
    %44 = arith.addf %43, %42 : vector<64x32xf32>
    %45 = arith.mulf %39, %44 : vector<64x32xf32>
    %46 = vector.shape_cast %45 : vector<64x32xf32> to vector<4x16x32xf32>
    %cst_31 = arith.constant dense<0.000000e+00> : vector<16x32xf32>
    %47 = vector.multi_reduction <add>, %46, %cst_31 [0] : vector<4x16x32xf32> to vector<16x32xf32>
    %48 = arith.truncf %47 : vector<16x32xf32> to vector<16x32xbf16>
    %c0_32 = arith.constant 0 : index
    %c0_33 = arith.constant 0 : index
    %49 = vector.load %arg12[%c0_32, %c0_33] : memref<32x32xbf16, #tpu.memory_space<vmem>>, vector<32x32xbf16>
    %cst_34 = arith.constant dense<0.000000e+00> : vector<16x32xf32>
    %50 = tpu.matmul %48, %49, %cst_34 {dimension_numbers = #tpu.dot_dimension_numbers<[1], [0], [0], [1], [0, 0, 1, 1], [], []>} : vector<16x32xbf16>, vector<32x32xbf16>, vector<16x32xf32> -> vector<16x32xf32>
    %c0_35 = arith.constant 0 : index
    %c0_36 = arith.constant 0 : index
    %51 = vector.load %arg13[%c0_35, %c0_36] : memref<1x32xf32, #tpu.memory_space<vmem>>, vector<1x32xf32>
    %52 = vector.broadcast %51 : vector<1x32xf32> to vector<16x32xf32>
    %53 = arith.addf %50, %52 : vector<16x32xf32>
    %54 = arith.addf %1, %53 : vector<16x32xf32>
    %c0_37 = arith.constant 0 : index
    %c0_38 = arith.constant 0 : index
    %55 = vector.load %arg18[%c0_37, %c0_38] : memref<1x32xf32, #tpu.memory_space<vmem>>, vector<1x32xf32>
    %c0_39 = arith.constant 0 : index
    %c0_40 = arith.constant 0 : index
    %56 = vector.load %arg19[%c0_39, %c0_40] : memref<1x32xf32, #tpu.memory_space<vmem>>, vector<1x32xf32>
    %cst_41 = arith.constant dense<0.000000e+00> : vector<16xf32>
    %57 = vector.multi_reduction <add>, %54, %cst_41 [1] : vector<16x32xf32> to vector<16xf32>
    %58 = vector.shape_cast %57 : vector<16xf32> to vector<16x1xf32>
    %cst_42 = arith.constant 3.200000e+01 : f32
    %59 = vector.broadcast %cst_42 : f32 to vector<16x1xf32>
    %60 = arith.divf %58, %59 : vector<16x1xf32>
    %61 = vector.broadcast %60 : vector<16x1xf32> to vector<16x32xf32>
    %62 = arith.subf %54, %61 : vector<16x32xf32>
    %63 = arith.mulf %62, %62 : vector<16x32xf32>
    %cst_43 = arith.constant dense<0.000000e+00> : vector<16xf32>
    %64 = vector.multi_reduction <add>, %63, %cst_43 [1] : vector<16x32xf32> to vector<16xf32>
    %65 = vector.shape_cast %64 : vector<16xf32> to vector<16x1xf32>
    %cst_44 = arith.constant 3.200000e+01 : f32
    %66 = vector.broadcast %cst_44 : f32 to vector<16x1xf32>
    %67 = arith.divf %65, %66 : vector<16x1xf32>
    %cst_45 = arith.constant 9.99999974E-6 : f32
    %68 = vector.broadcast %cst_45 : f32 to vector<16x1xf32>
    %69 = arith.addf %67, %68 : vector<16x1xf32>
    %70 = math.rsqrt %69 : vector<16x1xf32>
    %71 = vector.broadcast %70 : vector<16x1xf32> to vector<16x32xf32>
    %72 = arith.mulf %62, %71 : vector<16x32xf32>
    %73 = vector.broadcast %55 : vector<1x32xf32> to vector<16x32xf32>
    %74 = arith.mulf %72, %73 : vector<16x32xf32>
    %75 = vector.broadcast %56 : vector<1x32xf32> to vector<16x32xf32>
    %76 = arith.addf %74, %75 : vector<16x32xf32>
    %77 = arith.truncf %76 : vector<16x32xf32> to vector<16x32xbf16>
    %c0_46 = arith.constant 0 : index
    %c0_47 = arith.constant 0 : index
    %78 = vector.load %arg14[%c0_46, %c0_47] : memref<32x128xbf16, #tpu.memory_space<vmem>>, vector<32x128xbf16>
    %cst_48 = arith.constant dense<0.000000e+00> : vector<16x128xf32>
    %79 = tpu.matmul %77, %78, %cst_48 {dimension_numbers = #tpu.dot_dimension_numbers<[1], [0], [0], [1], [0, 0, 1, 1], [], []>} : vector<16x32xbf16>, vector<32x128xbf16>, vector<16x128xf32> -> vector<16x128xf32>
    %c0_49 = arith.constant 0 : index
    %c0_50 = arith.constant 0 : index
    %80 = vector.load %arg15[%c0_49, %c0_50] : memref<1x128xf32, #tpu.memory_space<vmem>>, vector<1x128xf32>
    %81 = vector.broadcast %80 : vector<1x128xf32> to vector<16x128xf32>
    %82 = arith.addf %79, %81 : vector<16x128xf32>
    %cst_51 = arith.constant 5.000000e-01 : f32
    %83 = vector.broadcast %cst_51 : f32 to vector<16x128xf32>
    %84 = arith.mulf %83, %82 : vector<16x128xf32>
    %cst_52 = arith.constant 0.707106769 : f32
    %85 = vector.broadcast %cst_52 : f32 to vector<16x128xf32>
    %86 = arith.mulf %82, %85 : vector<16x128xf32>
    %87 = math.erf %86 : vector<16x128xf32>
    %cst_53 = arith.constant 1.000000e+00 : f32
    %88 = vector.broadcast %cst_53 : f32 to vector<16x128xf32>
    %89 = arith.addf %88, %87 : vector<16x128xf32>
    %90 = arith.mulf %84, %89 : vector<16x128xf32>
    %91 = arith.truncf %90 : vector<16x128xf32> to vector<16x128xbf16>
    %c0_54 = arith.constant 0 : index
    %c0_55 = arith.constant 0 : index
    %92 = vector.load %arg16[%c0_54, %c0_55] : memref<128x32xbf16, #tpu.memory_space<vmem>>, vector<128x32xbf16>
    %cst_56 = arith.constant dense<0.000000e+00> : vector<16x32xf32>
    %93 = tpu.matmul %91, %92, %cst_56 {dimension_numbers = #tpu.dot_dimension_numbers<[1], [0], [0], [1], [0, 0, 1, 1], [], []>} : vector<16x128xbf16>, vector<128x32xbf16>, vector<16x32xf32> -> vector<16x32xf32>
    %94 = arith.addf %76, %93 : vector<16x32xf32>
    %c0_57 = arith.constant 0 : index
    %c0_58 = arith.constant 0 : index
    %95 = vector.load %arg17[%c0_57, %c0_58] : memref<1x32xf32, #tpu.memory_space<vmem>>, vector<1x32xf32>
    %96 = vector.broadcast %95 : vector<1x32xf32> to vector<16x32xf32>
    %97 = arith.addf %94, %96 : vector<16x32xf32>
    %c0_59 = arith.constant 0 : index
    %c0_60 = arith.constant 0 : index
    %98 = vector.load %arg20[%c0_59, %c0_60] : memref<1x32xf32, #tpu.memory_space<vmem>>, vector<1x32xf32>
    %c0_61 = arith.constant 0 : index
    %c0_62 = arith.constant 0 : index
    %99 = vector.load %arg21[%c0_61, %c0_62] : memref<1x32xf32, #tpu.memory_space<vmem>>, vector<1x32xf32>
    %cst_63 = arith.constant dense<0.000000e+00> : vector<16xf32>
    %100 = vector.multi_reduction <add>, %97, %cst_63 [1] : vector<16x32xf32> to vector<16xf32>
    %101 = vector.shape_cast %100 : vector<16xf32> to vector<16x1xf32>
    %cst_64 = arith.constant 3.200000e+01 : f32
    %102 = vector.broadcast %cst_64 : f32 to vector<16x1xf32>
    %103 = arith.divf %101, %102 : vector<16x1xf32>
    %104 = vector.broadcast %103 : vector<16x1xf32> to vector<16x32xf32>
    %105 = arith.subf %97, %104 : vector<16x32xf32>
    %106 = arith.mulf %105, %105 : vector<16x32xf32>
    %cst_65 = arith.constant dense<0.000000e+00> : vector<16xf32>
    %107 = vector.multi_reduction <add>, %106, %cst_65 [1] : vector<16x32xf32> to vector<16xf32>
    %108 = vector.shape_cast %107 : vector<16xf32> to vector<16x1xf32>
    %cst_66 = arith.constant 3.200000e+01 : f32
    %109 = vector.broadcast %cst_66 : f32 to vector<16x1xf32>
    %110 = arith.divf %108, %109 : vector<16x1xf32>
    %cst_67 = arith.constant 9.99999974E-6 : f32
    %111 = vector.broadcast %cst_67 : f32 to vector<16x1xf32>
    %112 = arith.addf %110, %111 : vector<16x1xf32>
    %113 = math.rsqrt %112 : vector<16x1xf32>
    %114 = vector.broadcast %113 : vector<16x1xf32> to vector<16x32xf32>
    %115 = arith.mulf %105, %114 : vector<16x32xf32>
    %116 = vector.broadcast %98 : vector<1x32xf32> to vector<16x32xf32>
    %117 = arith.mulf %115, %116 : vector<16x32xf32>
    %118 = vector.broadcast %99 : vector<1x32xf32> to vector<16x32xf32>
    %119 = arith.addf %117, %118 : vector<16x32xf32>
    %c0_68 = arith.constant 0 : index
    %c0_69 = arith.constant 0 : index
    %c0_70 = arith.constant 0 : index
    %120 = vector.load %arg5[%c0_68, %c0_69, %c0_70] : memref<1x16x1xf32, #tpu.memory_space<vmem>>, vector<1x16x1xf32>
    %121 = vector.shape_cast %120 : vector<1x16x1xf32> to vector<16x1xf32>
    %122 = vector.broadcast %121 : vector<16x1xf32> to vector<16x32xf32>
    %123 = arith.mulf %122, %119 : vector<16x32xf32>
    %c0_71 = arith.constant 0 : index
    %c0_72 = arith.constant 0 : index
    %c0_73 = arith.constant 0 : index
    %124 = vector.load %arg22[%c0_71, %c0_72, %c0_73] : memref<1x16x32xf32, #tpu.memory_space<vmem>>, vector<1x16x32xf32>
    %125 = vector.shape_cast %124 : vector<1x16x32xf32> to vector<16x32xf32>
    %126 = vector.shape_cast %123 : vector<16x32xf32> to vector<1x16x32xf32>
    tpu.vector_store %arg22[%c0_71, %c0_72, %c0_73], %126 {strides = array<i32>} : memref<1x16x32xf32, #tpu.memory_space<vmem>>, vector<1x16x32xf32>,
    return
  }
  func.func @transform_0(%arg0: i32, %arg1: i32) -> (i32, i32, i32) {
    %c0_i32 = arith.constant 0 : i32
    %c0_i32_0 = arith.constant 0 : i32
    return %arg0, %arg1, %c0_i32 : i32, i32, i32
  }
  func.func @transform_1(%arg0: i32, %arg1: i32) -> (i32, i32, i32, i32) {
    %c0_i32 = arith.constant 0 : i32
    %c0_i32_0 = arith.constant 0 : i32
    %c0_i32_1 = arith.constant 0 : i32
    return %arg0, %c0_i32, %arg1, %c0_i32_0 : i32, i32, i32, i32
  }
  func.func @transform_2(%arg0: i32, %arg1: i32) -> (i32, i32, i32, i32) {
    %c0_i32 = arith.constant 0 : i32
    %c0_i32_0 = arith.constant 0 : i32
    %c0_i32_1 = arith.constant 0 : i32
    return %arg0, %c0_i32, %arg1, %c0_i32_0 : i32, i32, i32, i32
  }
  func.func @transform_3(%arg0: i32, %arg1: i32) -> (i32, i32, i32) {
    %c0_i32 = arith.constant 0 : i32
    %c0_i32_0 = arith.constant 0 : i32
    return %arg0, %arg1, %c0_i32 : i32, i32, i32
  }
  func.func @transform_4(%arg0: i32, %arg1: i32) -> (i32, i32) {
    %c0_i32 = arith.constant 0 : i32
    %c0_i32_0 = arith.constant 0 : i32
    %c0_i32_1 = arith.constant 0 : i32
    return %c0_i32, %c0_i32_0 : i32, i32
  }
  func.func @transform_5(%arg0: i32, %arg1: i32) -> (i32, i32) {
    %c0_i32 = arith.constant 0 : i32
    %c0_i32_0 = arith.constant 0 : i32
    %c0_i32_1 = arith.constant 0 : i32
    return %c0_i32, %c0_i32_0 : i32, i32
  }
  func.func @transform_6(%arg0: i32, %arg1: i32) -> (i32, i32) {
    %c0_i32 = arith.constant 0 : i32
    %c0_i32_0 = arith.constant 0 : i32
    %c0_i32_1 = arith.constant 0 : i32
    return %c0_i32, %c0_i32_0 : i32, i32
  }
  func.func @transform_7(%arg0: i32, %arg1: i32) -> (i32, i32) {
    %c0_i32 = arith.constant 0 : i32
    %c0_i32_0 = arith.constant 0 : i32
    %c0_i32_1 = arith.constant 0 : i32
    return %c0_i32, %c0_i32_0 : i32, i32
  }
  func.func @transform_8(%arg0: i32, %arg1: i32) -> (i32, i32) {
    %c0_i32 = arith.constant 0 : i32
    %c0_i32_0 = arith.constant 0 : i32
    %c0_i32_1 = arith.constant 0 : i32
    return %c0_i32, %c0_i32_0 : i32, i32
  }
  func.func @transform_9(%arg0: i32, %arg1: i32) -> (i32, i32) {
    %c0_i32 = arith.constant 0 : i32
    %c0_i32_0 = arith.constant 0 : i32
    %c0_i32_1 = arith.constant 0 : i32
    return %c0_i32, %c0_i32_0 : i32, i32
  }
  func.func @transform_10(%arg0: i32, %arg1: i32) -> (i32, i32) {
    %c0_i32 = arith.constant 0 : i32
    %c0_i32_0 = arith.constant 0 : i32
    %c0_i32_1 = arith.constant 0 : i32
    return %c0_i32, %c0_i32_0 : i32, i32
  }
  func.func @transform_11(%arg0: i32, %arg1: i32) -> (i32, i32) {
    %c0_i32 = arith.constant 0 : i32
    %c0_i32_0 = arith.constant 0 : i32
    %c0_i32_1 = arith.constant 0 : i32
    return %c0_i32, %c0_i32_0 : i32, i32
  }
  func.func @transform_12(%arg0: i32, %arg1: i32) -> (i32, i32) {
    %c0_i32 = arith.constant 0 : i32
    %c0_i32_0 = arith.constant 0 : i32
    %c0_i32_1 = arith.constant 0 : i32
    return %c0_i32, %c0_i32_0 : i32, i32
  }
  func.func @transform_13(%arg0: i32, %arg1: i32) -> (i32, i32) {
    %c0_i32 = arith.constant 0 : i32
    %c0_i32_0 = arith.constant 0 : i32
    %c0_i32_1 = arith.constant 0 : i32
    return %c0_i32, %c0_i32_0 : i32, i32
  }
  func.func @transform_14(%arg0: i32, %arg1: i32) -> (i32, i32) {
    %c0_i32 = arith.constant 0 : i32
    %c0_i32_0 = arith.constant 0 : i32
    %c0_i32_1 = arith.constant 0 : i32
    return %c0_i32, %c0_i32_0 : i32, i32
  }
  func.func @transform_15(%arg0: i32, %arg1: i32) -> (i32, i32) {
    %c0_i32 = arith.constant 0 : i32
    %c0_i32_0 = arith.constant 0 : i32
    %c0_i32_1 = arith.constant 0 : i32
    return %c0_i32, %c0_i32_0 : i32, i32
  }
  func.func @transform_16(%arg0: i32, %arg1: i32) -> (i32, i32) {
    %c0_i32 = arith.constant 0 : i32
    %c0_i32_0 = arith.constant 0 : i32
    %c0_i32_1 = arith.constant 0 : i32
    return %c0_i32, %c0_i32_0 : i32, i32
  }
  func.func @transform_17(%arg0: i32, %arg1: i32) -> (i32, i32) {
    %c0_i32 = arith.constant 0 : i32
    %c0_i32_0 = arith.constant 0 : i32
    %c0_i32_1 = arith.constant 0 : i32
    return %c0_i32, %c0_i32_0 : i32, i32
  }
  func.func @transform_18(%arg0: i32, %arg1: i32) -> (i32, i32) {
    %c0_i32 = arith.constant 0 : i32
    %c0_i32_0 = arith.constant 0 : i32
    %c0_i32_1 = arith.constant 0 : i32
    return %c0_i32, %c0_i32_0 : i32, i32
  }
  func.func @transform_19(%arg0: i32, %arg1: i32) -> (i32, i32) {
    %c0_i32 = arith.constant 0 : i32
    %c0_i32_0 = arith.constant 0 : i32
    %c0_i32_1 = arith.constant 0 : i32
    return %c0_i32, %c0_i32_0 : i32, i32
  }
  func.func @transform_20(%arg0: i32, %arg1: i32) -> (i32, i32, i32) {
    %c0_i32 = arith.constant 0 : i32
    %c0_i32_0 = arith.constant 0 : i32
    return %arg0, %arg1, %c0_i32 : i32, i32, i32
  }
}

module attributes {stable_mosaic.version = 11 : i64} {
  func.func @dec_layer_kernel(%arg0: i32, %arg1: i32, %arg2: memref<1x16x32xf32, #tpu.memory_space<vmem>>, %arg3: memref<1x4x16x64xbf16, #tpu.memory_space<vmem>>, %arg4: memref<1x4x16x32xbf16, #tpu.memory_space<vmem>>, %arg5: memref<1x16x1xf32, #tpu.memory_space<vmem>>, %arg6: memref<32x32xbf16, #tpu.memory_space<vmem>>, %arg7: memref<64x32xbf16, #tpu.memory_space<vmem>>, %arg8: memref<32x32xbf16, #tpu.memory_space<vmem>>, %arg9: memref<1x32xf32, #tpu.memory_space<vmem>>, %arg10: memref<32x32xbf16, #tpu.memory_space<vmem>>, %arg11: memref<1x32xf32, #tpu.memory_space<vmem>>, %arg12: memref<32x32xbf16, #tpu.memory_space<vmem>>, %arg13: memref<1x32xf32, #tpu.memory_space<vmem>>, %arg14: memref<32x128xbf16, #tpu.memory_space<vmem>>, %arg15: memref<1x128xf32, #tpu.memory_space<vmem>>, %arg16: memref<128x32xbf16, #tpu.memory_space<vmem>>, %arg17: memref<1x32xf32, #tpu.memory_space<vmem>>, %arg18: memref<1x32xf32, #tpu.memory_space<vmem>>, %arg19: memref<1x32xf32, #tpu.memory_space<vmem>>, %arg20: memref<1x32xf32, #tpu.memory_space<vmem>>, %arg21: memref<1x32xf32, #tpu.memory_space<vmem>>, %arg22: memref<1x16x32xf32, #tpu.memory_space<vmem>>) attributes {dimension_semantics = [#tpu.dimension_semantics<parallel>, #tpu.dimension_semantics<parallel>], iteration_bounds = array<i64: 2, 2>, scalar_prefetch = 0 : i64, scratch_operands = 0 : i64, tpu.core_type = #tpu.core_type<tc>, window_params = [{transform_indices = @transform_0, window_bounds = array<i64: 1, 16, 32>}, {transform_indices = @transform_1, window_bounds = array<i64: 1, 4, 16, 64>}, {transform_indices = @transform_2, window_bounds = array<i64: 1, 4, 16, 32>}, {transform_indices = @transform_3, window_bounds = array<i64: 1, 16, 1>}, {pipeline_mode = #tpu.pipeline_mode<synchronous>, transform_indices = @transform_4, window_bounds = array<i64: 32, 32>}, {pipeline_mode = #tpu.pipeline_mode<synchronous>, transform_indices = @transform_5, window_bounds = array<i64: 64, 32>}, {pipeline_mode = #tpu.pipeline_mode<synchronous>, transform_indices = @transform_6, window_bounds = array<i64: 32, 32>}, {pipeline_mode = #tpu.pipeline_mode<synchronous>, transform_indices = @transform_7, window_bounds = array<i64: 1, 32>}, {pipeline_mode = #tpu.pipeline_mode<synchronous>, transform_indices = @transform_8, window_bounds = array<i64: 32, 32>}, {pipeline_mode = #tpu.pipeline_mode<synchronous>, transform_indices = @transform_9, window_bounds = array<i64: 1, 32>}, {pipeline_mode = #tpu.pipeline_mode<synchronous>, transform_indices = @transform_10, window_bounds = array<i64: 32, 32>}, {pipeline_mode = #tpu.pipeline_mode<synchronous>, transform_indices = @transform_11, window_bounds = array<i64: 1, 32>}, {pipeline_mode = #tpu.pipeline_mode<synchronous>, transform_indices = @transform_12, window_bounds = array<i64: 32, 128>}, {pipeline_mode = #tpu.pipeline_mode<synchronous>, transform_indices = @transform_13, window_bounds = array<i64: 1, 128>}, {pipeline_mode = #tpu.pipeline_mode<synchronous>, transform_indices = @transform_14, window_bounds = array<i64: 128, 32>}, {pipeline_mode = #tpu.pipeline_mode<synchronous>, transform_indices = @transform_15, window_bounds = array<i64: 1, 32>}, {pipeline_mode = #tpu.pipeline_mode<synchronous>, transform_indices = @transform_16, window_bounds = array<i64: 1, 32>}, {pipeline_mode = #tpu.pipeline_mode<synchronous>, transform_indices = @transform_17, window_bounds = array<i64: 1, 32>}, {pipeline_mode = #tpu.pipeline_mode<synchronous>, transform_indices = @transform_18, window_bounds = array<i64: 1, 32>}, {pipeline_mode = #tpu.pipeline_mode<synchronous>, transform_indices = @transform_19, window_bounds = array<i64: 1, 32>}, {transform_indices = @transform_20, window_bounds = array<i64: 1, 16, 32>}]} {
    %c0 = arith.constant 0 : index
    %c0_0 = arith.constant 0 : index
    %c0_1 = arith.constant 0 : index
    %0 = vector.load %arg2[%c0, %c0_0, %c0_1] : memref<1x16x32xf32, #tpu.memory_space<vmem>>, vector<1x16x32xf32>
    %1 = vector.shape_cast %0 : vector<1x16x32xf32> to vector<16x32xf32>
    %2 = arith.truncf %1 : vector<16x32xf32> to vector<16x32xbf16>
    %c0_2 = arith.constant 0 : index
    %c0_3 = arith.constant 0 : index
    %3 = vector.load %arg6[%c0_2, %c0_3] : memref<32x32xbf16, #tpu.memory_space<vmem>>, vector<32x32xbf16>
    %cst = arith.constant dense<0.000000e+00> : vector<16x32xf32>
    %4 = tpu.matmul %2, %3, %cst {dimension_numbers = #tpu.dot_dimension_numbers<[1], [0], [0], [1], [0, 0, 1, 1], [], []>} : vector<16x32xbf16>, vector<32x32xbf16>, vector<16x32xf32> -> vector<16x32xf32>
    %c0_4 = arith.constant 0 : index
    %c0_5 = arith.constant 0 : index
    %5 = vector.load %arg9[%c0_4, %c0_5] : memref<1x32xf32, #tpu.memory_space<vmem>>, vector<1x32xf32>
    %6 = vector.broadcast %5 : vector<1x32xf32> to vector<16x32xf32>
    %7 = arith.addf %4, %6 : vector<16x32xf32>
    %c0_6 = arith.constant 0 : index
    %c0_7 = arith.constant 0 : index
    %c0_8 = arith.constant 0 : index
    %c0_9 = arith.constant 0 : index
    %8 = vector.load %arg3[%c0_6, %c0_7, %c0_8, %c0_9] : memref<1x4x16x64xbf16, #tpu.memory_space<vmem>>, vector<1x4x16x64xbf16>
    %9 = vector.shape_cast %8 : vector<1x4x16x64xbf16> to vector<4x16x64xbf16>
    %10 = vector.shape_cast %9 : vector<4x16x64xbf16> to vector<64x64xbf16>
    %c0_10 = arith.constant 0 : index
    %c0_11 = arith.constant 0 : index
    %c0_12 = arith.constant 0 : index
    %c0_13 = arith.constant 0 : index
    %11 = vector.load %arg4[%c0_10, %c0_11, %c0_12, %c0_13] : memref<1x4x16x32xbf16, #tpu.memory_space<vmem>>, vector<1x4x16x32xbf16>
    %12 = vector.shape_cast %11 : vector<1x4x16x32xbf16> to vector<4x16x32xbf16>
    %13 = vector.shape_cast %12 : vector<4x16x32xbf16> to vector<64x32xbf16>
    %c0_14 = arith.constant 0 : index
    %c0_15 = arith.constant 0 : index
    %14 = vector.load %arg7[%c0_14, %c0_15] : memref<64x32xbf16, #tpu.memory_space<vmem>>, vector<64x32xbf16>
    %cst_16 = arith.constant dense<0.000000e+00> : vector<64x32xf32>
    %15 = tpu.matmul %10, %14, %cst_16 {dimension_numbers = #tpu.dot_dimension_numbers<[1], [0], [0], [1], [0, 0, 1, 1], [], []>} : vector<64x64xbf16>, vector<64x32xbf16>, vector<64x32xf32> -> vector<64x32xf32>
    %c0_17 = arith.constant 0 : index
    %c0_18 = arith.constant 0 : index
    %16 = vector.load %arg8[%c0_17, %c0_18] : memref<32x32xbf16, #tpu.memory_space<vmem>>, vector<32x32xbf16>
    %cst_19 = arith.constant dense<0.000000e+00> : vector<64x32xf32>
    %17 = tpu.matmul %13, %16, %cst_19 {dimension_numbers = #tpu.dot_dimension_numbers<[1], [0], [0], [1], [0, 0, 1, 1], [], []>} : vector<64x32xbf16>, vector<32x32xbf16>, vector<64x32xf32> -> vector<64x32xf32>
    %18 = arith.addf %15, %17 : vector<64x32xf32>
    %19 = vector.shape_cast %18 : vector<64x32xf32> to vector<4x16x32xf32>
    %20 = vector.shape_cast %7 : vector<16x32xf32> to vector<1x16x32xf32>
    %21 = vector.broadcast %20 : vector<1x16x32xf32> to vector<4x16x32xf32>
    %22 = arith.addf %19, %21 : vector<4x16x32xf32>
    %cst_20 = arith.constant 5.000000e-01 : f32
    %23 = vector.broadcast %cst_20 : f32 to vector<4x16x32xf32>
    %24 = arith.mulf %23, %22 : vector<4x16x32xf32>
    %cst_21 = arith.constant 0.707106769 : f32
    %25 = vector.broadcast %cst_21 : f32 to vector<4x16x32xf32>
    %26 = arith.mulf %22, %25 : vector<4x16x32xf32>
    %27 = math.erf %26 : vector<4x16x32xf32>
    %cst_22 = arith.constant 1.000000e+00 : f32
    %28 = vector.broadcast %cst_22 : f32 to vector<4x16x32xf32>
    %29 = arith.addf %28, %27 : vector<4x16x32xf32>
    %30 = arith.mulf %24, %29 : vector<4x16x32xf32>
    %31 = arith.truncf %30 : vector<4x16x32xf32> to vector<4x16x32xbf16>
    %32 = vector.shape_cast %31 : vector<4x16x32xbf16> to vector<64x32xbf16>
    %c0_23 = arith.constant 0 : index
    %c0_24 = arith.constant 0 : index
    %33 = vector.load %arg10[%c0_23, %c0_24] : memref<32x32xbf16, #tpu.memory_space<vmem>>, vector<32x32xbf16>
    %cst_25 = arith.constant dense<0.000000e+00> : vector<64x32xf32>
    %34 = tpu.matmul %32, %33, %cst_25 {dimension_numbers = #tpu.dot_dimension_numbers<[1], [0], [0], [1], [0, 0, 1, 1], [], []>} : vector<64x32xbf16>, vector<32x32xbf16>, vector<64x32xf32> -> vector<64x32xf32>
    %c0_26 = arith.constant 0 : index
    %c0_27 = arith.constant 0 : index
    %35 = vector.load %arg11[%c0_26, %c0_27] : memref<1x32xf32, #tpu.memory_space<vmem>>, vector<1x32xf32>
    %36 = vector.broadcast %35 : vector<1x32xf32> to vector<64x32xf32>
    %37 = arith.addf %34, %36 : vector<64x32xf32>
    %cst_28 = arith.constant 5.000000e-01 : f32
    %38 = vector.broadcast %cst_28 : f32 to vector<64x32xf32>
    %39 = arith.mulf %38, %37 : vector<64x32xf32>
    %cst_29 = arith.constant 0.707106769 : f32
    %40 = vector.broadcast %cst_29 : f32 to vector<64x32xf32>
    %41 = arith.mulf %37, %40 : vector<64x32xf32>
    %42 = math.erf %41 : vector<64x32xf32>
    %cst_30 = arith.constant 1.000000e+00 : f32
    %43 = vector.broadcast %cst_30 : f32 to vector<64x32xf32>
    %44 = arith.addf %43, %42 : vector<64x32xf32>
    %45 = arith.mulf %39, %44 : vector<64x32xf32>
    %46 = vector.shape_cast %45 : vector<64x32xf32> to vector<4x16x32xf32>
    %cst_31 = arith.constant dense<0.000000e+00> : vector<16x32xf32>
    %47 = vector.multi_reduction <add>, %46, %cst_31 [0] : vector<4x16x32xf32> to vector<16x32xf32>
    %48 = arith.truncf %47 : vector<16x32xf32> to vector<16x32xbf16>
    %c0_32 = arith.constant 0 : index
    %c0_33 = arith.constant 0 : index
    %49 = vector.load %arg12[%c0_32, %c0_33] : memref<32x32xbf16, #tpu.memory_space<vmem>>, vector<32x32xbf16>
    %cst_34 = arith.constant dense<0.000000e+00> : vector<16x32xf32>
    %50 = tpu.matmul %48, %49, %cst_34 {dimension_numbers = #tpu.dot_dimension_numbers<[1], [0], [0], [1], [0, 0, 1, 1], [], []>} : vector<16x32xbf16>, vector<32x32xbf16>, vector<16x32xf32> -> vector<16x32xf32>
    %c0_35 = arith.constant 0 : index
    %c0_36 = arith.constant 0 : index
    %51 = vector.load %arg13[%c0_35, %c0_36] : memref<1x32xf32, #tpu.memory_space<vmem>>, vector<1x32xf32>
    %52 = vector.broadcast %51 : vector<1x32xf32> to vector<16x32xf32>
    %53 = arith.addf %50, %52 : vector<16x32xf32>
    %54 = arith.addf %1, %53 : vector<16x32xf32>
    %c0_37 = arith.constant 0 : index
    %c0_38 = arith.constant 0 : index
    %55 = vector.load %arg18[%c0_37, %c0_38] : memref<1x32xf32, #tpu.memory_space<vmem>>, vector<1x32xf32>
    %c0_39 = arith.constant 0 : index
    %c0_40 = arith.constant 0 : index
    %56 = vector.load %arg19[%c0_39, %c0_40] : memref<1x32xf32, #tpu.memory_space<vmem>>, vector<1x32xf32>
    %cst_41 = arith.constant dense<0.000000e+00> : vector<16xf32>
    %57 = vector.multi_reduction <add>, %54, %cst_41 [1] : vector<16x32xf32> to vector<16xf32>
    %58 = vector.shape_cast %57 : vector<16xf32> to vector<16x1xf32>
    %cst_42 = arith.constant 3.200000e+01 : f32
    %59 = vector.broadcast %cst_42 : f32 to vector<16x1xf32>
    %60 = arith.divf %58, %59 : vector<16x1xf32>
    %61 = vector.broadcast %60 : vector<16x1xf32> to vector<16x32xf32>
    %62 = arith.subf %54, %61 : vector<16x32xf32>
    %63 = arith.mulf %62, %62 : vector<16x32xf32>
    %cst_43 = arith.constant dense<0.000000e+00> : vector<16xf32>
    %64 = vector.multi_reduction <add>, %63, %cst_43 [1] : vector<16x32xf32> to vector<16xf32>
    %65 = vector.shape_cast %64 : vector<16xf32> to vector<16x1xf32>
    %cst_44 = arith.constant 3.200000e+01 : f32
    %66 = vector.broadcast %cst_44 : f32 to vector<16x1xf32>
    %67 = arith.divf %65, %66 : vector<16x1xf32>
    %cst_45 = arith.constant 9.99999974E-6 : f32
    %68 = vector.broadcast %cst_45 : f32 to vector<16x1xf32>
    %69 = arith.addf %67, %68 : vector<16x1xf32>
    %70 = math.rsqrt %69 : vector<16x1xf32>
    %71 = vector.broadcast %70 : vector<16x1xf32> to vector<16x32xf32>
    %72 = arith.mulf %62, %71 : vector<16x32xf32>
    %73 = vector.broadcast %55 : vector<1x32xf32> to vector<16x32xf32>
    %74 = arith.mulf %72, %73 : vector<16x32xf32>
    %75 = vector.broadcast %56 : vector<1x32xf32> to vector<16x32xf32>
    %76 = arith.addf %74, %75 : vector<16x32xf32>
    %77 = arith.truncf %76 : vector<16x32xf32> to vector<16x32xbf16>
    %c0_46 = arith.constant 0 : index
    %c0_47 = arith.constant 0 : index
    %78 = vector.load %arg14[%c0_46, %c0_47] : memref<32x128xbf16, #tpu.memory_space<vmem>>, vector<32x128xbf16>
    %cst_48 = arith.constant dense<0.000000e+00> : vector<16x128xf32>
    %79 = tpu.matmul %77, %78, %cst_48 {dimension_numbers = #tpu.dot_dimension_numbers<[1], [0], [0], [1], [0, 0, 1, 1], [], []>} : vector<16x32xbf16>, vector<32x128xbf16>, vector<16x128xf32> -> vector<16x128xf32>
    %c0_49 = arith.constant 0 : index
    %c0_50 = arith.constant 0 : index
    %80 = vector.load %arg15[%c0_49, %c0_50] : memref<1x128xf32, #tpu.memory_space<vmem>>, vector<1x128xf32>
    %81 = vector.broadcast %80 : vector<1x128xf32> to vector<16x128xf32>
    %82 = arith.addf %79, %81 : vector<16x128xf32>
    %cst_51 = arith.constant 5.000000e-01 : f32
    %83 = vector.broadcast %cst_51 : f32 to vector<16x128xf32>
    %84 = arith.mulf %83, %82 : vector<16x128xf32>
    %cst_52 = arith.constant 0.707106769 : f32
    %85 = vector.broadcast %cst_52 : f32 to vector<16x128xf32>
    %86 = arith.mulf %82, %85 : vector<16x128xf32>
    %87 = math.erf %86 : vector<16x128xf32>
    %cst_53 = arith.constant 1.000000e+00 : f32
    %88 = vector.broadcast %cst_53 : f32 to vector<16x128xf32>
    %89 = arith.addf %88, %87 : vector<16x128xf32>
    %90 = arith.mulf %84, %89 : vector<16x128xf32>
    %91 = arith.truncf %90 : vector<16x128xf32> to vector<16x128xbf16>
    %c0_54 = arith.constant 0 : index
    %c0_55 = arith.constant 0 : index
    %92 = vector.load %arg16[%c0_54, %c0_55] : memref<128x32xbf16, #tpu.memory_space<vmem>>, vector<128x32xbf16>
    %cst_56 = arith.constant dense<0.000000e+00> : vector<16x32xf32>
    %93 = tpu.matmul %91, %92, %cst_56 {dimension_numbers = #tpu.dot_dimension_numbers<[1], [0], [0], [1], [0, 0, 1, 1], [], []>} : vector<16x128xbf16>, vector<128x32xbf16>, vector<16x32xf32> -> vector<16x32xf32>
    %94 = arith.addf %76, %93 : vector<16x32xf32>
    %c0_57 = arith.constant 0 : index
    %c0_58 = arith.constant 0 : index
    %95 = vector.load %arg17[%c0_57, %c0_58] : memref<1x32xf32, #tpu.memory_space<vmem>>, vector<1x32xf32>
    %96 = vector.broadcast %95 : vector<1x32xf32> to vector<16x32xf32>
    %97 = arith.addf %94, %96 : vector<16x32xf32>
    %c0_59 = arith.constant 0 : index
    %c0_60 = arith.constant 0 : index
    %98 = vector.load %arg20[%c0_59, %c0_60] : memref<1x32xf32, #tpu.memory_space<vmem>>, vector<1x32xf32>
    %c0_61 = arith.constant 0 : index
    %c0_62 = arith.constant 0 : index
    %99 = vector.load %arg21[%c0_61, %c0_62] : memref<1x32xf32, #tpu.memory_space<vmem>>, vector<1x32xf32>
    %cst_63 = arith.constant dense<0.000000e+00> : vector<16xf32>
    %100 = vector.multi_reduction <add>, %97, %cst_63 [1] : vector<16x32xf32> to vector<16xf32>
    %101 = vector.shape_cast %100 : vector<16xf32> to vector<16x1xf32>
    %cst_64 = arith.constant 3.200000e+01 : f32
    %102 = vector.broadcast %cst_64 : f32 to vector<16x1xf32>
    %103 = arith.divf %101, %102 : vector<16x1xf32>
    %104 = vector.broadcast %103 : vector<16x1xf32> to vector<16x32xf32>
    %105 = arith.subf %97, %104 : vector<16x32xf32>
    %106 = arith.mulf %105, %105 : vector<16x32xf32>
    %cst_65 = arith.constant dense<0.000000e+00> : vector<16xf32>
    %107 = vector.multi_reduction <add>, %106, %cst_65 [1] : vector<16x32xf32> to vector<16xf32>
    %108 = vector.shape_cast %107 : vector<16xf32> to vector<16x1xf32>
    %cst_66 = arith.constant 3.200000e+01 : f32
    %109 = vector.broadcast %cst_66 : f32 to vector<16x1xf32>
    %110 = arith.divf %108, %109 : vector<16x1xf32>
    %cst_67 = arith.constant 9.99999974E-6 : f32
    %111 = vector.broadcast %cst_67 : f32 to vector<16x1xf32>
    %112 = arith.addf %110, %111 : vector<16x1xf32>
    %113 = math.rsqrt %112 : vector<16x1xf32>
    %114 = vector.broadcast %113 : vector<16x1xf32> to vector<16x32xf32>
    %115 = arith.mulf %105, %114 : vector<16x32xf32>
    %116 = vector.broadcast %98 : vector<1x32xf32> to vector<16x32xf32>
    %117 = arith.mulf %115, %116 : vector<16x32xf32>
    %118 = vector.broadcast %99 : vector<1x32xf32> to vector<16x32xf32>
    %119 = arith.addf %117, %118 : vector<16x32xf32>
    %c0_68 = arith.constant 0 : index
    %c0_69 = arith.constant 0 : index
    %c0_70 = arith.constant 0 : index
    %120 = vector.load %arg5[%c0_68, %c0_69, %c0_70] : memref<1x16x1xf32, #tpu.memory_space<vmem>>, vector<1x16x1xf32>
    %121 = vector.shape_cast %120 : vector<1x16x1xf32> to vector<16x1xf32>
    %122 = vector.broadcast %121 : vector<16x1xf32> to vector<16x32xf32>
    %123 = arith.mulf %122, %119 : vector<16x32xf32>
    %c0_71 = arith.constant 0 : index
    %c0_72 = arith.constant 0 : index
    %c0_73 = arith.constant 0 : index
    %124 = vector.load %arg22[%c0_71, %c0_72, %c0_73] : memref<1x16x32xf32, #tpu.memory_space<vmem>>, vector<1x16x32xf32>
    %125 = vector.shape_cast %124 : vector<1x16x32xf32> to vector<16x32xf32>
    %126 = vector.shape_cast %123 : vector<16x32xf32> to vector<1x16x32xf32>
    tpu.vector_store %arg22[%c0_71, %c0_72, %c0_73], %126 {strides = array<i32>} : memref<1x16x32xf32, #tpu.memory_space<vmem>>, vector<1x16x32xf32>,
    return
  }
  func.func @transform_0(%arg0: i32, %arg1: i32) -> (i32, i32, i32) {
    %c0_i32 = arith.constant 0 : i32
    %c0_i32_0 = arith.constant 0 : i32
    return %arg0, %arg1, %c0_i32 : i32, i32, i32
  }
  func.func @transform_1(%arg0: i32, %arg1: i32) -> (i32, i32, i32, i32) {
    %c0_i32 = arith.constant 0 : i32
    %c0_i32_0 = arith.constant 0 : i32
    %c0_i32_1 = arith.constant 0 : i32
    return %arg0, %c0_i32, %arg1, %c0_i32_0 : i32, i32, i32, i32
  }
  func.func @transform_2(%arg0: i32, %arg1: i32) -> (i32, i32, i32, i32) {
    %c0_i32 = arith.constant 0 : i32
    %c0_i32_0 = arith.constant 0 : i32
    %c0_i32_1 = arith.constant 0 : i32
    return %arg0, %c0_i32, %arg1, %c0_i32_0 : i32, i32, i32, i32
  }
  func.func @transform_3(%arg0: i32, %arg1: i32) -> (i32, i32, i32) {
    %c0_i32 = arith.constant 0 : i32
    %c0_i32_0 = arith.constant 0 : i32
    return %arg0, %arg1, %c0_i32 : i32, i32, i32
  }
  func.func @transform_4(%arg0: i32, %arg1: i32) -> (i32, i32) {
    %c0_i32 = arith.constant 0 : i32
    %c0_i32_0 = arith.constant 0 : i32
    %c0_i32_1 = arith.constant 0 : i32
    return %c0_i32, %c0_i32_0 : i32, i32
  }
  func.func @transform_5(%arg0: i32, %arg1: i32) -> (i32, i32) {
    %c0_i32 = arith.constant 0 : i32
    %c0_i32_0 = arith.constant 0 : i32
    %c0_i32_1 = arith.constant 0 : i32
    return %c0_i32, %c0_i32_0 : i32, i32
  }
  func.func @transform_6(%arg0: i32, %arg1: i32) -> (i32, i32) {
    %c0_i32 = arith.constant 0 : i32
    %c0_i32_0 = arith.constant 0 : i32
    %c0_i32_1 = arith.constant 0 : i32
    return %c0_i32, %c0_i32_0 : i32, i32
  }
  func.func @transform_7(%arg0: i32, %arg1: i32) -> (i32, i32) {
    %c0_i32 = arith.constant 0 : i32
    %c0_i32_0 = arith.constant 0 : i32
    %c0_i32_1 = arith.constant 0 : i32
    return %c0_i32, %c0_i32_0 : i32, i32
  }
  func.func @transform_8(%arg0: i32, %arg1: i32) -> (i32, i32) {
    %c0_i32 = arith.constant 0 : i32
    %c0_i32_0 = arith.constant 0 : i32
    %c0_i32_1 = arith.constant 0 : i32
    return %c0_i32, %c0_i32_0 : i32, i32
  }
  func.func @transform_9(%arg0: i32, %arg1: i32) -> (i32, i32) {
    %c0_i32 = arith.constant 0 : i32
    %c0_i32_0 = arith.constant 0 : i32
    %c0_i32_1 = arith.constant 0 : i32
    return %c0_i32, %c0_i32_0 : i32, i32
  }
  func.func @transform_10(%arg0: i32, %arg1: i32) -> (i32, i32) {
    %c0_i32 = arith.constant 0 : i32
    %c0_i32_0 = arith.constant 0 : i32
    %c0_i32_1 = arith.constant 0 : i32
    return %c0_i32, %c0_i32_0 : i32, i32
  }
  func.func @transform_11(%arg0: i32, %arg1: i32) -> (i32, i32) {
    %c0_i32 = arith.constant 0 : i32
    %c0_i32_0 = arith.constant 0 : i32
    %c0_i32_1 = arith.constant 0 : i32
    return %c0_i32, %c0_i32_0 : i32, i32
  }
  func.func @transform_12(%arg0: i32, %arg1: i32) -> (i32, i32) {
    %c0_i32 = arith.constant 0 : i32
    %c0_i32_0 = arith.constant 0 : i32
    %c0_i32_1 = arith.constant 0 : i32
    return %c0_i32, %c0_i32_0 : i32, i32
  }
  func.func @transform_13(%arg0: i32, %arg1: i32) -> (i32, i32) {
    %c0_i32 = arith.constant 0 : i32
    %c0_i32_0 = arith.constant 0 : i32
    %c0_i32_1 = arith.constant 0 : i32
    return %c0_i32, %c0_i32_0 : i32, i32
  }
  func.func @transform_14(%arg0: i32, %arg1: i32) -> (i32, i32) {
    %c0_i32 = arith.constant 0 : i32
    %c0_i32_0 = arith.constant 0 : i32
    %c0_i32_1 = arith.constant 0 : i32
    return %c0_i32, %c0_i32_0 : i32, i32
  }
  func.func @transform_15(%arg0: i32, %arg1: i32) -> (i32, i32) {
    %c0_i32 = arith.constant 0 : i32
    %c0_i32_0 = arith.constant 0 : i32
    %c0_i32_1 = arith.constant 0 : i32
    return %c0_i32, %c0_i32_0 : i32, i32
  }
  func.func @transform_16(%arg0: i32, %arg1: i32) -> (i32, i32) {
    %c0_i32 = arith.constant 0 : i32
    %c0_i32_0 = arith.constant 0 : i32
    %c0_i32_1 = arith.constant 0 : i32
    return %c0_i32, %c0_i32_0 : i32, i32
  }
  func.func @transform_17(%arg0: i32, %arg1: i32) -> (i32, i32) {
    %c0_i32 = arith.constant 0 : i32
    %c0_i32_0 = arith.constant 0 : i32
    %c0_i32_1 = arith.constant 0 : i32
    return %c0_i32, %c0_i32_0 : i32, i32
  }
  func.func @transform_18(%arg0: i32, %arg1: i32) -> (i32, i32) {
    %c0_i32 = arith.constant 0 : i32
    %c0_i32_0 = arith.constant 0 : i32
    %c0_i32_1 = arith.constant 0 : i32
    return %c0_i32, %c0_i32_0 : i32, i32
  }
  func.func @transform_19(%arg0: i32, %arg1: i32) -> (i32, i32) {
    %c0_i32 = arith.constant 0 : i32
    %c0_i32_0 = arith.constant 0 : i32
    %c0_i32_1 = arith.constant 0 : i32
    return %c0_i32, %c0_i32_0 : i32, i32
  }
  func.func @transform_20(%arg0: i32, %arg1: i32) -> (i32, i32, i32) {
    %c0_i32 = arith.constant 0 : i32
    %c0_i32_0 = arith.constant 0 : i32
    return %arg0, %arg1, %c0_i32 : i32, i32, i32
  }
}

</mosaic_0001>

<bundles_post_ra>
// kernel: mpnn_decoder_forward.3
= control target key start
LH: loop header
LB: loop body
LE: loop exit
PB: predicated region body
PF: predicated region fallthrough
CT: control target
= control target key end

     0   :  { %s3860_s0 = inlined_call_operand.vmem [shape: f32[2,32,32], index: 0, kind: input, shape index: {}]   ;;  %s3861_s1 = inlined_call_operand.vmem [shape: bf16[2,4,32,64], index: 1, kind: input, shape index: {}]   ;;  %s3862_s2 = inlined_call_operand.vmem [shape: bf16[2,4,32,32], index: 2, kind: input, shape index: {}]   ;;  %s3863_s3 = inlined_call_operand.vmem [shape: f32[2,32,1], index: 3, kind: input, shape index: {}]   ;;  %s3864_s4 = inlined_call_operand.vmem [shape: bf16[32,32], index: 4, kind: input, shape index: {}]   ;;  %s3865_s5 = inlined_call_operand.vmem [shape: bf16[64,32], index: 5, kind: input, shape index: {}]   ;;  %s3866_s6 = inlined_call_operand.vmem [shape: bf16[32,32], index: 6, kind: input, shape index: {}]   ;;  %s3867_s7 = inlined_call_operand.vmem [shape: f32[1,32], index: 7, kind: input, shape index: {}]   ;;  %s3868_s8 = inlined_call_operand.vmem [shape: bf16[32,32], index: 8, kind: input, shape index: {}]   ;;  %s3869_s9 = inlined_call_operand.vmem [shape: f32[1,32], index: 9, kind: input, shape index: {}]   ;;  %s3870_s10 = inlined_call_operand.vmem [shape: bf16[32,32], index: 10, kind: input, shape index: {}]   ;;  %s3871_s11 = inlined_call_operand.vmem [shape: f32[1,32], index: 11, kind: input, shape index: {}]   ;;  %s3872_s12 = inlined_call_operand.vmem [shape: bf16[32,128], index: 12, kind: input, shape index: {}]   ;;  %s3873_s13 = inlined_call_operand.vmem [shape: f32[1,128], index: 13, kind: input, shape index: {}]   ;;  %s3874_s14 = inlined_call_operand.vmem [shape: bf16[128,32], index: 14, kind: input, shape index: {}]   ;;  %s3875_s15 = inlined_call_operand.vmem [shape: f32[1,32], index: 15, kind: input, shape index: {}]   ;;  %s3876_s16 = inlined_call_operand.vmem [shape: f32[1,32], index: 16, kind: input, shape index: {}]   ;;  %s3877_s17 = inlined_call_operand.vmem [shape: f32[1,32], index: 17, kind: input, shape index: {}]   ;;  %s3878_s18 = inlined_call_operand.vmem [shape: f32[1,32], index: 18, kind: input, shape index: {}]   ;;  %s3879_s19 = inlined_call_operand.vmem [shape: f32[1,32], index: 19, kind: input, shape index: {}]   ;;  %s3880_s20 = inlined_call_operand.vmem [shape: f32[2,32,32], index: 20, kind: output, shape index: {}]  }
   0x1   :  { %3884 = sst [smem:[#allocation7_spill]] %s3860_s0 }
   0x2   :  { %3885 = sst [smem:[#allocation8_spill]] %s3861_s1 }
   0x3   :  { %3886 = sst [smem:[#allocation9_spill]] %s3862_s2 }
   0x4   :  { %3887 = sst [smem:[#allocation10_spill]] %s3863_s3 }
   0x5   :  { %3888 = sst [smem:[#allocation11_spill]] %s3864_s4 }
   0x6   :  { %3889 = sst [smem:[#allocation12_spill]] %s3875_s15 }
   0x7   :  { %3890 = sst [smem:[#allocation13_spill]] %s3878_s18 }
   0x8   :  { %3891 = sst [smem:[#allocation14_spill]] %s3879_s19 }
   0x9   :  { %3892 = sst [smem:[#allocation15_spill]] %s3880_s20 }
   0xa   :  { %s2970_s1 = smov 0   ;;  %s2972_s22 = smov 0  }
   0xb   :  { %s2974_s23 = smov 0   ;;  %s2976_s24 = smov 0  }
   0xc   :  { %s2978_s2 = smov 0   ;;  %s2980_s25 = smov 0  }
   0xd   :  { %s2982_s3 = smov 0  }
   0xe LB: > { %s39_s26 = sadd.s32 1, %s2853_s2  ;;  %s42_s27 = sadd.s32 1, %s2857_s25  ;;  %s2861_s3 = sphi %s2982_s3, %s30_s3   ;;  %s2857_s25 = sphi %s2980_s25, %s3942_s25   ;;  %s2853_s2 = sphi %s2978_s2, %s3941_s2   ;;  %s2849_s24 = sphi %s2976_s24, %s3940_s24   ;;  %s2845_s23 = sphi %s2974_s23, %s3939_s23   ;;  %s2841_s22 = sphi %s2972_s22, %s3938_s22   ;;  %s2837_s1 = sphi %s2970_s1, %s3937_s1  }
   0xf   : > { %p40_p0 = scmp.ge.s32.totalorder %s39_s26, 2  ;;  %p86_p1 = scmp.ne.s32.totalorder %s2841_s22, %s2837_s1 }
  0x10   : > { %p87_p2 = scmp.eq.s32.totalorder %s2861_s3, 0  ;;  %s79_s0 = sadd.s32 1, %s2841_s22 }
  0x11   : > { %s3944_s26 = smov (%p40_p0, %s39_s26), 0  ;;  %s3946_s27 = smov (!%p40_p0, %s42_s27), %s2857_s25 }
  0x12   : > { %3893 = sst [smem:[#allocation4_spill]] %s3944_s26  ;;  %p3013_p3 = por %p87_p2, %p86_p1 }
  0x13   : > { %p44_p4 = scmp.ge.s32.totalorder %s3946_s27, 2  ;;  %s75_s4 = ssub.s32 %s2853_s2, %s3944_s26 }
  0x14   : > { %p2484_p6 = scmp.ge.s32.totalorder %s2861_s3, 4 }
  0x15   : > { %s3948_s27 = smov (%p44_p4, %s3946_s27), 0 }
  0x16   : > { %3895 = sst [smem:[#allocation5_spill]] %s3948_s27  ;;  %s74_s29 = ssub.s32 %s2857_s25, %s3948_s27 }
  0x17   : > { %s76_s30 = sor.u32 %s75_s4, %s74_s29 }
  0x18   : > { %p77_p5 = scmp.eq.s32.totalorder %s76_s30, 0  ;;  %580 = sbr.rel (%p2484_p6) target bundleno = 57 (0x39), region = 80 }
  0x1a   : > { %s3025_s21 = scalar_select %p77_p5, %s2841_s22, %s79_s0  }
  0x1c   : > { %3896 = sst [smem:[#allocation6_spill]] %s3025_s21 }
  0x1d   : > { %596 = sbr.rel (!%p3013_p3) target bundleno = 43 (0x2b), region = 88  ;;  %s598_s20 = sand.u32 (%p3013_p3), 1, %s2841_s22  }
  0x1e   : > { %s2486_s26 = sshll.u32 (%p3013_p3), %s2853_s2, 1  ;;  %s2485_s19 = sshll.u32 (%p3013_p3), %s598_s20, 5 }
  0x1f   : > { %s2487_s18 = sshll.u32 (%p3013_p3), %s2857_s25, 4  ;;  %s3897_s30 = sld [smem:[#allocation8_spill]] (%p3013_p3) }
  0x20   : > { %s603_s15 = sadd.s32 (%p3013_p3), %s2487_s18, %s2486_s26  ;;  %s600_s21 = scalar_lea.vmem (%p3013_p3), [#allocation2], %s2485_s19 }
  0x21   : > { %s2488_s27 = sshll.u32 (%p3013_p3), %s603_s15, 2 }
  0x25   : > { %s605_s0 = scalar_lea.vmem %s3897_s30, %s2488_s27 }
  0x26   : > { %v622_v0 = vld [vmem:[%s605_s0] sm:$0xff]   ;;  %v626_v1 = vld [vmem:[%s605_s0 + $0x10] sm:$0xff]  }
  0x27   : > { %v630_v2 = vld [vmem:[%s605_s0 + $0x20] sm:$0xff]   ;;  %623 = vst [vmem:[%s600_s21] sm:$0xff] %v622_v0   ;;  %v634_v3 = vld [vmem:[%s605_s0 + $0x30] sm:$0xff]  }
  0x28   : > { %627 = vst [vmem:[%s600_s21 + $0x8] sm:$0xff] %v626_v1  }
  0x29   : > { %631 = vst [vmem:[%s600_s21 + $0x10] sm:$0xff] %v630_v2  }
  0x2a   : > { %635 = vst [vmem:[%s600_s21 + $0x18] sm:$0xff] %v634_v3  }
  0x2b PF: > { %677 = sbr.rel (!%p3013_p3) target bundleno = 57 (0x39), region = 129  ;;  %s679_s15 = sand.u32 (%p3013_p3), 1, %s2841_s22  }
  0x2c   : > { %s2490_s18 = sshll.u32 (%p3013_p3), %s2853_s2, 1  ;;  %s2489_s20 = sshll.u32 (%p3013_p3), %s679_s15, 5 }
  0x2d   : > { %s2491_s26 = sshll.u32 (%p3013_p3), %s2857_s25, 4  ;;  %s3898_s30 = sld [smem:[#allocation9_spill]] (%p3013_p3) }
  0x2e   : > { %s684_s27 = sadd.s32 (%p3013_p3), %s2491_s26, %s2490_s18  ;;  %s681_s21 = scalar_lea.vmem (%p3013_p3), [#allocation3], %s2489_s20 }
  0x2f   : > { %s2492_s4 = sshll.u32 (%p3013_p3), %s684_s27, 2 }
  0x33   : > { %s686_s0 = scalar_lea.vmem %s3898_s30, %s2492_s4 }
  0x34   : > { %v703_v4 = vld [vmem:[%s686_s0] sm:$0xff]   ;;  %v707_v5 = vld [vmem:[%s686_s0 + $0x10] sm:$0xff]  }
  0x35   : > { %v711_v6 = vld [vmem:[%s686_s0 + $0x20] sm:$0xff]   ;;  %704 = vst [vmem:[%s681_s21] sm:$0xff] %v703_v4   ;;  %v715_v7 = vld [vmem:[%s686_s0 + $0x30] sm:$0xff]  }
  0x36   : > { %708 = vst [vmem:[%s681_s21 + $0x8] sm:$0xff] %v707_v5  }
  0x37   : > { %712 = vst [vmem:[%s681_s21 + $0x10] sm:$0xff] %v711_v6  }
  0x38   : > { %716 = vst [vmem:[%s681_s21 + $0x18] sm:$0xff] %v715_v7  }
  0x39 PF: > { %p2493_p7 = scmp.ge.s32.totalorder %s2861_s3, 1  ;;  %p770_p8 = scmp.lt.s32.totalorder %s2861_s3, 5 }
  0x3b   : > { %p771_p9 = pnand %p2493_p7, %p770_p8 }
  0x3c   : > { %s3899_s26 = sld [smem:[#allocation11_spill]] (!%p771_p9)  ;;  %s2496_s27 = sshll.u32 (!%p771_p9), %s2845_s23, 1 }
  0x3d   : > { %774 = sbr.rel (%p771_p9) target bundleno = 1549 (0x60d), region = 174  ;;  %p868_p10 = scmp.lt.s32.totalorder (!%p771_p9), %s2849_s24, 1 }
  0x3e   : > { %p870_p11 = scmp.lt.s32.totalorder (!%p771_p9), %s2496_s27, 3  ;;  %s777_s19 = sand.u32 (!%p771_p9), 1, %s2837_s1  }
  0x3f   : > { %s2494_s20 = sshll.u32 (!%p771_p9), %s777_s19, 5  ;;  %s3900_s23 = sld [smem:[#allocation7_spill]] (!%p771_p9) }
  0x40   : > { %s786_s0 = scalar_lea.vmem (!%p771_p9), [#allocation3], %s2494_s20  ;;  %s779_s19 = scalar_lea.vmem (!%p771_p9), [#allocation2], %s2494_s20 }
  0x41   : > { %s3929_s4 = sld [smem:[#allocation12_spill]] (!%p771_p9) }
  0x42   : > { %v2673_v8 = vld [vmem:[%s3865_s5 + $0x18] sm:$0xff]  ;;  %v2661_v9 = vld [vmem:[%s3899_s26 + $0x8] sm:$0xff]  ;;  %v2672_v11 = vld [vmem:[%s3865_s5 + $0x10] sm:$0xff]  ;;  %s3950_s24 = smov (!%p868_p10, %s2849_s24), 1  ;;  %s3952_s27 = smov (!%p870_p11, %s2496_s27), 3  ;;  %vm923_vm0 = vcmask 261120  }
  0x43   : > { %v2675_v10 = vld [vmem:[%s3866_s6 + $0x8] sm:$0xff]  ;;  %1103 = vmatpush.bf16.msra.mxu2 %v2673_v8  ;;  %933 = vmatpush.bf16.msra.mxu0 %v2661_v9  ;;  %v2660_v12 = vld [vmem:[%s3899_s26] sm:$0xff]  ;;  %s2497_s18 = sshll.u32 %s3950_s24, 2  ;;  %vm1086_vm1 = vcmask 523264   ;;  %v2668_v23 = vld [vmem:[%s786_s0 + $0x10] sm:$0xff]  ;;  %s3930_s21 = sld [smem:[#allocation10_spill]] }
  0x44   : > { %1019 = vmatpush.bf16.msra.mxu1 %v2675_v10  ;;  %v2674_v13 = vld [vmem:[%s3866_s6] sm:$0xff]  ;;  %s873_s1 = sadd.s32 %s2497_s18, %s3952_s27  ;;  %v2671_v14 = vld [vmem:[%s3865_s5 + $0x8] sm:$0xff]  ;;  %v2664_v24 = vld [vmem:[%s779_s19 + $0x10] sm:$0xff]  ;;  %s3931_s27 = sld [smem:[#allocation13_spill]] }
  0x45   : > { %s3071_s30 = sshll.u32 %s873_s1, 3  ;;  %v2666_v15 = vld [vmem:[%s786_s0] sm:$0xff]  ;;  %v2667_v21 = vld [vmem:[%s786_s0 + $0x8] sm:$0xff]  ;;  %v2669_v25 = vld [vmem:[%s786_s0 + $0x18] sm:$0xff]  ;;  %s3932_s20 = sld [smem:[#allocation14_spill]] }
  0x46   : > { %s3077_s15 = scalar_lea.vmem %s3900_s23, %s3071_s30  ;;  %v2670_v19 = vld [vmem:[%s3865_s5] sm:$0xff]  ;;  %v2663_v22 = vld [vmem:[%s779_s19 + $0x8] sm:$0xff]  ;;  %v2665_v26 = vld [vmem:[%s779_s19 + $0x18] sm:$0xff] }
  0x47   : > { %1104 = vmatpush.bf16.msra.mxu2 %v2672_v11  ;;  %934 = vmatpush.bf16.msra.mxu0 %v2660_v12  ;;  %v900_v16 = vld [vmem:[%s3077_s15] sm:$0xff]  ;;  %v901_v17 = vld [vmem:[%s3077_s15 + $0x8] sm:$0xff] }
  0x48   : > { %1020 = vmatpush.bf16.msra.mxu1 %v2674_v13  ;;  %v902_v18 = vpack.c.bf16 %v901_v17, %v900_v16  ;;  %v2662_v20 = vld [vmem:[%s779_s19] sm:$0xff] }
  0x49   : > { %v2750_v28 = vld [vmem:[%s3867_s7] ss:$0 sm:$0xff]  ;;  %s887_s28 = scalar_lea.vmem %s3930_s21, %s3071_s30 }
  0x4a   : > { %2513 = vmatmul.msk.bf16.vlgmr.msra.gmra.mxu0 %vm923_vm0, %v902_v18 }
  0x4b   : > { %1105 = vmatpush.bf16.msra.mxu2 %v2671_v14  ;;  %2538 = vmatmul.msk.bf16.vlgmr.msra.gmra.mxu1 %vm923_vm0, %v2666_v15 }
  0x4f   : > { %1106 = vmatpush.bf16.msra.mxu2 %v2670_v19 }
  0x52   : > { %2574 = vmatmul.msk.bf16.vlgmr.msra.gmra.mxu2 %vm1086_vm1, %v2662_v20 }
  0x5b   : > { %2539 = vmatmul.msk.bf16.gmra.mxu1 %vm923_vm0, %v2667_v21 }
  0x62   : > { %2575 = vmatmul.msk.bf16.gmra.mxu2 %vm1086_vm1, %v2663_v22 }
  0x6b   : > { %2540 = vmatmul.msk.bf16.gmra.mxu1 %vm923_vm0, %v2668_v23 }
  0x72   : > { %2576 = vmatmul.msk.bf16.gmra.mxu2 %vm1086_vm1, %v2664_v24 }
  0x7b   : > { %2541 = vmatmul.msk.bf16.gmra.mxu1 %vm923_vm0, %v2669_v25 }
  0x82   : > { %2577 = vmatmul.msk.bf16.gmra.mxu2 %vm1086_vm1, %v2665_v26 }
  0xc7   : > { %v936_v29 = vpop.f32.mrf.mxu0 }
  0xc8   : > { %v1022_v27 = vpop.f32.mrf.mxu1  ;;  %v3092_v30 = vadd.f32 %v2750_v28, %v936_v29 }
  0xcf   : > { %v938_v36 = vpop.f32.mrf.mxu0 }
  0xd0   : > { %v1024_v32 = vpop.f32.mrf.mxu1  ;;  %v3102_v39 = vadd.f32 %v2750_v28, %v938_v36 }
  0xd5   : > { %v1108_v31 = vpop.f32.mrf.mxu2 }
  0xd6   : > { %v1109_v33 = vadd.f32 %v1108_v31, %v1022_v27 }
  0xd8   : > { %v3095_v34 = vadd.f32 %v1109_v33, %v3092_v30  ;;  %v1027_v44 = vpop.f32.mrf.mxu1 }
  0xda   : > { %v3098_v35 = vmul.f32 0.70710677, %v3095_v34 }
  0xdc   : > { %v1152_v37 = vmul.f32 %v3098_v35, %v3098_v35 }
  0xdd   : > { %v1110_v38 = vpop.f32.mrf.mxu2 }
  0xde   : > { %v1153_v40 = vmin.f32 %v1152_v37, 16.0  ;;  %v1111_v41 = vadd.f32 %v1110_v38, %v1024_v32 }
  0xe0   : > { %v1154_v42 = vmul.f32 2.1237322e-06, %v1153_v40  ;;  %v1165_v43 = vmul.f32 3.8918573e-05, %v1153_v40  ;;  %v3105_v45 = vadd.f32 %v1111_v41, %v3102_v39  ;;  %v1029_v63 = vpop.f32.mrf.mxu1 }
  0xe2   : > { %v1155_v46 = vadd.f32 0.00028619796, %v1154_v42  ;;  %v1166_v47 = vadd.f32 0.001143296, %v1165_v43  ;;  %v3108_v48 = vmul.f32 0.70710677, %v3105_v45 }
  0xe4   : > { %v1156_v49 = vmul.f32 %v1155_v46, %v1153_v40  ;;  %v1167_v50 = vmul.f32 %v1166_v47, %v1153_v40  ;;  %v1192_v51 = vmul.f32 %v3108_v48, %v3108_v48 }
  0xe5   : > { %v1113_v52 = vpop.f32.mrf.mxu2 }
  0xe6   : > { %v1157_v53 = vadd.f32 0.0036580483, %v1156_v49  ;;  %v1168_v54 = vadd.f32 0.014752088, %v1167_v50  ;;  %v1114_v55 = vadd.f32 %v1113_v52, %v1027_v44  ;;  %v3112_v56 = vmin.f32 %v1192_v51, 16.0 }
  0xe8   : > { %v1169_v57 = vmul.f32 %v1168_v54, %v1153_v40  ;;  %v3115_v58 = vadd.f32 %v1114_v55, %v3092_v30  ;;  %v1158_v59 = vmul.f32 %v1157_v53, %v1153_v40  ;;  %v1194_v60 = vmul.f32 2.1237322e-06, %v3112_v56  ;;  %v1032_v25 = vpop.f32.mrf.mxu1 }
  0xe9   : > { %v1205_v61 = vmul.f32 3.8918573e-05, %v3112_v56 }
  0xea   : > { %v1170_v62 = vadd.f32 0.112945676, %v1169_v57  ;;  %v1195_v0 = vadd.f32 0.00028619796, %v1194_v60  ;;  %v3120_v2 = vmul.f32 0.70710677, %v3115_v58 }
  0xeb   : > { %v1206_v1 = vadd.f32 0.001143296, %v1205_v61  ;;  %v1159_v4 = vadd.f32 0.05243302, %v1158_v59 }
  0xec   : > { %v1171_v3 = vmul.f32 %v1170_v62, %v1153_v40  ;;  %v1196_v5 = vmul.f32 %v1195_v0, %v3112_v56  ;;  %v1232_v7 = vmul.f32 %v3120_v2, %v3120_v2 }
  0xed   : > { %v1207_v6 = vmul.f32 %v1206_v1, %v3112_v56  ;;  %v1115_v8 = vpop.f32.mrf.mxu2  ;;  %v1160_v16 = vmul.f32 %v1159_v4, %v1153_v40 }
  0xee   : > { %v1172_v9 = vadd.f32 0.4994258, %v1171_v3  ;;  %v1116_v10 = vadd.f32 %v1115_v8, %v1029_v63  ;;  %v1197_v11 = vadd.f32 0.0036580483, %v1196_v5  ;;  %v3126_v13 = vmin.f32 %v1232_v7, 16.0 }
  0xef   : > { %v1208_v12 = vadd.f32 0.014752088, %v1207_v6  ;;  %v1161_v26 = vadd.f32 0.18741608, %v1160_v16 }
  0xf0   : > { %v1173_v14 = vmul.f32 %v1172_v9, %v1153_v40  ;;  %v3129_v15 = vadd.f32 %v1116_v10, %v3102_v39  ;;  %v1234_v18 = vmul.f32 2.1237322e-06, %v3126_v13  ;;  %v1245_v20 = vmul.f32 3.8918573e-05, %v3126_v13  ;;  %v1034_v3 = vpop.f32.mrf.mxu1 }
  0xf1   : > { %v1209_v17 = vmul.f32 %v1208_v12, %v3112_v56  ;;  %v1198_v22 = vmul.f32 %v1197_v11, %v3112_v56  ;;  %v1162_v42 = vmul.f32 %v1161_v26, %v1153_v40 }
  0xf2   : > { %v3133_v19 = vadd.f32 1.0, %v1173_v14  ;;  %v3137_v21 = vmul.f32 0.70710677, %v3129_v15  ;;  %v1235_v24 = vadd.f32 0.00028619796, %v1234_v18 }
  0xf3   : > { %v1210_v23 = vadd.f32 0.112945676, %v1209_v17  ;;  %v1246_v31 = vadd.f32 0.001143296, %v1245_v20  ;;  %v1199_v33 = vadd.f32 0.05243302, %v1198_v22 }
  0xf4   : > { %2759 = vrcp.f32 %v3133_v19  ;;  %v1236_v28 = vmul.f32 %v1235_v24, %v3126_v13  ;;  %v1272_v32 = vmul.f32 %v3137_v21, %v3137_v21  ;;  %v1163_v63 = vadd.f32 1.1283791, %v1162_v42 }
  0xf5   : > { %v1211_v27 = vmul.f32 %v1210_v23, %v3112_v56  ;;  %v1118_v29 = vpop.f32.mrf.mxu2  ;;  %v1247_v38 = vmul.f32 %v1246_v31, %v3126_v13  ;;  %v1200_v53 = vmul.f32 %v1199_v33, %v3112_v56  ;;  %v1184_v0 = vand.u32 2147483647, %v3133_v19 }
  0xf6   : > { %v1237_v37 = vadd.f32 0.0036580483, %v1236_v28  ;;  %v3146_v41 = vmin.f32 %v1272_v32, 16.0  ;;  %v1119_v44 = vadd.f32 %v1118_v29, %v1032_v25  ;;  %vm1180_vm3 = vweird.f32 %v3133_v19 }
  0xf7   : > { %v1212_v36 = vadd.f32 0.4994258, %v1211_v27  ;;  %v1248_v49 = vadd.f32 0.014752088, %v1247_v38  ;;  %v1186_v8 = vand.u32 2147483648, %v3133_v19  ;;  %v3172_v17 = vmul.f32 0.5, %v3095_v34 }
  0xf8   : > { %v1238_v47 = vmul.f32 %v1237_v37, %v3126_v13  ;;  %v1274_v50 = vmul.f32 2.1237322e-06, %v3146_v41  ;;  %v1285_v51 = vmul.f32 3.8918573e-05, %v3146_v41  ;;  %v3159_v61 = vadd.f32 %v1119_v44, %v3092_v30 }
  0xf9   : > { %v1213_v43 = vmul.f32 %v1212_v36, %v3112_v56  ;;  %v1249_v40 = vmul.f32 %v1248_v49, %v3126_v13  ;;  %v1201_v9 = vadd.f32 0.18741608, %v1200_v53  ;;  %v1164_v18 = vmul.f32 %v1163_v63, %v3098_v35  ;;  %v1037_v53 = vpop.f32.mrf.mxu1 }
  0xfa   : > { %v2760_v46 = vpop.eup %2759  ;;  %v1239_v55 = vadd.f32 0.05243302, %v1238_v47  ;;  %v1275_v57 = vadd.f32 0.00028619796, %v1274_v50  ;;  %v1286_v59 = vadd.f32 0.001143296, %v1285_v51 }
  0xfb   : > { %v1176_v52 = vmul.f32 %v2760_v46, %v3133_v19  ;;  %v3154_v54 = vadd.f32 1.0, %v1213_v43  ;;  %vm1181_vm2 = vweird.f32 %v2760_v46  ;;  %v1250_v1 = vadd.f32 0.112945676, %v1249_v40  ;;  %v2677_v47 = vld [vmem:[%s3868_s8 + $0x8] sm:$0xff] }
  0xfc   : > { %v1240_v5 = vmul.f32 %v1239_v55, %v3126_v13  ;;  %v1276_v6 = vmul.f32 %v1275_v57, %v3146_v41  ;;  %v1287_v7 = vmul.f32 %v1286_v59, %v3146_v41  ;;  %v3169_v16 = vmul.f32 0.70710677, %v3159_v61  ;;  %vm3176_vm4 = vmor %vm1180_vm3, %vm1181_vm2  ;;  %1554 = vmatpush.bf16.msra.mxu3 %v2677_v47 }
  0xfd   : > { %v1177_v60 = vsub.f32 1.0, %v1176_v52  ;;  %2761 = vrcp.f32 %v3154_v54  ;;  %v1120_v62 = vpop.f32.mrf.mxu2  ;;  %v1251_v10 = vmul.f32 %v1250_v1, %v3126_v13  ;;  %vm1185_vm5 = vcmp.eq.f32.partialorder %v1184_v0, 8.507059e+37 }
  0xfe   : > { %v1277_v12 = vadd.f32 0.0036580483, %v1276_v6  ;;  %v1288_v14 = vadd.f32 0.014752088, %v1287_v7  ;;  %v1241_v24 = vadd.f32 0.18741608, %v1240_v5  ;;  %v1312_v34 = vmul.f32 %v3169_v16, %v3169_v16 }
  0xff   : > { %v1178_v4 = vmul.f32 %v2760_v46, %v1177_v60  ;;  %v1252_v19 = vadd.f32 0.4994258, %v1251_v10  ;;  %v1187_v26 = vor.u32 1.1754944e-38, %v1186_v8  ;;  %v1202_v35 = vmul.f32 %v1201_v9, %v3112_v56 }
 0x100   : > { %v1289_v25 = vmul.f32 %v1288_v14, %v3146_v41  ;;  %v1278_v28 = vmul.f32 %v1277_v12, %v3146_v41  ;;  %v1224_v29 = vand.u32 2147483647, %v3154_v54  ;;  %v1121_v33 = vadd.f32 %v1120_v62, %v1034_v3  ;;  %v2676_v3 = vld [vmem:[%s3868_s8] sm:$0xff] }
 0x101   : > { %v1179_v11 = vadd.f32 %v2760_v46, %v1178_v4  ;;  %v1253_v31 = vmul.f32 %v1252_v19, %v3126_v13  ;;  %v1226_v38 = vand.u32 2147483648, %v3154_v54  ;;  %v3191_v42 = vmin.f32 %v1312_v34, 16.0  ;;  %1555 = vmatpush.bf16.msra.mxu3 %v2676_v3 }
 0x102   : > { %v1290_v32 = vadd.f32 0.112945676, %v1289_v25  ;;  %v1242_v56 = vmul.f32 %v1241_v24, %v3126_v13  ;;  %v1279_v50 = vadd.f32 0.05243302, %v1278_v28  ;;  %v1203_v40 = vadd.f32 1.1283791, %v1202_v35 }
 0x103   : > { %v2762_v22 = vpop.eup %2761  ;;  %v1183_v23 = vsel %vm3176_vm4, %v2760_v46, %v1179_v11  ;;  %v3194_v44 = vadd.f32 1.0, %v1253_v31  ;;  %v1314_v51 = vmul.f32 2.1237322e-06, %v3191_v42  ;;  %v1325_v52 = vmul.f32 3.8918573e-05, %v3191_v42 }
 0x104   : > { %v1216_v27 = vmul.f32 %v2762_v22, %v3154_v54  ;;  %v1188_v36 = vsel %vm1185_vm5, %v1187_v26, %v1183_v23  ;;  %vm1221_vm6 = vweird.f32 %v2762_v22  ;;  %v1291_v46 = vmul.f32 %v1290_v32, %v3146_v41 }
 0x105   : > { %v1123_v43 = vpop.f32.mrf.mxu2  ;;  %v1189_v55 = vmul.f32 %v1188_v36, %v1164_v18  ;;  %2763 = vrcp.f32 %v3194_v44  ;;  %v3204_v13 = vadd.f32 %v1121_v33, %v3102_v39  ;;  %vm1220_vm7 = vweird.f32 %v3154_v54 }
 0x106   : > { %v1217_v37 = vsub.f32 1.0, %v1216_v27  ;;  %vm3207_vm8 = vcmp.eq.f32.partialorder %v1224_v29, 8.507059e+37  ;;  %v1292_v60 = vadd.f32 0.4994258, %v1291_v46  ;;  %vm3212_vm9 = vmor %vm1220_vm7, %vm1221_vm6  ;;  %v1227_v63 = vor.u32 1.1754944e-38, %v1226_v38 }
 0x107   : > { %v1315_v0 = vadd.f32 0.00028619796, %v1314_v51  ;;  %v1326_v1 = vadd.f32 0.001143296, %v1325_v52  ;;  %v1243_v4 = vadd.f32 1.1283791, %v1242_v56  ;;  %v1280_v5 = vmul.f32 %v1279_v50, %v3146_v41 }
 0x108   : > { %v1218_v49 = vmul.f32 %v2762_v22, %v1217_v37  ;;  %v1293_v6 = vmul.f32 %v1292_v60, %v3146_v41  ;;  %v2578_v7 = vclamps-f32 %v1189_v55, 1.0  ;;  %v3226_v10 = vmul.f32 0.70710677, %v3204_v13 }
 0x109   : > { %v1316_v8 = vmul.f32 %v1315_v0, %v3191_v42  ;;  %v1327_v9 = vmul.f32 %v1326_v1, %v3191_v42  ;;  %v3229_v11 = vmul.f32 0.5, %v3105_v45  ;;  %v1264_v14 = vand.u32 2147483647, %v3194_v44 }
 0x10a   : > { %v1219_v57 = vadd.f32 %v2762_v22, %v1218_v49  ;;  %v3234_v18 = vadd.f32 1.0, %v1293_v6  ;;  %v1352_v23 = vmul.f32 %v3226_v10, %v3226_v10  ;;  %v1124_v24 = vadd.f32 %v1123_v43, %v1037_v53 }
 0x10b   : > { %v2764_v20 = vpop.eup %2763  ;;  %v1317_v19 = vadd.f32 0.0036580483, %v1316_v8  ;;  %v1204_v25 = vmul.f32 %v1203_v40, %v3108_v48  ;;  %v1244_v34 = vmul.f32 %v1243_v4, %v3120_v2  ;;  %v1281_v26 = vadd.f32 0.18741608, %v1280_v5  ;;  %v1039_v48 = vpop.f32.mrf.mxu1 }
 0x10c   : > { %v1223_v54 = vsel %vm3212_vm9, %v2762_v22, %v1219_v57  ;;  %v1328_v22 = vadd.f32 0.014752088, %v1327_v9  ;;  %v1256_v45 = vmul.f32 %v2764_v20, %v3194_v44  ;;  %v1472_v27 = vadd.f32 1.0, %v2578_v7 }
 0x10d   : > { %v1228_v12 = vsel %vm3207_vm8, %v1227_v63, %v1223_v54  ;;  %v1125_v35 = vpop.f32.mrf.mxu2  ;;  %vm1260_vm10 = vweird.f32 %v3194_v44  ;;  %v1266_v28 = vand.u32 2147483648, %v3194_v44  ;;  %2765 = vrcp.f32 %v3234_v18 }
 0x10e   : > { %v1229_v29 = vmul.f32 %v1228_v12, %v1204_v25  ;;  %v1257_v31 = vsub.f32 1.0, %v1256_v45  ;;  %v1318_v32 = vmul.f32 %v1317_v19, %v3191_v42  ;;  %v1329_v33 = vmul.f32 %v1328_v22, %v3191_v42 }
 0x10f   : > { %vm3246_vm11 = vcmp.eq.f32.partialorder %v1264_v14, 8.507059e+37  ;;  %v3250_v36 = vmin.f32 %v1352_v23, 16.0  ;;  %v3253_v37 = vadd.f32 %v1124_v24, %v3092_v30  ;;  %v1126_v38 = vadd.f32 %v1125_v35, %v1039_v48 }
 0x110   : > { %v1258_v43 = vmul.f32 %v2764_v20, %v1257_v31  ;;  %vm1261_vm12 = vweird.f32 %v2764_v20  ;;  %v1282_v56 = vmul.f32 %v1281_v26, %v3146_v41  ;;  %v1330_v46 = vadd.f32 0.112945676, %v1329_v33 }
 0x111   : > { %v3257_v47 = vmul.f32 %v1472_v27, %v3172_v17  ;;  %v1319_v49 = vadd.f32 0.05243302, %v1318_v32  ;;  %v1354_v50 = vmul.f32 2.1237322e-06, %v3250_v36  ;;  %v1365_v51 = vmul.f32 3.8918573e-05, %v3250_v36  ;;  %vm1262_vm13 = vmor %vm1260_vm10, %vm1261_vm12 }
 0x112   : > { %v2579_v52 = vclamps-f32 %v1229_v29, 1.0  ;;  %v1259_v53 = vadd.f32 %v2764_v20, %v1258_v43  ;;  %v1331_v55 = vmul.f32 %v1330_v46, %v3191_v42  ;;  %v3263_v30 = vmul.f32 0.70710677, %v3253_v37 }
 0x113   : > { %v2766_v40 = vpop.eup %2765  ;;  %v1267_v41 = vor.u32 1.1754944e-38, %v1266_v28  ;;  %v1355_v57 = vadd.f32 0.00028619796, %v1354_v50  ;;  %v1366_v17 = vadd.f32 0.001143296, %v1365_v51  ;;  %v3268_v59 = vadd.f32 %v1126_v38, %v3102_v39 }
 0x114   : > { %v1263_v60 = vsel %vm1262_vm13, %v2764_v20, %v1259_v53  ;;  %v1283_v62 = vadd.f32 1.1283791, %v1282_v56  ;;  %v1296_v63 = vmul.f32 %v2766_v40, %v3234_v18  ;;  %v1306_v0 = vand.u32 2147483648, %v3234_v18 }
 0x115   : > { %v1320_v1 = vmul.f32 %v1319_v49, %v3191_v42  ;;  %v1332_v3 = vadd.f32 0.4994258, %v1331_v55  ;;  %v1356_v54 = vmul.f32 %v1355_v57, %v3250_v36  ;;  %v1367_v44 = vmul.f32 %v1366_v17, %v3250_v36 }
 0x116   : > { %v1473_v4 = vadd.f32 1.0, %v2579_v52  ;;  %v1268_v5 = vsel %vm3246_vm11, %v1267_v41, %v1263_v60  ;;  %v1297_v6 = vsub.f32 1.0, %v1296_v63  ;;  %v1392_v39 = vmul.f32 %v3263_v30, %v3263_v30 }
 0x117   : > { %v1333_v7 = vmul.f32 %v1332_v3, %v3191_v42  ;;  %v1357_v8 = vadd.f32 0.0036580483, %v1356_v54  ;;  %v1368_v9 = vadd.f32 0.014752088, %v1367_v44  ;;  %v3281_v12 = vmul.f32 0.70710677, %v3268_v59 }
 0x118   : > { %v1298_v14 = vmul.f32 %v2766_v40, %v1297_v6  ;;  %vm1301_vm14 = vweird.f32 %v2766_v40  ;;  %v1304_v20 = vand.u32 2147483647, %v3234_v18  ;;  %v3284_v19 = vmin.f32 %v1392_v39, 16.0 }
 0x119   : > { %v1269_v22 = vmul.f32 %v1268_v5, %v1244_v34  ;;  %v1321_v23 = vadd.f32 0.18741608, %v1320_v1  ;;  %v3286_v24 = vadd.f32 1.0, %v1333_v7  ;;  %v1369_v25 = vmul.f32 %v1368_v9, %v3250_v36 }
 0x11a   : > { %v1299_v45 = vadd.f32 %v2766_v40, %v1298_v14  ;;  %vm1300_vm15 = vweird.f32 %v3234_v18  ;;  %v1307_v26 = vor.u32 1.1754944e-38, %v1306_v0  ;;  %v1358_v35 = vmul.f32 %v1357_v8, %v3250_v36 }
 0x11b   : > { %v1481_v27 = vmul.f32 %v1473_v4, %v3229_v11  ;;  %vm1302_vm1 = vmor %vm1300_vm15, %vm1301_vm14  ;;  %2767 = vrcp.f32 %v3286_v24  ;;  %v1394_v28 = vmul.f32 2.1237322e-06, %v3284_v19  ;;  %v1432_v34 = vmul.f32 %v3281_v12, %v3281_v12 }
 0x11c   : > { %v1284_v29 = vmul.f32 %v1283_v62, %v3137_v21  ;;  %v1303_v31 = vsel %vm1302_vm1, %v2766_v40, %v1299_v45  ;;  %vm1305_vm2 = vcmp.eq.f32.partialorder %v1304_v20, 8.507059e+37  ;;  %v1370_v32 = vadd.f32 0.112945676, %v1369_v25 }
 0x11d   : > { %v2580_v33 = vclamps-f32 %v1269_v22, 1.0  ;;  %v1308_v18 = vsel %vm1305_vm2, %v1307_v26, %v1303_v31  ;;  %v1322_v48 = vmul.f32 %v1321_v23, %v3191_v42  ;;  %v1359_v38 = vadd.f32 0.05243302, %v1358_v35 }
 0x11e   : > { %v1309_v2 = vmul.f32 %v1308_v18, %v1284_v29  ;;  %v1371_v11 = vmul.f32 %v1370_v32, %v3250_v36  ;;  %v1405_v43 = vmul.f32 3.8918573e-05, %v3284_v19  ;;  %v1138_v56 = vmul.f32 0.5, %v3115_v58 }
 0x11f   : > { %v1395_v46 = vadd.f32 0.00028619796, %v1394_v28  ;;  %v3301_v49 = vmin.f32 %v1432_v34, 16.0  ;;  %v1489_v50 = vpack.c.bf16 %v1481_v27, %v1481_v27  ;;  %v1139_v21 = vmul.f32 0.5, %v3129_v15 }
 0x120   : > { %v2581_v51 = vclamps-f32 %v1309_v2, 1.0  ;;  %v1372_v52 = vadd.f32 0.4994258, %v1371_v11  ;;  %v1488_v53 = vpack.c.bf16 %v3257_v47, %v3257_v47  ;;  %v1323_v55 = vadd.f32 1.1283791, %v1322_v48 }
 0x121   : > { %v2768_v42 = vpop.eup %2767  ;;  %v1406_v40 = vadd.f32 0.001143296, %v1405_v43  ;;  %v1434_v41 = vmul.f32 2.1237322e-06, %v3301_v49  ;;  %v1474_v57 = vadd.f32 1.0, %v2580_v33  ;;  %v1360_v58 = vmul.f32 %v1359_v38, %v3250_v36 }
 0x122   : > { %v1336_v17 = vmul.f32 %v2768_v42, %v3286_v24  ;;  %v1513_v60 = vunpack.c.l.b16 %v1489_v50  ;;  %v1373_v62 = vmul.f32 %v1372_v52, %v3250_v36  ;;  %v1396_v15 = vmul.f32 %v1395_v46, %v3284_v19 }
 0x123   : > { %v1407_v63 = vmul.f32 %v1406_v40, %v3284_v19  ;;  %v1435_v0 = vadd.f32 0.00028619796, %v1434_v41  ;;  %v1475_v1 = vadd.f32 1.0, %v2581_v51  ;;  %v1445_v3 = vmul.f32 3.8918573e-05, %v3301_v49 }
 0x124   : > { %v1337_v47 = vsub.f32 1.0, %v1336_v17  ;;  %v1512_v54 = vunpack.c.l.b16 %v1488_v53  ;;  %v1344_v44 = vand.u32 2147483647, %v3286_v24  ;;  %v1346_v4 = vand.u32 2147483648, %v3286_v24 }
 0x125   : > { %v3315_v5 = vadd.f32 1.0, %v1373_v62  ;;  %v1408_v6 = vadd.f32 0.014752088, %v1407_v63  ;;  %vm1341_vm3 = vweird.f32 %v2768_v42  ;;  %v1446_v7 = vadd.f32 0.001143296, %v1445_v3 }
 0x126   : > { %v1338_v39 = vmul.f32 %v2768_v42, %v1337_v47  ;;  %v1520_v8 = vpack.c.b16 %v1513_v60, %v1512_v54  ;;  %vm1340_vm4 = vweird.f32 %v3286_v24  ;;  %v1397_v9 = vadd.f32 0.0036580483, %v1396_v15 }
 0x127   : > { %2769 = vrcp.f32 %v3315_v5  ;;  %v1436_v14 = vmul.f32 %v1435_v0, %v3301_v49  ;;  %v1483_v20 = vmul.f32 %v1475_v1, %v1139_v21  ;;  %v1361_v23 = vadd.f32 0.18741608, %v1360_v58  ;;  %vm1342_vm5 = vmor %vm1340_vm4, %vm1341_vm3 }
 0x128   : > { %v1339_v22 = vadd.f32 %v2768_v42, %v1338_v39  ;;  %v1409_v25 = vmul.f32 %v1408_v6, %v3284_v19  ;;  %2594 = vmatmul.msk.bf16.vlgmr.msra.gmra.mxu3 %vm923_vm0, %v1520_v8  ;;  %v1347_v45 = vor.u32 1.1754944e-38, %v1346_v4  ;;  %v1447_v26 = vmul.f32 %v1446_v7, %v3301_v49 }
 0x129   : > { %v1482_v35 = vmul.f32 %v1474_v57, %v1138_v56  ;;  %vm1345_vm6 = vcmp.eq.f32.partialorder %v1344_v44, 8.507059e+37  ;;  %v1398_v34 = vmul.f32 %v1397_v9, %v3284_v19  ;;  %v1437_v29 = vadd.f32 0.0036580483, %v1436_v14 }
 0x12a   : > { %v1343_v27 = vsel %vm1342_vm5, %v2768_v42, %v1339_v22  ;;  %v1410_v24 = vadd.f32 0.112945676, %v1409_v25  ;;  %v1448_v31 = vadd.f32 0.014752088, %v1447_v26  ;;  %v1324_v32 = vmul.f32 %v1323_v55, %v3169_v16 }
 0x12b   : > { %v1348_v28 = vsel %vm1345_vm6, %v1347_v45, %v1343_v27  ;;  %v1362_v33 = vmul.f32 %v1361_v23, %v3250_v36  ;;  %v1491_v48 = vpack.c.bf16 %v1483_v20, %v1483_v20  ;;  %v1490_v56 = vpack.c.bf16 %v1482_v35, %v1482_v35 }
 0x12c   : > { %v1411_v18 = vmul.f32 %v1410_v24, %v3284_v19  ;;  %v1449_v38 = vmul.f32 %v1448_v31, %v3301_v49  ;;  %v1349_v11 = vmul.f32 %v1348_v28, %v1324_v32  ;;  %v1399_v46 = vadd.f32 0.05243302, %v1398_v34 }
 0x12d   : > { %v2770_v2 = vpop.eup %2769  ;;  %v1438_v21 = vmul.f32 %v1437_v29, %v3301_v49  ;;  %v1363_v52 = vadd.f32 1.1283791, %v1362_v33  ;;  %v1515_v16 = vunpack.c.l.b16 %v1491_v48  ;;  %v1384_v36 = vand.u32 2147483647, %v3315_v5 }
 0x12e   : > { %v1376_v43 = vmul.f32 %v2770_v2, %v3315_v5  ;;  %v1412_v50 = vadd.f32 0.4994258, %v1411_v18  ;;  %v1450_v51 = vadd.f32 0.112945676, %v1449_v38  ;;  %v1386_v42 = vand.u32 2147483648, %v3315_v5 }
 0x12f   : > { %v2582_v41 = vclamps-f32 %v1349_v11, 1.0  ;;  %vm1381_vm7 = vweird.f32 %v2770_v2  ;;  %v1514_v17 = vunpack.c.l.b16 %v1490_v56  ;;  %v1400_v58 = vmul.f32 %v1399_v46, %v3284_v19 }
 0x130   : > { %v1377_v53 = vsub.f32 1.0, %v1376_v43  ;;  %v1413_v55 = vmul.f32 %v1412_v50, %v3284_v19  ;;  %v1451_v40 = vmul.f32 %v1450_v51, %v3301_v49  ;;  %v1439_v62 = vadd.f32 0.05243302, %v1438_v21 }
 0x131   : > { %vm1380_vm8 = vweird.f32 %v3315_v5  ;;  %v1521_v0 = vpack.c.b16 %v1515_v16, %v1514_v17  ;;  %v1364_v1 = vmul.f32 %v1363_v52, %v3226_v10  ;;  %v1387_v47 = vor.u32 1.1754944e-38, %v1386_v42 }
 0x132   : > { %v1378_v57 = vmul.f32 %v2770_v2, %v1377_v53  ;;  %v1414_v60 = vadd.f32 1.0, %v1413_v55  ;;  %v1452_v15 = vadd.f32 0.4994258, %v1451_v40  ;;  %vm1382_vm9 = vmor %vm1380_vm8, %vm1381_vm7  ;;  %v1476_v3 = vadd.f32 1.0, %v2582_v41 }
 0x133   : > { %vm1385_vm10 = vcmp.eq.f32.partialorder %v1384_v36, 8.507059e+37  ;;  %v1401_v6 = vadd.f32 0.18741608, %v1400_v58  ;;  %v1440_v39 = vmul.f32 %v1439_v62, %v3301_v49  ;;  %v1140_v7 = vmul.f32 0.5, %v3159_v61 }
 0x134   : > { %v1379_v63 = vadd.f32 %v2770_v2, %v1378_v57  ;;  %2771 = vrcp.f32 %v1414_v60  ;;  %v1453_v44 = vmul.f32 %v1452_v15, %v3301_v49  ;;  %v1141_v23 = vmul.f32 0.5, %v3204_v13 }
 0x135   : > { %v1484_v5 = vmul.f32 %v1476_v3, %v1140_v7  ;;  %v1402_v20 = vmul.f32 %v1401_v6, %v3284_v19  ;;  %v1441_v22 = vadd.f32 0.18741608, %v1440_v39  ;;  %v1426_v61 = vand.u32 2147483648, %v1414_v60 }
 0x136   : > { %v1383_v54 = vsel %vm1382_vm9, %v2770_v2, %v1379_v63  ;;  %v1454_v9 = vadd.f32 1.0, %v1453_v44  ;;  %v1424_v31 = vand.u32 2147483647, %v1414_v60  ;;  %vm1420_vm12 = vweird.f32 %v1414_v60 }
 0x137   : > { %v1388_v4 = vsel %vm1385_vm10, %v1387_v47, %v1383_v54  ;;  %v1492_v27 = vpack.c.bf16 %v1484_v5, %v1484_v5  ;;  %v1403_v24 = vadd.f32 1.1283791, %v1402_v20  ;;  %v1442_v28 = vmul.f32 %v1441_v22, %v3301_v49 }
 0x138   : > { %v1389_v8 = vmul.f32 %v1388_v4, %v1364_v1  ;;  %2595 = vmatmul.msk.bf16.gmra.mxu3 %vm923_vm0, %v1521_v0  ;;  %2773 = vrcp.f32 %v1454_v9  ;;  %v1427_v2 = vor.u32 1.1754944e-38, %v1426_v61  ;;  %vm1425_vm14 = vcmp.eq.f32.partialorder %v1424_v31, 8.507059e+37 }
 0x139   : > { %v1516_v19 = vunpack.c.l.b16 %v1492_v27  ;;  %v1404_v13 = vmul.f32 %v1403_v24, %v3263_v30  ;;  %v1443_v38 = vadd.f32 1.1283791, %v1442_v28  ;;  %v1466_v56 = vand.u32 2147483648, %v1454_v9 }
 0x13a   : > { %v2583_v10 = vclamps-f32 %v1389_v8, 1.0  ;;  %v2772_v14 = vpop.eup %2771  ;;  %v1464_v21 = vand.u32 2147483647, %v1454_v9  ;;  %vm1460_vm1 = vweird.f32 %v1454_v9  ;;  %v1142_v40 = vmul.f32 0.5, %v3253_v37 }
 0x13b   : > { %v1416_v45 = vmul.f32 %v2772_v14, %v1414_v60  ;;  %vm1421_vm11 = vweird.f32 %v2772_v14  ;;  %v1467_v16 = vor.u32 1.1754944e-38, %v1466_v56  ;;  %v1444_v30 = vmul.f32 %v1443_v38, %v3281_v12  ;;  %v3353_v12 = vld [vmem:[%s3869_s9] ss:$0 sm:$0xff] }
 0x13c   : > { %v1477_v25 = vadd.f32 1.0, %v2583_v10  ;;  %vm1422_vm13 = vmor %vm1420_vm12, %vm1421_vm11  ;;  %vm1465_vm3 = vcmp.eq.f32.partialorder %v1464_v21, 8.507059e+37  ;;  %v1143_v58 = vmul.f32 0.5, %v3268_v59 }
 0x13d   : > { %v1417_v35 = vsub.f32 1.0, %v1416_v45 }
 0x13e   : > { %v1485_v26 = vmul.f32 %v1477_v25, %v1141_v23  ;;  %v2774_v34 = vpop.eup %2773 }
 0x13f   : > { %v1418_v29 = vmul.f32 %v2772_v14, %v1417_v35  ;;  %v1456_v33 = vmul.f32 %v2774_v34, %v1454_v9  ;;  %vm1461_vm15 = vweird.f32 %v2774_v34 }
 0x140   : > { %v1493_v32 = vpack.c.bf16 %v1485_v26, %v1485_v26  ;;  %vm1462_vm2 = vmor %vm1460_vm1, %vm1461_vm15 }
 0x141   : > { %v1419_v18 = vadd.f32 %v2772_v14, %v1418_v29  ;;  %v1457_v11 = vsub.f32 1.0, %v1456_v33 }
 0x142   : > { %v1517_v48 = vunpack.c.l.b16 %v1493_v32 }
 0x143   : > { %v1423_v43 = vsel %vm1422_vm13, %v2772_v14, %v1419_v18  ;;  %v1458_v50 = vmul.f32 %v2774_v34, %v1457_v11 }
 0x144   : > { %v1522_v49 = vpack.c.b16 %v1517_v48, %v1516_v19  ;;  %v1428_v46 = vsel %vm1425_vm14, %v1427_v2, %v1423_v43 }
 0x145   : > { %v1429_v51 = vmul.f32 %v1428_v46, %v1404_v13  ;;  %v1459_v52 = vadd.f32 %v2774_v34, %v1458_v50 }
 0x147   : > { %v2584_v53 = vclamps-f32 %v1429_v51, 1.0  ;;  %v1463_v36 = vsel %vm1462_vm2, %v2774_v34, %v1459_v52 }
 0x148   : > { %2596 = vmatmul.msk.bf16.gmra.mxu3 %vm923_vm0, %v1522_v49  ;;  %v1468_v55 = vsel %vm1465_vm3, %v1467_v16, %v1463_v36 }
 0x149   : > { %v1478_v42 = vadd.f32 1.0, %v2584_v53  ;;  %v1469_v41 = vmul.f32 %v1468_v55, %v1444_v30 }
 0x14b   : > { %v1486_v57 = vmul.f32 %v1478_v42, %v1142_v40  ;;  %v2585_v17 = vclamps-f32 %v1469_v41, 1.0 }
 0x14d   : > { %v1479_v60 = vadd.f32 1.0, %v2585_v17  ;;  %v1494_v15 = vpack.c.bf16 %v1486_v57, %v1486_v57 }
 0x14f   : > { %v1487_v62 = vmul.f32 %v1479_v60, %v1143_v58  ;;  %v1518_v0 = vunpack.c.l.b16 %v1494_v15 }
 0x151   : > { %v1495_v63 = vpack.c.bf16 %v1487_v62, %v1487_v62 }
 0x153   : > { %v1519_v1 = vunpack.c.l.b16 %v1495_v63 }
 0x155   : > { %v1523_v47 = vpack.c.b16 %v1519_v1, %v1518_v0 }
 0x158   : > { %2597 = vmatmul.msk.bf16.gmra.mxu3 %vm923_vm0, %v1523_v47 }
 0x1ab   : > { %v1557_v37 = vpop.f32.mrf.mxu3 }
 0x1ac   : > { %v3356_v3 = vadd.f32 %v3353_v12, %v1557_v37 }
 0x1ae   : > { %v3359_v59 = vmul.f32 0.70710677, %v3356_v3 }
 0x1b0   : > { %v1593_v54 = vmul.f32 %v3359_v59, %v3359_v59 }
 0x1b2   : > { %v3363_v44 = vmin.f32 %v1593_v54, 16.0 }
 0x1b3   : > { %v1559_v4 = vpop.f32.mrf.mxu3 }
 0x1b4   : > { %v3366_v6 = vadd.f32 %v3353_v12, %v1559_v4  ;;  %v1606_v39 = vmul.f32 3.8918573e-05, %v3363_v44  ;;  %v1595_v28 = vmul.f32 2.1237322e-06, %v3363_v44 }
 0x1b6   : > { %v3370_v7 = vmul.f32 0.70710677, %v3366_v6  ;;  %v1607_v8 = vadd.f32 0.001143296, %v1606_v39  ;;  %v1596_v33 = vadd.f32 0.00028619796, %v1595_v28 }
 0x1b8   : > { %v1633_v9 = vmul.f32 %v3370_v7, %v3370_v7  ;;  %v1608_v14 = vmul.f32 %v1607_v8, %v3363_v44  ;;  %v1597_v11 = vmul.f32 %v1596_v33, %v3363_v44 }
 0x1ba   : > { %v3378_v20 = vmin.f32 %v1633_v9, 16.0  ;;  %v1609_v23 = vadd.f32 0.014752088, %v1608_v14  ;;  %v1598_v53 = vadd.f32 0.0036580483, %v1597_v11 }
 0x1bb   : > { %v1562_v5 = vpop.f32.mrf.mxu3 }
 0x1bc   : > { %v3375_v10 = vadd.f32 %v3353_v12, %v1562_v5  ;;  %v1646_v25 = vmul.f32 3.8918573e-05, %v3378_v20  ;;  %v1610_v24 = vmul.f32 %v1609_v23, %v3363_v44  ;;  %v1635_v18 = vmul.f32 2.1237322e-06, %v3378_v20 }
 0x1bd   : > { %v1599_v57 = vmul.f32 %v1598_v53, %v3363_v44 }
 0x1be   : > { %v3381_v22 = vmul.f32 0.70710677, %v3375_v10  ;;  %v1647_v61 = vadd.f32 0.001143296, %v1646_v25  ;;  %v1611_v31 = vadd.f32 0.112945676, %v1610_v24 }
 0x1bf   : > { %v1636_v43 = vadd.f32 0.00028619796, %v1635_v18  ;;  %v1600_v47 = vadd.f32 0.05243302, %v1599_v57 }
 0x1c0   : > { %v1673_v45 = vmul.f32 %v3381_v22, %v3381_v22  ;;  %v1648_v32 = vmul.f32 %v1647_v61, %v3378_v20  ;;  %v1612_v2 = vmul.f32 %v1611_v31, %v3363_v44 }
 0x1c1   : > { %v1637_v16 = vmul.f32 %v1636_v43, %v3378_v20  ;;  %v1601_v23 = vmul.f32 %v1600_v47, %v3363_v44 }
 0x1c2   : > { %v3386_v26 = vmin.f32 %v1673_v45, 16.0  ;;  %v1649_v38 = vadd.f32 0.014752088, %v1648_v32  ;;  %v1613_v21 = vadd.f32 0.4994258, %v1612_v2 }
 0x1c3   : > { %v1564_v35 = vpop.f32.mrf.mxu3  ;;  %v1638_v17 = vadd.f32 0.0036580483, %v1637_v16  ;;  %v1602_v33 = vadd.f32 0.18741608, %v1601_v23 }
 0x1c4   : > { %v3389_v27 = vadd.f32 %v3353_v12, %v1564_v35  ;;  %v1686_v34 = vmul.f32 3.8918573e-05, %v3386_v26  ;;  %v1650_v51 = vmul.f32 %v1649_v38, %v3378_v20  ;;  %v1675_v42 = vmul.f32 2.1237322e-06, %v3386_v26 }
 0x1c5   : > { %v1614_v55 = vmul.f32 %v1613_v21, %v3363_v44  ;;  %v1639_v37 = vmul.f32 %v1638_v17, %v3378_v20  ;;  %v1603_v21 = vmul.f32 %v1602_v33, %v3363_v44 }
 0x1c6   : > { %v3395_v29 = vmul.f32 0.70710677, %v3389_v27  ;;  %v1687_v19 = vadd.f32 0.001143296, %v1686_v34  ;;  %v1651_v40 = vadd.f32 0.112945676, %v1650_v51 }
 0x1c7   : > { %v1676_v15 = vadd.f32 0.00028619796, %v1675_v42  ;;  %v3422_v0 = vadd.f32 1.0, %v1614_v55  ;;  %v1640_v25 = vadd.f32 0.05243302, %v1639_v37 }
 0x1c8   : > { %v1713_v48 = vmul.f32 %v3395_v29, %v3395_v29  ;;  %v1688_v56 = vmul.f32 %v1687_v19, %v3386_v26  ;;  %v1652_v1 = vmul.f32 %v1651_v40, %v3378_v20 }
 0x1c9   : > { %v1677_v9 = vmul.f32 %v1676_v15, %v3386_v26  ;;  %2775 = vrcp.f32 %v3422_v0  ;;  %v1641_v2 = vmul.f32 %v1640_v25, %v3378_v20  ;;  %vm1621_vm4 = vweird.f32 %v3422_v0 }
 0x1ca   : > { %v3401_v13 = vmin.f32 %v1713_v48, 16.0  ;;  %v1689_v30 = vadd.f32 0.014752088, %v1688_v56  ;;  %v1653_v14 = vadd.f32 0.4994258, %v1652_v1 }
 0x1cb   : > { %v1567_v46 = vpop.f32.mrf.mxu3  ;;  %v1678_v28 = vadd.f32 0.0036580483, %v1677_v9  ;;  %v1625_v1 = vand.u32 2147483647, %v3422_v0 }
 0x1cc   : > { %v1726_v49 = vmul.f32 3.8918573e-05, %v3401_v13  ;;  %v3409_v52 = vadd.f32 %v3353_v12, %v1567_v46  ;;  %v1690_v58 = vmul.f32 %v1689_v30, %v3386_v26  ;;  %v1654_v34 = vmul.f32 %v1653_v14, %v3378_v20 }
 0x1cd   : > { %v1715_v31 = vmul.f32 2.1237322e-06, %v3401_v13  ;;  %v1679_v56 = vmul.f32 %v1678_v28, %v3386_v26  ;;  %v1642_v30 = vadd.f32 0.18741608, %v1641_v2  ;;  %vm3496_vm5 = vcmp.eq.f32.partialorder %v1625_v1, 8.507059e+37 }
 0x1ce   : > { %v1727_v50 = vadd.f32 0.001143296, %v1726_v49  ;;  %v3416_v41 = vmul.f32 0.70710677, %v3409_v52  ;;  %v1691_v54 = vadd.f32 0.112945676, %v1690_v58 }
 0x1cf   : > { %v3443_v48 = vpop.eup %2775  ;;  %v3450_v49 = vadd.f32 1.0, %v1654_v34  ;;  %v1716_v46 = vadd.f32 0.00028619796, %v1715_v31  ;;  %v1680_v55 = vadd.f32 0.05243302, %v1679_v56  ;;  %v1643_v9 = vmul.f32 %v1642_v30, %v3378_v20 }
 0x1d0   : > { %v1728_v36 = vmul.f32 %v1727_v50, %v3401_v13  ;;  %v1753_v62 = vmul.f32 %v3416_v41, %v3416_v41  ;;  %v1692_v45 = vmul.f32 %v1691_v54, %v3386_v26  ;;  %v1617_v51 = vmul.f32 %v3443_v48, %v3422_v0 }
 0x1d1   : > { %2777 = vrcp.f32 %v3450_v49  ;;  %v1717_v17 = vmul.f32 %v1716_v46, %v3401_v13  ;;  %v1681_v25 = vmul.f32 %v1680_v55, %v3386_v26  ;;  %vm1622_vm6 = vweird.f32 %v3443_v48 }
 0x1d2   : > { %v1729_v60 = vadd.f32 0.014752088, %v1728_v36  ;;  %v3426_v4 = vmin.f32 %v1753_v62, 16.0  ;;  %v1693_v18 = vadd.f32 0.4994258, %v1692_v45  ;;  %v1618_v62 = vsub.f32 1.0, %v1617_v51  ;;  %vm3522_vm7 = vmor %vm1621_vm4, %vm1622_vm6 }
 0x1d3   : > { %v1569_v63 = vpop.f32.mrf.mxu3  ;;  %v1718_v45 = vadd.f32 0.0036580483, %v1717_v17  ;;  %v1682_v56 = vadd.f32 0.18741608, %v1681_v25  ;;  %vm1661_vm8 = vweird.f32 %v3450_v49 }
 0x1d4   : > { %v1730_v39 = vmul.f32 %v1729_v60, %v3401_v13  ;;  %v3430_v8 = vadd.f32 %v3353_v12, %v1569_v63  ;;  %v1766_v5 = vmul.f32 3.8918573e-05, %v3426_v4  ;;  %v1694_v53 = vmul.f32 %v1693_v18, %v3386_v26 }
 0x1d5   : > { %v1755_v40 = vmul.f32 2.1237322e-06, %v3426_v4  ;;  %v1604_v60 = vadd.f32 1.1283791, %v1603_v21  ;;  %v1619_v34 = vmul.f32 %v3443_v48, %v1618_v62  ;;  %v1719_v46 = vmul.f32 %v1718_v45, %v3401_v13 }
 0x1d6   : > { %v1731_v35 = vadd.f32 0.112945676, %v1730_v39  ;;  %v1767_v24 = vadd.f32 0.001143296, %v1766_v5  ;;  %v3438_v61 = vmul.f32 0.70710677, %v3430_v8  ;;  %v1683_v1 = vmul.f32 %v1682_v56, %v3386_v26 }
 0x1d7   : > { %v3469_v15 = vadd.f32 1.0, %v1694_v53  ;;  %v1627_v39 = vand.u32 2147483648, %v3422_v0  ;;  %v1756_v5 = vadd.f32 0.00028619796, %v1755_v40  ;;  %v3482_v28 = vmul.f32 %v1604_v60, %v3359_v59  ;;  %v3488_v20 = vpop.eup %2777 }
 0x1d8   : > { %v1768_v32 = vmul.f32 %v1767_v24, %v3426_v4  ;;  %v1732_v38 = vmul.f32 %v1731_v35, %v3401_v13  ;;  %v1793_v43 = vmul.f32 %v3438_v61, %v3438_v61  ;;  %v1620_v51 = vadd.f32 %v3443_v48, %v1619_v34 }
 0x1d9   : > { %2779 = vrcp.f32 %v3469_v15  ;;  %v1628_v59 = vor.u32 1.1754944e-38, %v1627_v39  ;;  %v1757_v2 = vmul.f32 %v1756_v5, %v3426_v4  ;;  %vm1662_vm9 = vweird.f32 %v3488_v20 }
 0x1da   : > { %v1769_v11 = vadd.f32 0.014752088, %v1768_v32  ;;  %v1733_v36 = vadd.f32 0.4994258, %v1732_v38  ;;  %v3460_v42 = vmin.f32 %v1793_v43, 16.0  ;;  %vm3581_vm10 = vmor %vm1661_vm8, %vm1662_vm9  ;;  %vm1701_vm12 = vweird.f32 %v3469_v15 }
 0x1db   : > { %v1572_v19 = vpop.f32.mrf.mxu3  ;;  %v1644_v43 = vadd.f32 1.1283791, %v1643_v9  ;;  %v1758_v40 = vadd.f32 0.0036580483, %v1757_v2  ;;  %v1684_v2 = vadd.f32 1.1283791, %v1683_v1 }
 0x1dc   : > { %v3453_v50 = vadd.f32 %v3353_v12, %v1572_v19  ;;  %v1770_v16 = vmul.f32 %v1769_v11, %v3426_v4  ;;  %v1806_v44 = vmul.f32 3.8918573e-05, %v3460_v42  ;;  %v1734_v47 = vmul.f32 %v1733_v36, %v3401_v13 }
 0x1dd   : > { %v1795_v14 = vmul.f32 2.1237322e-06, %v3460_v42  ;;  %v3527_v62 = vmul.f32 %v1644_v43, %v3370_v7  ;;  %v1759_v26 = vmul.f32 %v1758_v40, %v3426_v4 }
 0x1de   : > { %v1771_v57 = vadd.f32 0.112945676, %v1770_v16  ;;  %v3467_v58 = vmul.f32 0.70710677, %v3453_v50  ;;  %v1807_v37 = vadd.f32 0.001143296, %v1806_v44 }
 0x1df   : > { %v3491_v32 = vadd.f32 1.0, %v1734_v47  ;;  %v1796_v11 = vadd.f32 0.00028619796, %v1795_v14  ;;  %v1667_v16 = vand.u32 2147483648, %v3450_v49  ;;  %v3515_v55 = vpop.eup %2779  ;;  %v1720_v47 = vadd.f32 0.05243302, %v1719_v46 }
 0x1e0   : > { %v1772_v63 = vmul.f32 %v1771_v57, %v3426_v4  ;;  %v1833_v54 = vmul.f32 %v3467_v58, %v3467_v58  ;;  %v1808_v24 = vmul.f32 %v1807_v37, %v3460_v42  ;;  %v1624_v37 = vsel %vm3522_vm7, %v3443_v48, %v1620_v51 }
 0x1e1   : > { %2781 = vrcp.f32 %v3491_v32  ;;  %v1797_v17 = vmul.f32 %v1796_v11, %v3460_v42  ;;  %v3535_v9 = vor.u32 1.1754944e-38, %v1667_v16  ;;  %v1697_v5 = vmul.f32 %v3515_v55, %v3469_v15 }
 0x1e2   : > { %v1773_v35 = vadd.f32 0.4994258, %v1772_v63  ;;  %v3486_v31 = vmin.f32 %v1833_v54, 16.0  ;;  %v1809_v33 = vadd.f32 0.014752088, %v1808_v24  ;;  %v3548_v45 = vsel %vm3496_vm5, %v1628_v59, %v1624_v37 }
 0x1e3   : > { %v1574_v23 = vpop.f32.mrf.mxu3  ;;  %v1665_v63 = vand.u32 2147483647, %v3450_v49  ;;  %v1798_v48 = vadd.f32 0.0036580483, %v1797_v17  ;;  %v1698_v11 = vsub.f32 1.0, %v1697_v5  ;;  %vm1702_vm13 = vweird.f32 %v3515_v55 }
 0x1e4   : > { %v3494_v18 = vadd.f32 %v3353_v12, %v1574_v23  ;;  %v1774_v38 = vmul.f32 %v1773_v35, %v3426_v4  ;;  %v1810_v21 = vmul.f32 %v1809_v33, %v3460_v42  ;;  %v1657_v12 = vmul.f32 %v3488_v20, %v3450_v49  ;;  %vm3613_vm15 = vmor %vm1701_vm12, %vm1702_vm13 }
 0x1e5   : > { %v1835_v53 = vmul.f32 2.1237322e-06, %v3486_v31  ;;  %v1846_v30 = vmul.f32 3.8918573e-05, %v3486_v31  ;;  %v1721_v35 = vmul.f32 %v1720_v47, %v3401_v13  ;;  %v1760_v46 = vadd.f32 0.05243302, %v1759_v26 }
 0x1e6   : > { %v3513_v36 = vmul.f32 0.70710677, %v3494_v18  ;;  %v3517_v57 = vadd.f32 1.0, %v1774_v38  ;;  %v1811_v44 = vadd.f32 0.112945676, %v1810_v21  ;;  %v1658_v54 = vsub.f32 1.0, %v1657_v12 }
 0x1e7   : > { %v1836_v0 = vadd.f32 0.00028619796, %v1835_v53  ;;  %v1847_v7 = vadd.f32 0.001143296, %v1846_v30  ;;  %v3544_v25 = vpop.eup %2781  ;;  %v1799_v21 = vmul.f32 %v1798_v48, %v3460_v42  ;;  %v1722_v12 = vadd.f32 0.18741608, %v1721_v35 }
 0x1e8   : > { %v1812_v39 = vmul.f32 %v1811_v44, %v3460_v42  ;;  %v1873_v14 = vmul.f32 %v3513_v36, %v3513_v36  ;;  %2783 = vrcp.f32 %v3517_v57  ;;  %v1659_v33 = vmul.f32 %v3488_v20, %v1658_v54 }
 0x1e9   : > { %v1848_v24 = vmul.f32 %v1847_v7, %v3486_v31  ;;  %v1837_v38 = vmul.f32 %v1836_v0, %v3486_v31  ;;  %v1737_v59 = vmul.f32 %v3544_v25, %v3491_v32  ;;  %v3570_v44 = vmul.f32 %v1684_v2, %v3381_v22 }
 0x1ea   : > { %v1813_v23 = vadd.f32 0.4994258, %v1812_v39  ;;  %v3552_v34 = vmin.f32 %v1873_v14, 16.0  ;;  %v1660_v17 = vadd.f32 %v3488_v20, %v1659_v33  ;;  %v1699_v47 = vmul.f32 %v3515_v55, %v1698_v11 }
 0x1eb   : > { %v1849_v56 = vadd.f32 0.014752088, %v1848_v24  ;;  %v1838_v60 = vadd.f32 0.0036580483, %v1837_v38  ;;  %v1705_v37 = vand.u32 2147483647, %v3469_v15  ;;  %v1761_v0 = vmul.f32 %v1760_v46, %v3426_v4 }
 0x1ec   : > { %v1814_v43 = vmul.f32 %v1813_v23, %v3460_v42  ;;  %v1875_v19 = vmul.f32 2.1237322e-06, %v3552_v34  ;;  %v1886_v51 = vmul.f32 3.8918573e-05, %v3552_v34  ;;  %v1707_v54 = vand.u32 2147483648, %v3469_v15 }
 0x1ed   : > { %v1850_v16 = vmul.f32 %v1849_v56, %v3486_v31  ;;  %v1738_v39 = vsub.f32 1.0, %v1737_v59  ;;  %v1800_v5 = vadd.f32 0.05243302, %v1799_v21  ;;  %vm3585_vm11 = vcmp.eq.f32.partialorder %v1665_v63, 8.507059e+37 }
 0x1ee   : > { %v3563_v53 = vadd.f32 1.0, %v1814_v43  ;;  %v1876_v30 = vadd.f32 0.00028619796, %v1875_v19  ;;  %v3566_v40 = vpop.eup %2783  ;;  %v1887_v1 = vadd.f32 0.001143296, %v1886_v51  ;;  %v1723_v26 = vmul.f32 %v1722_v12, %v3401_v13 }
 0x1ef   : > { %v1851_v7 = vadd.f32 0.112945676, %v1850_v16  ;;  %v1777_v48 = vmul.f32 %v3566_v40, %v3517_v57  ;;  %v1664_v49 = vsel %vm3581_vm10, %v3488_v20, %v1660_v17  ;;  %v1839_v63 = vmul.f32 %v1838_v60, %v3486_v31 }
 0x1f0   : > { %2785 = vrcp.f32 %v3563_v53  ;;  %v1877_v23 = vmul.f32 %v1876_v30, %v3552_v34  ;;  %v1888_v35 = vmul.f32 %v1887_v1, %v3552_v34  ;;  %v1700_v33 = vadd.f32 %v3515_v55, %v1699_v47 }
 0x1f1   : > { %v1852_v24 = vmul.f32 %v1851_v7, %v3486_v31  ;;  %vm3602_vm14 = vcmp.eq.f32.partialorder %v1705_v37, 8.507059e+37  ;;  %v1708_v2 = vor.u32 1.1754944e-38, %v1707_v54  ;;  %v1739_v11 = vmul.f32 %v3544_v25, %v1738_v39 }
 0x1f2   : > { %v1889_v38 = vadd.f32 0.014752088, %v1888_v35  ;;  %v1762_v43 = vadd.f32 0.18741608, %v1761_v0  ;;  %v1801_v20 = vmul.f32 %v1800_v5, %v3460_v42  ;;  %v1724_v59 = vadd.f32 1.1283791, %v1723_v26 }
 0x1f3   : > { %v1853_v56 = vadd.f32 0.4994258, %v1852_v24  ;;  %v1778_v46 = vsub.f32 1.0, %v1777_v48  ;;  %v1878_v21 = vadd.f32 0.0036580483, %v1877_v23  ;;  %v1747_v30 = vand.u32 2147483648, %v3491_v32 }
 0x1f4   : > { %v1890_v51 = vmul.f32 %v1889_v38, %v3552_v34  ;;  %v1745_v16 = vand.u32 2147483647, %v3491_v32  ;;  %v1840_v60 = vadd.f32 0.05243302, %v1839_v63  ;;  %v1704_v1 = vsel %vm3613_vm15, %v3515_v55, %v1700_v33  ;;  %v2679_v5 = vld [vmem:[%s3870_s10 + $0x8] sm:$0xff]  ;;  %v2678_v33 = vld [vmem:[%s3870_s10] sm:$0xff] }
 0x1f5   : > { %vm1742_vm1 = vweird.f32 %v3544_v25  ;;  %v1854_v15 = vmul.f32 %v1853_v56, %v3486_v31  ;;  %v1740_v37 = vadd.f32 %v3544_v25, %v1739_v11  ;;  %v1763_v54 = vmul.f32 %v1762_v43, %v3426_v4  ;;  %1973 = vmatpush.bf16.msrb.mxu0 %v2679_v5 }
 0x1f6   : > { %v3608_v19 = vpop.eup %2785  ;;  %v1891_v47 = vadd.f32 0.112945676, %v1890_v51  ;;  %v1802_v39 = vadd.f32 0.18741608, %v1801_v20  ;;  %v1779_v7 = vmul.f32 %v3566_v40, %v1778_v46  ;;  %v1879_v55 = vmul.f32 %v1878_v21, %v3552_v34 }
 0x1f7   : > { %v1817_v17 = vmul.f32 %v3608_v19, %v3563_v53  ;;  %v3632_v22 = vadd.f32 1.0, %v1854_v15  ;;  %v1669_v48 = vsel %vm3585_vm11, %v3535_v9, %v1664_v49  ;;  %v1725_v4 = vmul.f32 %v1724_v59, %v3395_v29 }
 0x1f8   : > { %v1892_v26 = vmul.f32 %v1891_v47, %v3552_v34  ;;  %v1841_v35 = vmul.f32 %v1840_v60, %v3486_v31  ;;  %vm1741_vm2 = vweird.f32 %v3491_v32  ;;  %vm3643_vm3 = vcmp.eq.f32.partialorder %v1745_v16, 8.507059e+37 }
 0x1f9   : > { %v1818_v0 = vsub.f32 1.0, %v1817_v17  ;;  %v1748_v24 = vor.u32 1.1754944e-38, %v1747_v30  ;;  %2787 = vrcp.f32 %v3632_v22  ;;  %v1709_v14 = vsel %vm3602_vm14, %v1708_v2, %v1704_v1  ;;  %vm3652_vm4 = vmor %vm1741_vm2, %vm1742_vm1  ;;  %1974 = vmatpush.bf16.msrb.mxu0 %v2678_v33 }
 0x1fa   : > { %v1764_v9 = vadd.f32 1.1283791, %v1763_v54  ;;  %v1803_v49 = vmul.f32 %v1802_v39, %v3460_v42  ;;  %v1893_v32 = vadd.f32 0.4994258, %v1892_v26  ;;  %v1744_v38 = vsel %vm3652_vm4, %v3544_v25, %v1740_v37 }
 0x1fb   : > { %v1819_v23 = vmul.f32 %v3608_v19, %v1818_v0  ;;  %v1780_v13 = vadd.f32 %v3566_v40, %v1779_v7  ;;  %vm1782_vm5 = vweird.f32 %v3566_v40  ;;  %v1880_v2 = vadd.f32 0.05243302, %v1879_v55 }
 0x1fc   : > { %vm1822_vm6 = vweird.f32 %v3608_v19  ;;  %v1842_v43 = vadd.f32 0.18741608, %v1841_v35  ;;  %v1894_v42 = vmul.f32 %v1893_v32, %v3552_v34  ;;  %vm1781_vm7 = vweird.f32 %v3517_v57 }
 0x1fd   : > { %v1820_v11 = vadd.f32 %v3608_v19, %v1819_v23  ;;  %v1785_v20 = vand.u32 2147483647, %v3517_v57  ;;  %v1787_v56 = vand.u32 2147483648, %v3517_v57  ;;  %v1827_v25 = vand.u32 2147483648, %v3563_v53  ;;  %vm3672_vm8 = vmor %vm1781_vm7, %vm1782_vm5 }
 0x1fe   : > { %v1804_v46 = vadd.f32 1.1283791, %v1803_v49  ;;  %vm1821_vm9 = vweird.f32 %v3563_v53  ;;  %v1825_v21 = vand.u32 2147483647, %v3563_v53  ;;  %v3678_v51 = vadd.f32 1.0, %v1894_v42 }
 0x1ff   : > { %v2788_v12 = vpop.eup %2787  ;;  %v1710_v16 = vmul.f32 %v1709_v14, %v3570_v44  ;;  %v1749_v30 = vsel %vm3643_vm3, %v1748_v24, %v1744_v38  ;;  %v1765_v57 = vmul.f32 %v1764_v9, %v3416_v41  ;;  %vm3686_vm10 = vmor %vm1821_vm9, %vm1822_vm6  ;;  %v1881_v60 = vmul.f32 %v1880_v2, %v3552_v34 }
 0x200   : > { %v1784_v53 = vsel %vm3672_vm8, %v3566_v40, %v1780_v13  ;;  %v1824_v44 = vsel %vm3686_vm10, %v3608_v19, %v1820_v11  ;;  %v1843_v1 = vmul.f32 %v1842_v43, %v3486_v31  ;;  %v1857_v41 = vmul.f32 %v2788_v12, %v3632_v22 }
 0x201   : > { %vm1786_vm11 = vcmp.eq.f32.partialorder %v1785_v20, 8.507059e+37  ;;  %v1788_v15 = vor.u32 1.1754944e-38, %v1787_v56  ;;  %v1828_v47 = vor.u32 1.1754944e-38, %v1827_v25  ;;  %2789 = vrcp.f32 %v3678_v51 }
 0x202   : > { %v1750_v37 = vmul.f32 %v1749_v30, %v1725_v4  ;;  %v1805_v54 = vmul.f32 %v1804_v46, %v3438_v61  ;;  %vm1826_vm12 = vcmp.eq.f32.partialorder %v1825_v21, 8.507059e+37  ;;  %v1858_v39 = vsub.f32 1.0, %v1857_v41 }
 0x203   : > { %v1789_v0 = vsel %vm1786_vm11, %v1788_v15, %v1784_v53  ;;  %v1829_v40 = vsel %vm1826_vm12, %v1828_v47, %v1824_v44  ;;  %v1867_v5 = vand.u32 2147483648, %v3632_v22  ;;  %v1882_v7 = vadd.f32 0.18741608, %v1881_v60 }
 0x204   : > { %v1844_v19 = vadd.f32 1.1283791, %v1843_v1  ;;  %v1859_v55 = vmul.f32 %v2788_v12, %v1858_v39  ;;  %vm1862_vm13 = vweird.f32 %v2788_v12  ;;  %v1865_v31 = vand.u32 2147483647, %v3632_v22 }
 0x205   : > { %v1577_v26 = vmul.f32 0.5, %v3356_v3  ;;  %v1630_v23 = vmul.f32 %v3548_v45, %v3482_v28  ;;  %v1578_v4 = vmul.f32 0.5, %v3366_v6  ;;  %v1670_v61 = vmul.f32 %v1669_v48, %v3527_v62 }
 0x206   : > { %v1790_v35 = vmul.f32 %v1789_v0, %v1765_v57  ;;  %v1830_v63 = vmul.f32 %v1829_v40, %v1805_v54  ;;  %v1860_v24 = vadd.f32 %v2788_v12, %v1859_v55  ;;  %vm1861_vm14 = vweird.f32 %v3632_v22 }
 0x207   : > { %v2790_v14 = vpop.eup %2789  ;;  %v2600_v29 = vclamps-f32 %v1710_v16, 1.0  ;;  %v2601_v9 = vclamps-f32 %v1750_v37, 1.0  ;;  %vm1863_vm15 = vmor %vm1861_vm14, %vm1862_vm13  ;;  %v1868_v49 = vor.u32 1.1754944e-38, %v1867_v5  ;;  %v1883_v32 = vmul.f32 %v1882_v7, %v3552_v34 }
 0x208   : > { %v1845_v3 = vmul.f32 %v1844_v19, %v3467_v58  ;;  %v1864_v33 = vsel %vm1863_vm15, %v2788_v12, %v1860_v24  ;;  %vm1866_vm1 = vcmp.eq.f32.partialorder %v1865_v31, 8.507059e+37  ;;  %v1897_v6 = vmul.f32 %v2790_v14, %v3678_v51 }
 0x209   : > { %v2598_v28 = vclamps-f32 %v1630_v23, 1.0  ;;  %v2599_v62 = vclamps-f32 %v1670_v61, 1.0  ;;  %v1579_v45 = vmul.f32 0.5, %v3375_v10  ;;  %v1869_v48 = vsel %vm1866_vm1, %v1868_v49, %v1864_v33  ;;  %v2805_v49 = vld [vmem:[%s3077_s15] sm:$0xff] }
 0x20a   : > { %v2602_v38 = vclamps-f32 %v1790_v35, 1.0  ;;  %v2603_v22 = vclamps-f32 %v1830_v63, 1.0  ;;  %v1870_v13 = vmul.f32 %v1869_v48, %v1845_v3  ;;  %v1898_v2 = vsub.f32 1.0, %v1897_v6 }
 0x20b   : > { %v1915_v11 = vadd.f32 1.0, %v2600_v29  ;;  %v1916_v43 = vadd.f32 1.0, %v2601_v9  ;;  %v1884_v42 = vadd.f32 1.1283791, %v1883_v32  ;;  %v1907_v34 = vand.u32 2147483648, %v3678_v51 }
 0x20c   : > { %v2604_v20 = vclamps-f32 %v1870_v13, 1.0  ;;  %v1899_v58 = vmul.f32 %v2790_v14, %v1898_v2  ;;  %vm1902_vm2 = vweird.f32 %v2790_v14  ;;  %v1905_v56 = vand.u32 2147483647, %v3678_v51 }
 0x20d   : > { %v1913_v25 = vadd.f32 1.0, %v2598_v28  ;;  %v1914_v59 = vadd.f32 1.0, %v2599_v62  ;;  %v1580_v46 = vmul.f32 0.5, %v3389_v27  ;;  %v1581_v10 = vmul.f32 0.5, %v3409_v52  ;;  %v2806_v28 = vld [vmem:[%s3077_s15 + $0x8] sm:$0xff] }
 0x20e   : > { %v1917_v21 = vadd.f32 1.0, %v2602_v38  ;;  %v1918_v12 = vadd.f32 1.0, %v2603_v22  ;;  %v1900_v16 = vadd.f32 %v2790_v14, %v1899_v58  ;;  %vm1901_vm3 = vweird.f32 %v3678_v51 }
 0x20f   : > { %v1923_v30 = vmul.f32 %v1915_v11, %v1579_v45  ;;  %v1924_v57 = vmul.f32 %v1916_v43, %v1580_v46  ;;  %v1582_v17 = vmul.f32 0.5, %v3430_v8  ;;  %vm1903_vm4 = vmor %vm1901_vm3, %vm1902_vm2  ;;  %v1908_v60 = vor.u32 1.1754944e-38, %v1907_v34 }
 0x210   : > { %v1919_v53 = vadd.f32 1.0, %v2604_v20  ;;  %v1885_v44 = vmul.f32 %v1884_v42, %v3513_v36  ;;  %v1904_v1 = vsel %vm1903_vm4, %v2790_v14, %v1900_v16  ;;  %vm1906_vm5 = vcmp.eq.f32.partialorder %v1905_v56, 8.507059e+37 }
 0x211   : > { %v1921_v41 = vmul.f32 %v1913_v25, %v1577_v26  ;;  %v1922_v27 = vmul.f32 %v1914_v59, %v1578_v4  ;;  %v1909_v15 = vsel %vm1906_vm5, %v1908_v60, %v1904_v1  ;;  %v1925_v52 = vmul.f32 %v1917_v21, %v1581_v10 }
 0x212   : > { %v1926_v47 = vmul.f32 %v1918_v12, %v1582_v17  ;;  %v1583_v37 = vmul.f32 0.5, %v3453_v50  ;;  %v1910_v54 = vmul.f32 %v1909_v15, %v1885_v44  ;;  %v1930_v51 = vsel %vm923_vm0, %v1923_v30, 0.0  ;;  %v2681_v12 = vld [vmem:[%s3872_s12 + $0x8] sm:$0xff] }
 0x213   : > { %v1937_v39 = vsel %vm923_vm0, %v1924_v57, 0.0  ;;  %v1929_v40 = vsel %vm923_vm0, %v1921_v41, 0.0  ;;  %v1936_v36 = vsel %vm923_vm0, %v1922_v27, 0.0  ;;  %v1932_v5 = vsel %vm923_vm0, %v1925_v52, 0.0  ;;  %2076 = vmatpush.bf16.msra.mxu0 %v2681_v12  ;;  %v2680_v57 = vld [vmem:[%s3872_s12] sm:$0xff] }
 0x214   : > { %v1927_v8 = vmul.f32 %v1919_v53, %v1583_v37  ;;  %v2605_v0 = vclamps-f32 %v1910_v54, 1.0  ;;  %v1939_v7 = vsel %vm923_vm0, %v1926_v47, 0.0  ;;  %v1584_v19 = vmul.f32 0.5, %v3494_v18  ;;  %v2752_v18 = vld [vmem:[%s3871_s11] ss:$0 sm:$0xff] }
 0x215   : > { %v1931_v50 = vadd.f32 %v1930_v51, %v1929_v40  ;;  %v1938_v31 = vadd.f32 %v1937_v39, %v1936_v36  ;;  %v2863_v48 = vmov 32.0   ;;  %v2753_v40 = vld [vmem:[%s3876_s16] ss:$0 sm:$0xff] }
 0x216   : > { %v1920_v55 = vadd.f32 1.0, %v2605_v0  ;;  %v1934_v26 = vsel %vm923_vm0, %v1927_v8, 0.0  ;;  %2791 = vrcp.f32 %v2863_v48 }
 0x217   : > { %v1933_v4 = vadd.f32 %v1932_v5, %v1931_v50  ;;  %v1940_v61 = vadd.f32 %v1939_v7, %v1938_v31  ;;  %2077 = vmatpush.bf16.msra.mxu0 %v2680_v57 }
 0x218   : > { %v1928_v23 = vmul.f32 %v1920_v55, %v1584_v19  ;;  %v2754_v19 = vld [vmem:[%s3877_s17] ss:$0 sm:$0xff] }
 0x219   : > { %v1935_v63 = vadd.f32 %v1934_v26, %v1933_v4 }
 0x21a   : > { %v1941_v35 = vsel %vm923_vm0, %v1928_v23, 0.0 }
 0x21b   : > { %v1942_v24 = vadd.f32 %v1941_v35, %v1940_v61  ;;  %v2755_v61 = vld [vmem:[%s3873_s13] ss:$0 sm:$0xff] }
 0x21c   : > { %v2792_v38 = vpop.eup %2791 }
 0x21d   : > { %v1943_v14 = vpack.c.bf16 %v1942_v24, %v1935_v63  ;;  %v1992_v22 = vmul.f32 32.0, %v2792_v38  ;;  %vm1996_vm6 = vweird.f32 %v2792_v38  ;;  %v2689_v24 = vld [vmem:[%s3874_s14 + $0x38] sm:$0xff] }
 0x21f   : > { %2614 = vmatmul.msk.bf16.vlgmr.msrb.gmra.mxu0 %vm923_vm0, %v1943_v14  ;;  %v1993_v13 = vsub.f32 1.0, %v1992_v22 }
 0x220   : > { %2237 = vmatpush.bf16.msrb.mxu0 %v2689_v24 }
 0x221   : > { %v1994_v2 = vmul.f32 %v2792_v38, %v1993_v13 }
 0x223   : > { %v1995_v11 = vadd.f32 %v2792_v38, %v1994_v2 }
 0x225   : > { %v3738_v43 = vsel %vm1996_vm6, %v2792_v38, %v1995_v11  ;;  %v2686_v38 = vld [vmem:[%s3874_s14 + $0x20] sm:$0xff] }
 0x29c   : > { %v1976_v29 = vpop.f32.mrf.mxu0 }
 0x29d   : > { %v1977_v9 = vadd.f32 %v2752_v18, %v1976_v29  ;;  %v2688_v29 = vld [vmem:[%s3874_s14 + $0x30] sm:$0xff] }
 0x29e   : > { %2238 = vmatpush.bf16.msrb.mxu0 %v2688_v29 }
 0x29f   : > { %v1981_v32 = vadd.f32 %v2805_v49, %v1977_v9 }
 0x2a1   : > { %v1985_v3 = vsel %vm923_vm0, %v1981_v32, 0.0 }
 0x2a2   : > { %1986 = vadd.xlane.f32.xlu0 %v1985_v3 }
 0x2a4   : > { %v1978_v33 = vpop.f32.mrf.mxu0 }
 0x2a5   : > { %v1979_v6 = vadd.f32 %v2752_v18, %v1978_v33 }
 0x2a7   : > { %v1982_v62 = vadd.f32 %v2806_v28, %v1979_v6  ;;  %v2687_v6 = vld [vmem:[%s3874_s14 + $0x28] sm:$0xff] }
 0x2a8   : > { %2239 = vmatpush.bf16.msrb.mxu0 %v2687_v6 }
 0x2a9   : > { %v1988_v45 = vsel %vm923_vm0, %v1982_v62, 0.0 }
 0x2aa   : > { %1989 = vadd.xlane.f32.xlu0 %v1988_v45 }
 0x2ac   : > { %2240 = vmatpush.bf16.msrb.mxu0 %v2686_v38 }
 0x315   : > { %v1987_v42 = vpop.xlane.xlu0 %1986 }
 0x316   : > { %v1998_v34 = vmul.f32 %v3738_v43, %v1987_v42 }
 0x318   : > { %v2000_v20 = vsub.f32 %v1981_v32, %v1998_v34  ;;  %v2685_v34 = vld [vmem:[%s3874_s14 + $0x18] sm:$0xff] }
 0x319   : > { %2241 = vmatpush.bf16.msrb.mxu0 %v2685_v34 }
 0x31a   : > { %v2002_v58 = vmul.f32 %v2000_v20, %v2000_v20 }
 0x31c   : > { %v2004_v56 = vsel %vm923_vm0, %v2002_v58, 0.0 }
 0x31d   : > { %2005 = vadd.xlane.f32.xlu1 %v2004_v56  ;;  %v1990_v25 = vpop.xlane.xlu0 %1989 }
 0x31e   : > { %v1999_v59 = vmul.f32 %v3738_v43, %v1990_v25 }
 0x320   : > { %v2001_v46 = vsub.f32 %v1982_v62, %v1999_v59 }
 0x322   : > { %v2003_v10 = vmul.f32 %v2001_v46, %v2001_v46 }
 0x324   : > { %v2007_v21 = vsel %vm923_vm0, %v2003_v10, 0.0 }
 0x325   : > { %2008 = vadd.xlane.f32.xlu1 %v2007_v21  ;;  %v2684_v21 = vld [vmem:[%s3874_s14 + $0x10] sm:$0xff] }
 0x326   : > { %2242 = vmatpush.bf16.msrb.mxu0 %v2684_v21 }
 0x390   : > { %v2006_v16 = vpop.xlane.xlu1 %2005 }
 0x391   : > { %v2010_v30 = vmul.f32 %v2006_v16, %v3738_v43 }
 0x393   : > { %v2012_v17 = vadd.f32 1e-05, %v2010_v30 }
 0x395   : > { %2793 = vrsqrt.f32 %v2012_v17  ;;  %vm2020_vm8 = vweird.f32 %v2012_v17 }
 0x398   : > { %v2009_v60 = vpop.xlane.xlu1 %2008 }
 0x399   : > { %v2011_v53 = vmul.f32 %v2009_v60, %v3738_v43 }
 0x39b   : > { %v2794_v44 = vpop.eup %2793  ;;  %v2013_v1 = vadd.f32 1e-05, %v2011_v53 }
 0x39c   : > { %v2015_v41 = vmul.f32 %v2794_v44, %v2012_v17  ;;  %vm2021_vm7 = vweird.f32 %v2794_v44 }
 0x39d   : > { %2795 = vrsqrt.f32 %v2013_v1  ;;  %vm2022_vm9 = vmor %vm2020_vm8, %vm2021_vm7  ;;  %vm2030_vm11 = vweird.f32 %v2013_v1 }
 0x39e   : > { %v2016_v27 = vmul.f32 %v2794_v44, %v2015_v41 }
 0x3a0   : > { %v2017_v15 = vmul.f32 0.5, %v2016_v27 }
 0x3a2   : > { %v2018_v52 = vsub.f32 1.5, %v2017_v15 }
 0x3a3   : > { %v2796_v47 = vpop.eup %2795 }
 0x3a4   : > { %v2019_v37 = vmul.f32 %v2794_v44, %v2018_v52  ;;  %v2025_v54 = vmul.f32 %v2796_v47, %v2013_v1  ;;  %vm2031_vm10 = vweird.f32 %v2796_v47 }
 0x3a5   : > { %vm2032_vm12 = vmor %vm2030_vm11, %vm2031_vm10 }
 0x3a6   : > { %v2026_v51 = vmul.f32 %v2796_v47, %v2025_v54  ;;  %v2023_v39 = vsel %vm2022_vm9, %v2794_v44, %v2019_v37  ;;  %v2683_v44 = vld [vmem:[%s3874_s14 + $0x8] sm:$0xff] }
 0x3a7   : > { %v2034_v36 = vmul.f32 %v2023_v39, %v2000_v20  ;;  %2243 = vmatpush.bf16.msrb.mxu0 %v2683_v44 }
 0x3a8   : > { %v2027_v8 = vmul.f32 0.5, %v2026_v51 }
 0x3a9   : > { %v2039_v55 = vmul.f32 %v2753_v40, %v2034_v36 }
 0x3aa   : > { %v2028_v0 = vsub.f32 1.5, %v2027_v8 }
 0x3ab   : > { %v3758_v26 = vadd.f32 %v2754_v19, %v2039_v55 }
 0x3ac   : > { %v2029_v5 = vmul.f32 %v2796_v47, %v2028_v0 }
 0x3ae   : > { %v2033_v7 = vsel %vm2032_vm12, %v2796_v47, %v2029_v5  ;;  %v2682_v47 = vld [vmem:[%s3874_s14] sm:$0xff] }
 0x3af   : > { %v2035_v50 = vmul.f32 %v2033_v7, %v2001_v46  ;;  %2244 = vmatpush.bf16.msrb.mxu0 %v2682_v47 }
 0x3b1   : > { %v2040_v31 = vmul.f32 %v2753_v40, %v2035_v50 }
 0x3b3   : > { %v3760_v23 = vadd.f32 %v2754_v19, %v2040_v31 }
 0x3b5   : > { %v2046_v4 = vpack.c.bf16 %v3760_v23, %v3758_v26 }
 0x3b7   : > { %2623 = vmatmul.msk.bf16.vlgmr.msra.gmra.mxu0 %vm923_vm0, %v2046_v4 }
 0x434   : > { %v2079_v35 = vpop.f32.mrf.mxu0 }
 0x435   : > { %v3768_v63 = vadd.f32 %v2755_v61, %v2079_v35 }
 0x437   : > { %v3774_v14 = vmul.f32 0.70710677, %v3768_v63 }
 0x439   : > { %v2088_v18 = vmul.f32 %v3774_v14, %v3774_v14 }
 0x43b   : > { %v2089_v9 = vmin.f32 %v2088_v18, 16.0 }
 0x43c   : > { %v2081_v49 = vpop.f32.mrf.mxu0 }
 0x43d   : > { %v2090_v32 = vmul.f32 2.1237322e-06, %v2089_v9  ;;  %v2101_v3 = vmul.f32 3.8918573e-05, %v2089_v9  ;;  %v3781_v33 = vadd.f32 %v2755_v61, %v2081_v49 }
 0x43f   : > { %v2091_v28 = vadd.f32 0.00028619796, %v2090_v32  ;;  %v2102_v62 = vadd.f32 0.001143296, %v2101_v3  ;;  %v3787_v45 = vmul.f32 0.70710677, %v3781_v33 }
 0x441   : > { %v2103_v48 = vmul.f32 %v2102_v62, %v2089_v9  ;;  %v2128_v22 = vmul.f32 %v3787_v45, %v3787_v45  ;;  %v2092_v13 = vmul.f32 %v2091_v28, %v2089_v9 }
 0x443   : > { %v2104_v2 = vadd.f32 0.014752088, %v2103_v48  ;;  %v2129_v11 = vmin.f32 %v2128_v22, 16.0  ;;  %v2093_v56 = vadd.f32 0.0036580483, %v2092_v13 }
 0x445   : > { %v2105_v42 = vmul.f32 %v2104_v2, %v2089_v9  ;;  %v2130_v20 = vmul.f32 2.1237322e-06, %v2129_v11  ;;  %v2141_v58 = vmul.f32 3.8918573e-05, %v2129_v11  ;;  %v2094_v30 = vmul.f32 %v2093_v56, %v2089_v9 }
 0x447   : > { %v2106_v25 = vadd.f32 0.112945676, %v2105_v42  ;;  %v2131_v59 = vadd.f32 0.00028619796, %v2130_v20  ;;  %v2142_v46 = vadd.f32 0.001143296, %v2141_v58 }
 0x448   : > { %v2095_v41 = vadd.f32 0.05243302, %v2094_v30 }
 0x449   : > { %v2107_v10 = vmul.f32 %v2106_v25, %v2089_v9  ;;  %v2132_v12 = vmul.f32 %v2131_v59, %v2129_v11  ;;  %v2143_v16 = vmul.f32 %v2142_v46, %v2129_v11  ;;  %v2084_v59 = vmul.f32 0.5, %v3768_v63 }
 0x44a   : > { %v2096_v54 = vmul.f32 %v2095_v41, %v2089_v9  ;;  %v2085_v46 = vmul.f32 0.5, %v3781_v33  ;;  %v2315_v41 = vld [vmem:[%s887_s28] sm:$0xff] }
 0x44b   : > { %v2108_v57 = vadd.f32 0.4994258, %v2107_v10  ;;  %v2133_v17 = vadd.f32 0.0036580483, %v2132_v12  ;;  %v2144_v60 = vadd.f32 0.014752088, %v2143_v16 }
 0x44c   : > { %v2097_v40 = vadd.f32 0.18741608, %v2096_v54 }
 0x44d   : > { %v2109_v53 = vmul.f32 %v2108_v57, %v2089_v9  ;;  %v2145_v1 = vmul.f32 %v2144_v60, %v2129_v11  ;;  %v2134_v15 = vmul.f32 %v2133_v17, %v2129_v11 }
 0x44e   : > { %v2098_v55 = vmul.f32 %v2097_v40, %v2089_v9 }
 0x44f   : > { %v2110_v27 = vadd.f32 1.0, %v2109_v53  ;;  %v2146_v52 = vadd.f32 0.112945676, %v2145_v1  ;;  %v2135_v51 = vadd.f32 0.05243302, %v2134_v15  ;;  %v2864_v1 = vmov 0  }
 0x450   : > { %v2099_v24 = vadd.f32 1.1283791, %v2098_v55  ;;  %2749 = vset.pattern.permute.xlu0 %v2864_v1  ;;  %2748 = vset.pattern.permute.xlu2 %v2864_v1 }
 0x451   : > { %2797 = vrcp.f32 %v2110_v27  ;;  %v2147_v37 = vmul.f32 %v2146_v52, %v2129_v11  ;;  %v2136_v5 = vmul.f32 %v2135_v51, %v2129_v11  ;;  %v2122_v31 = vand.u32 2147483648, %v2110_v27 }
 0x452   : > { %v2120_v61 = vand.u32 2147483647, %v2110_v27  ;;  %vm2116_vm14 = vweird.f32 %v2110_v27  ;;  %v2100_v28 = vmul.f32 %v2099_v24, %v3774_v14 }
 0x453   : > { %v2148_v39 = vadd.f32 0.4994258, %v2147_v37  ;;  %v2137_v4 = vadd.f32 0.18741608, %v2136_v5  ;;  %v2123_v49 = vor.u32 1.1754944e-38, %v2122_v31 }
 0x454   : > { %vm2121_vm1 = vcmp.eq.f32.partialorder %v2120_v61, 8.507059e+37 }
 0x455   : > { %v2149_v8 = vmul.f32 %v2148_v39, %v2129_v11  ;;  %v2138_v32 = vmul.f32 %v2137_v4, %v2129_v11 }
 0x457   : > { %v2798_v0 = vpop.eup %2797  ;;  %v2150_v7 = vadd.f32 1.0, %v2149_v8  ;;  %v2139_v9 = vadd.f32 1.1283791, %v2138_v32  ;;  %v2316_v8 = vld [vmem:[%s887_s28 + $0x8] sm:$0xff] }
 0x458   : > { %v2112_v36 = vmul.f32 %v2798_v0, %v2110_v27  ;;  %vm2117_vm13 = vweird.f32 %v2798_v0 }
 0x459   : > { %2799 = vrcp.f32 %v2150_v7  ;;  %vm2118_vm15 = vmor %vm2116_vm14, %vm2117_vm13  ;;  %v2162_v48 = vand.u32 2147483648, %v2150_v7  ;;  %v2160_v13 = vand.u32 2147483647, %v2150_v7  ;;  %vm2156_vm3 = vweird.f32 %v2150_v7 }
 0x45a   : > { %v2113_v19 = vsub.f32 1.0, %v2112_v36  ;;  %v2140_v20 = vmul.f32 %v2139_v9, %v3787_v45  ;;  %v2756_v45 = vld [vmem:[%s3929_s4] ss:$0 sm:$0xff]  ;;  %s3933_s4 = sld [smem:[#allocation15_spill]] }
 0x45b   : > { %v2163_v42 = vor.u32 1.1754944e-38, %v2162_v48  ;;  %vm2161_vm5 = vcmp.eq.f32.partialorder %v2160_v13, 8.507059e+37 }
 0x45c   : > { %v2114_v50 = vmul.f32 %v2798_v0, %v2113_v19 }
 0x45e   : > { %v2115_v35 = vadd.f32 %v2798_v0, %v2114_v50 }
 0x45f   : > { %v2800_v18 = vpop.eup %2799 }
 0x460   : > { %v2119_v29 = vsel %vm2118_vm15, %v2798_v0, %v2115_v35  ;;  %v2152_v3 = vmul.f32 %v2800_v18, %v2150_v7  ;;  %vm2157_vm2 = vweird.f32 %v2800_v18  ;;  %s897_s29 = scalar_lea.vmem %s3933_s4, %s3071_s30 }
 0x461   : > { %v2124_v6 = vsel %vm2121_vm1, %v2123_v49, %v2119_v29  ;;  %vm2158_vm4 = vmor %vm2156_vm3, %vm2157_vm2  ;;  %v2757_v29 = vld [vmem:[%s3931_s27] ss:$0 sm:$0xff] }
 0x462   : > { %v2153_v62 = vsub.f32 1.0, %v2152_v3  ;;  %v2125_v38 = vmul.f32 %v2124_v6, %v2100_v28  ;;  %v2758_v3 = vld [vmem:[%s3932_s20] ss:$0 sm:$0xff] }
 0x464   : > { %v2154_v22 = vmul.f32 %v2800_v18, %v2153_v62  ;;  %v2624_v34 = vclamps-f32 %v2125_v38, 1.0 }
 0x466   : > { %v2155_v2 = vadd.f32 %v2800_v18, %v2154_v22  ;;  %v2168_v25 = vadd.f32 1.0, %v2624_v34 }
 0x468   : > { %v2159_v11 = vsel %vm2158_vm4, %v2800_v18, %v2155_v2  ;;  %v2170_v21 = vmul.f32 %v2168_v25, %v2084_v59 }
 0x469   : > { %v2164_v58 = vsel %vm2161_vm5, %v2163_v42, %v2159_v11 }
 0x46a   : > { %v2165_v56 = vmul.f32 %v2164_v58, %v2140_v20 }
 0x46c   : > { %v2625_v14 = vclamps-f32 %v2165_v56, 1.0 }
 0x46e   : > { %v2169_v10 = vadd.f32 1.0, %v2625_v14 }
 0x470   : > { %v2171_v12 = vmul.f32 %v2169_v10, %v2085_v46 }
 0x472   : > { %v2172_v16 = vpack.c.bf16 %v2171_v12, %v2170_v21 }
 0x474   : > { %2245 = vmatmul.bf16.vlgmr.msrb.gmra.mxu0 %v2172_v16 }
 0x4f1   : > { %v2246_v30 = vpop.f32.mrf.mxu0 }
 0x4f2   : > { %v2251_v57 = vadd.f32 %v2246_v30, %v3758_v26 }
 0x4f4   : > { %v2257_v17 = vadd.f32 %v2756_v45, %v2251_v57 }
 0x4f6   : > { %v2261_v60 = vsel %vm923_vm0, %v2257_v17, 0.0 }
 0x4f7   : > { %2262 = vadd.xlane.f32.xlu2 %v2261_v60 }
 0x4f9   : > { %v2248_v63 = vpop.f32.mrf.mxu0 }
 0x4fa   : > { %v2252_v33 = vadd.f32 %v2248_v63, %v3760_v23 }
 0x4fc   : > { %v2258_v53 = vadd.f32 %v2756_v45, %v2252_v33 }
 0x4fe   : > { %v2264_v44 = vsel %vm923_vm0, %v2258_v53, 0.0 }
 0x4ff   : > { %2265 = vadd.xlane.f32.xlu2 %v2264_v44 }
 0x517   : > { %2319 = vperm.xlu2 %2748, %v2315_v41  }
 0x56a   : > { %v2263_v26 = vpop.xlane.xlu2 %2262 }
 0x56b   : > { %v2267_v27 = vmul.f32 %v2263_v26, %v3738_v43 }
 0x56d   : > { %v2269_v15 = vsub.f32 %v2257_v17, %v2267_v27 }
 0x56f   : > { %v2271_v52 = vmul.f32 %v2269_v15, %v2269_v15 }
 0x571   : > { %v2273_v23 = vsel %vm923_vm0, %v2271_v52, 0.0 }
 0x572   : > { %2274 = vadd.xlane.f32.xlu0 %v2273_v23  ;;  %v2266_v47 = vpop.xlane.xlu2 %2265 }
 0x573   : > { %v2268_v37 = vmul.f32 %v2266_v47, %v3738_v43 }
 0x575   : > { %v2270_v54 = vsub.f32 %v2258_v53, %v2268_v37 }
 0x577   : > { %v2272_v51 = vmul.f32 %v2270_v54, %v2270_v54 }
 0x579   : > { %v2276_v39 = vsel %vm923_vm0, %v2272_v51, 0.0 }
 0x57a   : > { %2277 = vadd.xlane.f32.xlu1 %v2276_v39  ;;  %v2320_v9 = vpop.permute.xlu2 %2319 }
 0x586   : > { %2324 = vperm.xlu0 %2749, %v2316_v8  }
 0x5e5   : > { %v2275_v0 = vpop.xlane.xlu0 %2274 }
 0x5e6   : > { %v2279_v40 = vmul.f32 %v2275_v0, %v3738_v43 }
 0x5e8   : > { %v2281_v36 = vadd.f32 1e-05, %v2279_v40 }
 0x5ea   : > { %2801 = vrsqrt.f32 %v2281_v36  ;;  %vm2289_vm7 = vweird.f32 %v2281_v36 }
 0x5ed   : > { %v2278_v5 = vpop.xlane.xlu1 %2277 }
 0x5ee   : > { %v2280_v7 = vmul.f32 %v2278_v5, %v3738_v43 }
 0x5f0   : > { %v2802_v19 = vpop.eup %2801  ;;  %v2282_v55 = vadd.f32 1e-05, %v2280_v7 }
 0x5f1   : > { %v2284_v50 = vmul.f32 %v2802_v19, %v2281_v36  ;;  %vm2290_vm6 = vweird.f32 %v2802_v19 }
 0x5f2   : > { %2803 = vrsqrt.f32 %v2282_v55  ;;  %vm2291_vm8 = vmor %vm2289_vm7, %vm2290_vm6  ;;  %vm2299_vm10 = vweird.f32 %v2282_v55 }
 0x5f3   : > { %v2285_v31 = vmul.f32 %v2802_v19, %v2284_v50 }
 0x5f5   : > { %v2286_v4 = vmul.f32 0.5, %v2285_v31 }
 0x5f7   : > { %v2287_v61 = vsub.f32 1.5, %v2286_v4 }
 0x5f8   : > { %v2804_v35 = vpop.eup %2803  ;;  %v2325_v34 = vpop.permute.xlu0 %2324 }
 0x5f9   : > { %v2288_v24 = vmul.f32 %v2802_v19, %v2287_v61  ;;  %v2294_v18 = vmul.f32 %v2804_v35, %v2282_v55  ;;  %vm2300_vm9 = vweird.f32 %v2804_v35 }
 0x5fa   : > { %vm2301_vm11 = vmor %vm2299_vm10, %vm2300_vm9 }
 0x5fb   : > { %v2295_v49 = vmul.f32 %v2804_v35, %v2294_v18  ;;  %v2292_v43 = vsel %vm2291_vm8, %v2802_v19, %v2288_v24 }
 0x5fc   : > { %v2303_v32 = vmul.f32 %v2292_v43, %v2269_v15 }
 0x5fd   : > { %v2296_v6 = vmul.f32 0.5, %v2295_v49 }
 0x5fe   : > { %v2308_v28 = vmul.f32 %v2757_v29, %v2303_v32 }
 0x5ff   : > { %v2297_v62 = vsub.f32 1.5, %v2296_v6 }
 0x600   : > { %v2313_v48 = vadd.f32 %v2758_v3, %v2308_v28 }
 0x601   : > { %v2298_v38 = vmul.f32 %v2804_v35, %v2297_v62 }
 0x602   : > { %v2327_v22 = vmul.f32 %v2320_v9, %v2313_v48 }
 0x603   : > { %v2302_v13 = vsel %vm2301_vm11, %v2804_v35, %v2298_v38 }
 0x604   : > { %2329 = vst.msk [vmem:[%s897_s29] sm:$0xff] %vm923_vm0, %v2327_v22  ;;  %v2304_v2 = vmul.f32 %v2302_v13, %v2270_v54 }
 0x606   : > { %v2309_v42 = vmul.f32 %v2757_v29, %v2304_v2 }
 0x608   : > { %v2314_v20 = vadd.f32 %v2758_v3, %v2309_v42 }
 0x60a   : > { %v2328_v11 = vmul.f32 %v2325_v34, %v2314_v20 }
 0x60c   : > { %2330 = vst.msk [vmem:[%s897_s29 + $0x8] sm:$0xff] %vm923_vm0, %v2328_v11 }
 0x60d PF: > { %s30_s3 = sadd.s32 1, %s2861_s3   ;;  %s3934_s0 = sld [smem:[#allocation6_spill]] }
 0x60e   : > { %p27_p12 = scmp.ge.s32.totalorder %s30_s3, 6   ;;  %s3935_s30 = sld [smem:[#allocation4_spill]] }
 0x60f   : > { %s3936_s21 = sld [smem:[#allocation5_spill]]  ;;  %s3937_s1 = smov %s2841_s22 }
 0x610   : > { %s3939_s23 = smov %s2853_s2  ;;  %s3940_s24 = smov %s2857_s25 }
 0x611   :  { %29 = sbr.rel (!%p27_p12) target bundleno = 14 (0xe), region = 231 }
 0x613   : > { %s3938_s22 = smov %s3934_s0 }
 0x614   : > { %s3941_s2 = smov %s3935_s30 }
 0x615   : > { %s3942_s25 = smov %s3936_s21 }

// kernel: mpnn_decoder_forward.5
= control target key start
LH: loop header
LB: loop body
LE: loop exit
PB: predicated region body
PF: predicated region fallthrough
CT: control target
= control target key end

     0   :  { %s3968_s0 = inlined_call_operand.vmem [shape: f32[2,32,32], index: 0, kind: input, shape index: {}]   ;;  %s3969_s1 = inlined_call_operand.vmem [shape: bf16[2,4,32,64], index: 1, kind: input, shape index: {}]   ;;  %s3970_s2 = inlined_call_operand.vmem [shape: bf16[2,4,32,32], index: 2, kind: input, shape index: {}]   ;;  %s3971_s3 = inlined_call_operand.vmem [shape: f32[2,32,1], index: 3, kind: input, shape index: {}]   ;;  %s3972_s4 = inlined_call_operand.vmem [shape: bf16[32,32], index: 4, kind: input, shape index: {}]   ;;  %s3973_s5 = inlined_call_operand.vmem [shape: bf16[64,32], index: 5, kind: input, shape index: {}]   ;;  %s3974_s6 = inlined_call_operand.vmem [shape: bf16[32,32], index: 6, kind: input, shape index: {}]   ;;  %s3975_s7 = inlined_call_operand.vmem [shape: f32[1,32], index: 7, kind: input, shape index: {}]   ;;  %s3976_s8 = inlined_call_operand.vmem [shape: bf16[32,32], index: 8, kind: input, shape index: {}]   ;;  %s3977_s9 = inlined_call_operand.vmem [shape: f32[1,32], index: 9, kind: input, shape index: {}]   ;;  %s3978_s10 = inlined_call_operand.vmem [shape: bf16[32,32], index: 10, kind: input, shape index: {}]   ;;  %s3979_s11 = inlined_call_operand.vmem [shape: f32[1,32], index: 11, kind: input, shape index: {}]   ;;  %s3980_s12 = inlined_call_operand.vmem [shape: bf16[32,128], index: 12, kind: input, shape index: {}]   ;;  %s3981_s13 = inlined_call_operand.vmem [shape: f32[1,128], index: 13, kind: input, shape index: {}]   ;;  %s3982_s14 = inlined_call_operand.vmem [shape: bf16[128,32], index: 14, kind: input, shape index: {}]   ;;  %s3983_s15 = inlined_call_operand.vmem [shape: f32[1,32], index: 15, kind: input, shape index: {}]   ;;  %s3984_s16 = inlined_call_operand.vmem [shape: f32[1,32], index: 16, kind: input, shape index: {}]   ;;  %s3985_s17 = inlined_call_operand.vmem [shape: f32[1,32], index: 17, kind: input, shape index: {}]   ;;  %s3986_s18 = inlined_call_operand.vmem [shape: f32[1,32], index: 18, kind: input, shape index: {}]   ;;  %s3987_s19 = inlined_call_operand.vmem [shape: f32[1,32], index: 19, kind: input, shape index: {}]   ;;  %s3988_s20 = inlined_call_operand.hbm [shape: f32[2,32,32], index: 20, kind: output, shape index: {}]  }
   0x1   :  { %3998 = sst [smem:[#allocation14_spill]] %s3968_s0 }
   0x2   :  { %3999 = sst [smem:[#allocation15_spill]] %s3969_s1 }
   0x3   :  { %4000 = sst [smem:[#allocation16_spill]] %s3970_s2 }
   0x4   :  { %4001 = sst [smem:[#allocation17_spill]] %s3971_s3 }
   0x5   :  { %4002 = sst [smem:[#allocation18_spill]] %s3972_s4 }
   0x6   :  { %4003 = sst [smem:[#allocation19_spill]] %s3973_s5 }
   0x7   :  { %4004 = sst [smem:[#allocation20_spill]] %s3974_s6 }
   0x8   :  { %4005 = sst [smem:[#allocation21_spill]] %s3983_s15 }
   0x9   :  { %4006 = sst [smem:[#allocation22_spill]] %s3986_s18 }
   0xa   :  { %4007 = sst [smem:[#allocation23_spill]] %s3987_s19 }
   0xb   :  { %4008 = sst [smem:[#allocation24_spill]] %s3988_s20 }
   0xc   :  { %25 = vsyncpa [#allocation5], 0 }
   0xd   :  { %27 = vsyncpa [#allocation5 + $0x1], 0  ;;  %s3031_s1 = smov 0   ;;  %s3033_s22 = smov 0  }
   0xe   :  { %s3035_s23 = smov 0   ;;  %s3037_s24 = smov 0  }
   0xf   :  { %s3039_s2 = smov 0   ;;  %s3041_s25 = smov 0  }
  0x10   :  { %s3043_s3 = smov 0   ;;  %s3045_s26 = smov 0  }
  0x11 LB: > { %4009 = sst [smem:[#allocation7_spill]] %s2892_s1  ;;  %s2481_s27 = sadd.s32 4294967295, %s2920_s26   ;;  %s2920_s26 = sphi %s3045_s26, %s33_s26   ;;  %s2916_s3 = sphi %s3043_s3, %s4064_s3   ;;  %s2912_s25 = sphi %s3041_s25, %s4069_s25   ;;  %s2908_s2 = sphi %s3039_s2, %s4062_s2   ;;  %s2904_s24 = sphi %s3037_s24, %s4068_s24   ;;  %s2900_s23 = sphi %s3035_s23, %s4067_s23   ;;  %s2896_s22 = sphi %s3033_s22, %s4066_s22   ;;  %s2892_s1 = sphi %s3031_s1, %s4065_s1  }
  0x12   : > { %4010 = sst [smem:[#allocation8_spill]] %s2916_s3  ;;  %s2482_s28 = sadd.s32 4294967294, %s2920_s26  }
  0x13   : > { %s42_s4 = sadd.s32 1, %s2912_s25  ;;  %s45_s29 = sadd.s32 1, %s2916_s3 }
  0x14   : > { %p43_p0 = scmp.ge.s32.totalorder %s42_s4, 2  ;;  %p89_p1 = scmp.ne.s32.totalorder %s2900_s23, %s2896_s22 }
  0x15   : > { %p90_p2 = scmp.eq.s32.totalorder %s2920_s26, 0  ;;  %p513_p5 = scmp.eq.s32.totalorder %s2481_s27, 3 }
  0x16   : > { %s4071_s4 = smov (%p43_p0, %s42_s4), 0  ;;  %s4073_s29 = smov (!%p43_p0, %s45_s29), %s2916_s3 }
  0x17   : > { %4011 = sst [smem:[#allocation9_spill]] %s4071_s4  ;;  %s78_s30 = ssub.s32 %s2912_s25, %s4071_s4 }
  0x18   : > { %p3083_p3 = por %p90_p2, %p89_p1  ;;  %p47_p4 = scmp.ge.s32.totalorder %s4073_s29, 2 }
  0x19   : > { %p518_p6 = scmp.ne.s32.totalorder %s2896_s22, %s2892_s1  ;;  %p519_p7 = scmp.eq.s32.totalorder %s2482_s28, 3 }
  0x1a   : > { %s4075_s29 = smov (%p47_p4, %s4073_s29), 0  ;;  %p3091_p8 = por %p513_p5, %p89_p1 }
  0x1b   : > { %4013 = sst [smem:[#allocation10_spill]] %s4075_s29  ;;  %p3095_p9 = por %p519_p7, %p518_p6 }
  0x1c   : > { %s4014_s21 = scalar_select %p3091_p8, 1, 0 }
  0x1d   : > { %s4016_s20 = scalar_select %p3095_p9, 1, 0 }
  0x1e   : > { %4015 = sst [smem:[#allocation11_spill]] %s4014_s21  ;;  %s77_s4 = ssub.s32 %s2916_s3, %s4075_s29 }
  0x1f   : > { %4017 = sst [smem:[#allocation12_spill]] %s4016_s20  ;;  %s79_s19 = sor.u32 %s78_s30, %s77_s4 }
  0x20   : > { %s82_s18 = sadd.s32 1, %s2900_s23  ;;  %p80_p10 = scmp.eq.s32.totalorder %s79_s19, 0 }
  0x21   : > { %p2484_p11 = scmp.ge.s32.totalorder %s2920_s26, 4 }
  0x22   : > { %s3103_s15 = scalar_select %p80_p10, %s2900_s23, %s82_s18  }
  0x23   : > { %583 = sbr.rel (%p2484_p11) target bundleno = 68 (0x44), region = 80 }
  0x24   : > { %4018 = sst [smem:[#allocation13_spill]] %s3103_s15 }
  0x28   : > { %599 = sbr.rel (!%p3083_p3) target bundleno = 54 (0x36), region = 88  ;;  %s601_s27 = sand.u32 (%p3083_p3), 1, %s2900_s23  }
  0x29   : > { %s2486_s28 = sshll.u32 (%p3083_p3), %s2912_s25, 1  ;;  %s2485_s1 = sshll.u32 (%p3083_p3), %s601_s27, 5 }
  0x2a   : > { %s2487_s21 = sshll.u32 (%p3083_p3), %s2916_s3, 4  ;;  %s4019_s19 = sld [smem:[#allocation15_spill]] (%p3083_p3) }
  0x2b   : > { %s606_s20 = sadd.s32 (%p3083_p3), %s2487_s21, %s2486_s28  ;;  %s603_s15 = scalar_lea.vmem (%p3083_p3), [#allocation2], %s2485_s1 }
  0x2c   : > { %s2488_s29 = sshll.u32 (%p3083_p3), %s606_s20, 2 }
  0x30   : > { %s608_s18 = scalar_lea.vmem %s4019_s19, %s2488_s29 }
  0x31   : > { %v625_v0 = vld [vmem:[%s608_s18] sm:$0xff]   ;;  %v629_v1 = vld [vmem:[%s608_s18 + $0x10] sm:$0xff]  }
  0x32   : > { %v633_v2 = vld [vmem:[%s608_s18 + $0x20] sm:$0xff]   ;;  %626 = vst [vmem:[%s603_s15] sm:$0xff] %v625_v0   ;;  %v637_v3 = vld [vmem:[%s608_s18 + $0x30] sm:$0xff]  }
  0x33   : > { %630 = vst [vmem:[%s603_s15 + $0x8] sm:$0xff] %v629_v1  }
  0x34   : > { %634 = vst [vmem:[%s603_s15 + $0x10] sm:$0xff] %v633_v2  }
  0x35   : > { %638 = vst [vmem:[%s603_s15 + $0x18] sm:$0xff] %v637_v3  }
  0x36 PF: > { %680 = sbr.rel (!%p3083_p3) target bundleno = 68 (0x44), region = 129  ;;  %s682_s20 = sand.u32 (%p3083_p3), 1, %s2900_s23  }
  0x37   : > { %s2490_s21 = sshll.u32 (%p3083_p3), %s2912_s25, 1  ;;  %s2489_s27 = sshll.u32 (%p3083_p3), %s682_s20, 5 }
  0x38   : > { %s2491_s29 = sshll.u32 (%p3083_p3), %s2916_s3, 4  ;;  %s4020_s19 = sld [smem:[#allocation16_spill]] (%p3083_p3) }
  0x39   : > { %s687_s28 = sadd.s32 (%p3083_p3), %s2491_s29, %s2490_s21  ;;  %s684_s15 = scalar_lea.vmem (%p3083_p3), [#allocation3], %s2489_s27 }
  0x3a   : > { %s2492_s4 = sshll.u32 (%p3083_p3), %s687_s28, 2 }
  0x3e   : > { %s689_s18 = scalar_lea.vmem %s4020_s19, %s2492_s4 }
  0x3f   : > { %v706_v4 = vld [vmem:[%s689_s18] sm:$0xff]   ;;  %v710_v5 = vld [vmem:[%s689_s18 + $0x10] sm:$0xff]  }
  0x40   : > { %v714_v6 = vld [vmem:[%s689_s18 + $0x20] sm:$0xff]   ;;  %707 = vst [vmem:[%s684_s15] sm:$0xff] %v706_v4   ;;  %v718_v7 = vld [vmem:[%s689_s18 + $0x30] sm:$0xff]  }
  0x41   : > { %711 = vst [vmem:[%s684_s15 + $0x8] sm:$0xff] %v710_v5  }
  0x42   : > { %715 = vst [vmem:[%s684_s15 + $0x10] sm:$0xff] %v714_v6  }
  0x43   : > { %719 = vst [vmem:[%s684_s15 + $0x18] sm:$0xff] %v718_v7  }
  0x44 PF: > { %p2493_p12 = scmp.ge.s32.totalorder %s2920_s26, 1  ;;  %p773_p13 = scmp.lt.s32.totalorder %s2920_s26, 5 }
  0x46   : > { %p774_p0 = pnand %p2493_p12, %p773_p13 }
  0x47   : > { %s4021_s5 = sld [smem:[#allocation19_spill]] (!%p774_p0)  ;;  %s3131_s28 = sshll.u32 (!%p774_p0), %s2904_s24, 1 }
  0x48   : > { %777 = sbr.rel (%p774_p0) target bundleno = 1563 (0x61b), region = 174  ;;  %s4022_s29 = sld [smem:[#allocation18_spill]] (!%p774_p0) }
  0x49   : > { %p867_p1 = scmp.lt.s32.totalorder (!%p774_p0), %s2908_s2, 1  ;;  %s4023_s6 = sld [smem:[#allocation20_spill]] (!%p774_p0) }
  0x4a   : > { %p869_p2 = scmp.lt.s32.totalorder (!%p774_p0), %s3131_s28, 3  ;;  %s3139_s1 = sand.u32 (!%p774_p0), 1, %s2896_s22  }
  0x4b   : > { %s2494_s30 = sshll.u32 (!%p774_p0), %s3139_s1, 5  ;;  %s4054_s21 = sld [smem:[#allocation17_spill]] (!%p774_p0) }
  0x4c   : > { %s789_s24 = scalar_lea.vmem (!%p774_p0), [#allocation3], %s2494_s30  ;;  %s782_s19 = scalar_lea.vmem (!%p774_p0), [#allocation2], %s2494_s30 }
  0x4d   : > { %v2675_v8 = vld [vmem:[%s4021_s5 + $0x18] sm:$0xff]  ;;  %v2674_v11 = vld [vmem:[%s4021_s5 + $0x10] sm:$0xff]  ;;  %s868_s0 = scalar_select %p867_p1, %s2908_s2, 1  ;;  %v2673_v14 = vld [vmem:[%s4021_s5 + $0x8] sm:$0xff]  ;;  %vm913_vm0 = vcmask 261120   ;;  %vm1076_vm1 = vcmask 523264  }
  0x4e   : > { %v2663_v9 = vld [vmem:[%s4022_s29 + $0x8] sm:$0xff]  ;;  %1093 = vmatpush.bf16.msra.mxu2 %v2675_v8  ;;  %v2662_v12 = vld [vmem:[%s4022_s29] sm:$0xff]  ;;  %s870_s27 = scalar_select %p869_p2, %s3131_s28, 3  ;;  %v2670_v23 = vld [vmem:[%s789_s24 + $0x10] sm:$0xff] }
  0x4f   : > { %v2677_v10 = vld [vmem:[%s4023_s6 + $0x8] sm:$0xff]  ;;  %923 = vmatpush.bf16.msra.mxu0 %v2663_v9  ;;  %v2676_v13 = vld [vmem:[%s4023_s6] sm:$0xff]  ;;  %s2498_s4 = sshll.u32 %s868_s0, 2  ;;  %s4024_s6 = sld [smem:[#allocation14_spill]]  ;;  %v2666_v24 = vld [vmem:[%s782_s19 + $0x10] sm:$0xff] }
  0x50   : > { %1009 = vmatpush.bf16.msra.mxu1 %v2677_v10  ;;  %s3153_s3 = sadd.s32 %s2498_s4, %s870_s27  ;;  %v2668_v15 = vld [vmem:[%s789_s24] sm:$0xff]  ;;  %v2669_v21 = vld [vmem:[%s789_s24 + $0x8] sm:$0xff]  ;;  %v2671_v25 = vld [vmem:[%s789_s24 + $0x18] sm:$0xff]  ;;  %s4053_s24 = sld [smem:[#allocation21_spill]] }
  0x51   : > { %s2499_s15 = sshll.u32 %s3153_s3, 3  ;;  %v2672_v19 = vld [vmem:[%s4021_s5] sm:$0xff]  ;;  %v2665_v22 = vld [vmem:[%s782_s19 + $0x8] sm:$0xff]  ;;  %v2667_v26 = vld [vmem:[%s782_s19 + $0x18] sm:$0xff]  ;;  %s4055_s4 = sld [smem:[#allocation22_spill]] }
  0x52   : > { %1094 = vmatpush.bf16.msra.mxu2 %v2674_v11  ;;  %v2664_v20 = vld [vmem:[%s782_s19] sm:$0xff]  ;;  %s886_s27 = scalar_lea.vmem %s4054_s21, %s2499_s15  ;;  %s2658_s19 = sshll.u32 %s2908_s2, 2 }
  0x53   : > { %924 = vmatpush.bf16.msra.mxu0 %v2662_v12  ;;  %v2769_v28 = vld [vmem:[%s3975_s7] ss:$0 sm:$0xff]  ;;  %s4056_s18 = sld [smem:[#allocation23_spill]]  ;;  %s2496_s20 = sshll.u32 %s3139_s1, 4 }
  0x54   : > { %1010 = vmatpush.bf16.msra.mxu1 %v2676_v13 }
  0x55   : > { %s3164_s0 = scalar_lea.vmem %s4024_s6, %s2499_s15  ;;  %s865_s15 = scalar_lea.vmem [#allocation4], %s2496_s20 }
  0x56   : > { %v890_v16 = vld [vmem:[%s3164_s0] sm:$0xff]  ;;  %v891_v17 = vld [vmem:[%s3164_s0 + $0x8] sm:$0xff]  ;;  %1095 = vmatpush.bf16.msra.mxu2 %v2673_v14  ;;  %s2322_s6 = scalar_lea.sflag [#allocation5], %s3139_s1 }
  0x57   : > { %v892_v18 = vpack.c.bf16 %v891_v17, %v890_v16  ;;  %2536 = vmatmul.msk.bf16.vlgmr.msra.gmra.mxu1 %vm913_vm0, %v2668_v15 }
  0x59   : > { %2511 = vmatmul.msk.bf16.vlgmr.msra.gmra.mxu0 %vm913_vm0, %v892_v18 }
  0x5a   : > { %1096 = vmatpush.bf16.msra.mxu2 %v2672_v19 }
  0x5d   : > { %2572 = vmatmul.msk.bf16.vlgmr.msra.gmra.mxu2 %vm1076_vm1, %v2664_v20 }
  0x67   : > { %2537 = vmatmul.msk.bf16.gmra.mxu1 %vm913_vm0, %v2669_v21 }
  0x6d   : > { %2573 = vmatmul.msk.bf16.gmra.mxu2 %vm1076_vm1, %v2665_v22 }
  0x77   : > { %2538 = vmatmul.msk.bf16.gmra.mxu1 %vm913_vm0, %v2670_v23 }
  0x7d   : > { %2574 = vmatmul.msk.bf16.gmra.mxu2 %vm1076_vm1, %v2666_v24 }
  0x87   : > { %2539 = vmatmul.msk.bf16.gmra.mxu1 %vm913_vm0, %v2671_v25 }
  0x8d   : > { %2575 = vmatmul.msk.bf16.gmra.mxu2 %vm1076_vm1, %v2667_v26 }
  0xd4   : > { %v1012_v27 = vpop.f32.mrf.mxu1 }
  0xd6   : > { %v926_v29 = vpop.f32.mrf.mxu0 }
  0xd7   : > { %v3179_v30 = vadd.f32 %v2769_v28, %v926_v29 }
  0xdc   : > { %v1014_v32 = vpop.f32.mrf.mxu1 }
  0xde   : > { %v928_v36 = vpop.f32.mrf.mxu0 }
  0xdf   : > { %v3189_v39 = vadd.f32 %v2769_v28, %v928_v36 }
  0xe0   : > { %v1098_v31 = vpop.f32.mrf.mxu2 }
  0xe1   : > { %v1099_v33 = vadd.f32 %v1098_v31, %v1012_v27 }
  0xe3   : > { %v3182_v34 = vadd.f32 %v1099_v33, %v3179_v30 }
  0xe4   : > { %v1017_v44 = vpop.f32.mrf.mxu1 }
  0xe5   : > { %v3185_v35 = vmul.f32 0.70710677, %v3182_v34 }
  0xe7   : > { %v1142_v37 = vmul.f32 %v3185_v35, %v3185_v35 }
  0xe8   : > { %v1100_v38 = vpop.f32.mrf.mxu2 }
  0xe9   : > { %v1143_v40 = vmin.f32 %v1142_v37, 16.0  ;;  %v1101_v41 = vadd.f32 %v1100_v38, %v1014_v32 }
  0xeb   : > { %v1144_v42 = vmul.f32 2.1237322e-06, %v1143_v40  ;;  %v1155_v43 = vmul.f32 3.8918573e-05, %v1143_v40  ;;  %v3192_v45 = vadd.f32 %v1101_v41, %v3189_v39 }
  0xec   : > { %v1019_v63 = vpop.f32.mrf.mxu1 }
  0xed   : > { %v1145_v46 = vadd.f32 0.00028619796, %v1144_v42  ;;  %v1156_v47 = vadd.f32 0.001143296, %v1155_v43  ;;  %v3195_v48 = vmul.f32 0.70710677, %v3192_v45 }
  0xef   : > { %v1146_v49 = vmul.f32 %v1145_v46, %v1143_v40  ;;  %v1157_v50 = vmul.f32 %v1156_v47, %v1143_v40  ;;  %v1182_v51 = vmul.f32 %v3195_v48, %v3195_v48 }
  0xf0   : > { %v1103_v52 = vpop.f32.mrf.mxu2 }
  0xf1   : > { %v1147_v53 = vadd.f32 0.0036580483, %v1146_v49  ;;  %v1158_v54 = vadd.f32 0.014752088, %v1157_v50  ;;  %v1104_v55 = vadd.f32 %v1103_v52, %v1017_v44  ;;  %v3199_v56 = vmin.f32 %v1182_v51, 16.0 }
  0xf3   : > { %v1159_v57 = vmul.f32 %v1158_v54, %v1143_v40  ;;  %v3202_v58 = vadd.f32 %v1104_v55, %v3179_v30  ;;  %v1148_v59 = vmul.f32 %v1147_v53, %v1143_v40  ;;  %v1184_v60 = vmul.f32 2.1237322e-06, %v3199_v56 }
  0xf4   : > { %v1195_v61 = vmul.f32 3.8918573e-05, %v3199_v56  ;;  %v1022_v25 = vpop.f32.mrf.mxu1 }
  0xf5   : > { %v1160_v62 = vadd.f32 0.112945676, %v1159_v57  ;;  %v1185_v0 = vadd.f32 0.00028619796, %v1184_v60  ;;  %v3207_v2 = vmul.f32 0.70710677, %v3202_v58 }
  0xf6   : > { %v1196_v1 = vadd.f32 0.001143296, %v1195_v61  ;;  %v1149_v4 = vadd.f32 0.05243302, %v1148_v59 }
  0xf7   : > { %v1161_v3 = vmul.f32 %v1160_v62, %v1143_v40  ;;  %v1186_v5 = vmul.f32 %v1185_v0, %v3199_v56  ;;  %v1222_v7 = vmul.f32 %v3207_v2, %v3207_v2 }
  0xf8   : > { %v1197_v6 = vmul.f32 %v1196_v1, %v3199_v56  ;;  %v1105_v8 = vpop.f32.mrf.mxu2  ;;  %v1150_v16 = vmul.f32 %v1149_v4, %v1143_v40 }
  0xf9   : > { %v1162_v9 = vadd.f32 0.4994258, %v1161_v3  ;;  %v1106_v10 = vadd.f32 %v1105_v8, %v1019_v63  ;;  %v1187_v11 = vadd.f32 0.0036580483, %v1186_v5  ;;  %v3213_v13 = vmin.f32 %v1222_v7, 16.0 }
  0xfa   : > { %v1198_v12 = vadd.f32 0.014752088, %v1197_v6  ;;  %v1151_v26 = vadd.f32 0.18741608, %v1150_v16 }
  0xfb   : > { %v1163_v14 = vmul.f32 %v1162_v9, %v1143_v40  ;;  %v3216_v15 = vadd.f32 %v1106_v10, %v3189_v39  ;;  %v1224_v18 = vmul.f32 2.1237322e-06, %v3213_v13  ;;  %v1235_v20 = vmul.f32 3.8918573e-05, %v3213_v13 }
  0xfc   : > { %v1199_v17 = vmul.f32 %v1198_v12, %v3199_v56  ;;  %v1188_v22 = vmul.f32 %v1187_v11, %v3199_v56  ;;  %v1152_v42 = vmul.f32 %v1151_v26, %v1143_v40  ;;  %v1024_v3 = vpop.f32.mrf.mxu1 }
  0xfd   : > { %v3220_v19 = vadd.f32 1.0, %v1163_v14  ;;  %v3224_v21 = vmul.f32 0.70710677, %v3216_v15  ;;  %v1225_v24 = vadd.f32 0.00028619796, %v1224_v18 }
  0xfe   : > { %v1200_v23 = vadd.f32 0.112945676, %v1199_v17  ;;  %v1236_v31 = vadd.f32 0.001143296, %v1235_v20  ;;  %v1189_v33 = vadd.f32 0.05243302, %v1188_v22 }
  0xff   : > { %2778 = vrcp.f32 %v3220_v19  ;;  %v1226_v28 = vmul.f32 %v1225_v24, %v3213_v13  ;;  %v1262_v32 = vmul.f32 %v3224_v21, %v3224_v21  ;;  %v1153_v63 = vadd.f32 1.1283791, %v1152_v42 }
 0x100   : > { %v1201_v27 = vmul.f32 %v1200_v23, %v3199_v56  ;;  %v1108_v29 = vpop.f32.mrf.mxu2  ;;  %v1237_v38 = vmul.f32 %v1236_v31, %v3213_v13  ;;  %v1190_v53 = vmul.f32 %v1189_v33, %v3199_v56  ;;  %v1174_v0 = vand.u32 2147483647, %v3220_v19 }
 0x101   : > { %v1227_v37 = vadd.f32 0.0036580483, %v1226_v28  ;;  %v3233_v41 = vmin.f32 %v1262_v32, 16.0  ;;  %v1109_v44 = vadd.f32 %v1108_v29, %v1022_v25  ;;  %vm1170_vm3 = vweird.f32 %v3220_v19 }
 0x102   : > { %v1202_v36 = vadd.f32 0.4994258, %v1201_v27  ;;  %v1238_v49 = vadd.f32 0.014752088, %v1237_v38  ;;  %v1176_v8 = vand.u32 2147483648, %v3220_v19  ;;  %v3259_v17 = vmul.f32 0.5, %v3182_v34 }
 0x103   : > { %v1228_v47 = vmul.f32 %v1227_v37, %v3213_v13  ;;  %v1264_v50 = vmul.f32 2.1237322e-06, %v3233_v41  ;;  %v1275_v51 = vmul.f32 3.8918573e-05, %v3233_v41  ;;  %v3246_v61 = vadd.f32 %v1109_v44, %v3179_v30 }
 0x104   : > { %v1203_v43 = vmul.f32 %v1202_v36, %v3199_v56  ;;  %v1239_v40 = vmul.f32 %v1238_v49, %v3213_v13  ;;  %v1191_v9 = vadd.f32 0.18741608, %v1190_v53  ;;  %v1154_v18 = vmul.f32 %v1153_v63, %v3185_v35  ;;  %v1027_v53 = vpop.f32.mrf.mxu1 }
 0x105   : > { %v2779_v46 = vpop.eup %2778  ;;  %v1229_v55 = vadd.f32 0.05243302, %v1228_v47  ;;  %v1265_v57 = vadd.f32 0.00028619796, %v1264_v50  ;;  %v1276_v59 = vadd.f32 0.001143296, %v1275_v51 }
 0x106   : > { %v1166_v52 = vmul.f32 %v2779_v46, %v3220_v19  ;;  %v3241_v54 = vadd.f32 1.0, %v1203_v43  ;;  %vm1171_vm2 = vweird.f32 %v2779_v46  ;;  %v1240_v1 = vadd.f32 0.112945676, %v1239_v40  ;;  %v2679_v47 = vld [vmem:[%s3976_s8 + $0x8] sm:$0xff] }
 0x107   : > { %v1230_v5 = vmul.f32 %v1229_v55, %v3213_v13  ;;  %v1266_v6 = vmul.f32 %v1265_v57, %v3233_v41  ;;  %v1277_v7 = vmul.f32 %v1276_v59, %v3233_v41  ;;  %v3256_v16 = vmul.f32 0.70710677, %v3246_v61  ;;  %vm3263_vm4 = vmor %vm1170_vm3, %vm1171_vm2  ;;  %1544 = vmatpush.bf16.msra.mxu3 %v2679_v47 }
 0x108   : > { %v1167_v60 = vsub.f32 1.0, %v1166_v52  ;;  %2780 = vrcp.f32 %v3241_v54  ;;  %v1110_v62 = vpop.f32.mrf.mxu2  ;;  %v1241_v10 = vmul.f32 %v1240_v1, %v3213_v13  ;;  %vm1175_vm5 = vcmp.eq.f32.partialorder %v1174_v0, 8.507059e+37 }
 0x109   : > { %v1267_v12 = vadd.f32 0.0036580483, %v1266_v6  ;;  %v1278_v14 = vadd.f32 0.014752088, %v1277_v7  ;;  %v1231_v24 = vadd.f32 0.18741608, %v1230_v5  ;;  %v1302_v34 = vmul.f32 %v3256_v16, %v3256_v16 }
 0x10a   : > { %v1168_v4 = vmul.f32 %v2779_v46, %v1167_v60  ;;  %v1242_v19 = vadd.f32 0.4994258, %v1241_v10  ;;  %v1177_v26 = vor.u32 1.1754944e-38, %v1176_v8  ;;  %v1192_v35 = vmul.f32 %v1191_v9, %v3199_v56 }
 0x10b   : > { %v1279_v25 = vmul.f32 %v1278_v14, %v3233_v41  ;;  %v1268_v28 = vmul.f32 %v1267_v12, %v3233_v41  ;;  %v1214_v29 = vand.u32 2147483647, %v3241_v54  ;;  %v1111_v33 = vadd.f32 %v1110_v62, %v1024_v3  ;;  %v2678_v3 = vld [vmem:[%s3976_s8] sm:$0xff] }
 0x10c   : > { %v1169_v11 = vadd.f32 %v2779_v46, %v1168_v4  ;;  %v1243_v31 = vmul.f32 %v1242_v19, %v3213_v13  ;;  %v1216_v38 = vand.u32 2147483648, %v3241_v54  ;;  %v3278_v42 = vmin.f32 %v1302_v34, 16.0  ;;  %1545 = vmatpush.bf16.msra.mxu3 %v2678_v3 }
 0x10d   : > { %v1280_v32 = vadd.f32 0.112945676, %v1279_v25  ;;  %v1232_v56 = vmul.f32 %v1231_v24, %v3213_v13  ;;  %v1269_v50 = vadd.f32 0.05243302, %v1268_v28  ;;  %v1193_v40 = vadd.f32 1.1283791, %v1192_v35 }
 0x10e   : > { %v2781_v22 = vpop.eup %2780  ;;  %v1173_v23 = vsel %vm3263_vm4, %v2779_v46, %v1169_v11  ;;  %v3281_v44 = vadd.f32 1.0, %v1243_v31  ;;  %v1304_v51 = vmul.f32 2.1237322e-06, %v3278_v42  ;;  %v1315_v52 = vmul.f32 3.8918573e-05, %v3278_v42 }
 0x10f   : > { %v1206_v27 = vmul.f32 %v2781_v22, %v3241_v54  ;;  %v1178_v36 = vsel %vm1175_vm5, %v1177_v26, %v1173_v23  ;;  %vm1211_vm6 = vweird.f32 %v2781_v22  ;;  %v1281_v46 = vmul.f32 %v1280_v32, %v3233_v41 }
 0x110   : > { %v1113_v43 = vpop.f32.mrf.mxu2  ;;  %v1179_v55 = vmul.f32 %v1178_v36, %v1154_v18  ;;  %2782 = vrcp.f32 %v3281_v44  ;;  %v3291_v13 = vadd.f32 %v1111_v33, %v3189_v39  ;;  %vm1210_vm7 = vweird.f32 %v3241_v54 }
 0x111   : > { %v1207_v37 = vsub.f32 1.0, %v1206_v27  ;;  %vm3294_vm8 = vcmp.eq.f32.partialorder %v1214_v29, 8.507059e+37  ;;  %v1282_v60 = vadd.f32 0.4994258, %v1281_v46  ;;  %vm3299_vm9 = vmor %vm1210_vm7, %vm1211_vm6  ;;  %v1217_v63 = vor.u32 1.1754944e-38, %v1216_v38 }
 0x112   : > { %v1305_v0 = vadd.f32 0.00028619796, %v1304_v51  ;;  %v1316_v1 = vadd.f32 0.001143296, %v1315_v52  ;;  %v1233_v4 = vadd.f32 1.1283791, %v1232_v56  ;;  %v1270_v5 = vmul.f32 %v1269_v50, %v3233_v41 }
 0x113   : > { %v1208_v49 = vmul.f32 %v2781_v22, %v1207_v37  ;;  %v1283_v6 = vmul.f32 %v1282_v60, %v3233_v41  ;;  %v2576_v7 = vclamps-f32 %v1179_v55, 1.0  ;;  %v3313_v10 = vmul.f32 0.70710677, %v3291_v13 }
 0x114   : > { %v1306_v8 = vmul.f32 %v1305_v0, %v3278_v42  ;;  %v1317_v9 = vmul.f32 %v1316_v1, %v3278_v42  ;;  %v3316_v11 = vmul.f32 0.5, %v3192_v45  ;;  %v1254_v14 = vand.u32 2147483647, %v3281_v44 }
 0x115   : > { %v1209_v57 = vadd.f32 %v2781_v22, %v1208_v49  ;;  %v3321_v18 = vadd.f32 1.0, %v1283_v6  ;;  %v1342_v23 = vmul.f32 %v3313_v10, %v3313_v10  ;;  %v1114_v24 = vadd.f32 %v1113_v43, %v1027_v53 }
 0x116   : > { %v2783_v20 = vpop.eup %2782  ;;  %v1307_v19 = vadd.f32 0.0036580483, %v1306_v8  ;;  %v1194_v25 = vmul.f32 %v1193_v40, %v3195_v48  ;;  %v1234_v34 = vmul.f32 %v1233_v4, %v3207_v2  ;;  %v1271_v26 = vadd.f32 0.18741608, %v1270_v5  ;;  %v1029_v48 = vpop.f32.mrf.mxu1 }
 0x117   : > { %v1213_v54 = vsel %vm3299_vm9, %v2781_v22, %v1209_v57  ;;  %v1318_v22 = vadd.f32 0.014752088, %v1317_v9  ;;  %v1246_v45 = vmul.f32 %v2783_v20, %v3281_v44  ;;  %v1462_v27 = vadd.f32 1.0, %v2576_v7 }
 0x118   : > { %v1218_v12 = vsel %vm3294_vm8, %v1217_v63, %v1213_v54  ;;  %v1115_v35 = vpop.f32.mrf.mxu2  ;;  %vm1250_vm10 = vweird.f32 %v3281_v44  ;;  %v1256_v28 = vand.u32 2147483648, %v3281_v44  ;;  %2784 = vrcp.f32 %v3321_v18 }
 0x119   : > { %v1219_v29 = vmul.f32 %v1218_v12, %v1194_v25  ;;  %v1247_v31 = vsub.f32 1.0, %v1246_v45  ;;  %v1308_v32 = vmul.f32 %v1307_v19, %v3278_v42  ;;  %v1319_v33 = vmul.f32 %v1318_v22, %v3278_v42 }
 0x11a   : > { %vm3333_vm11 = vcmp.eq.f32.partialorder %v1254_v14, 8.507059e+37  ;;  %v3337_v36 = vmin.f32 %v1342_v23, 16.0  ;;  %v3340_v37 = vadd.f32 %v1114_v24, %v3179_v30  ;;  %v1116_v38 = vadd.f32 %v1115_v35, %v1029_v48 }
 0x11b   : > { %v1248_v43 = vmul.f32 %v2783_v20, %v1247_v31  ;;  %vm1251_vm12 = vweird.f32 %v2783_v20  ;;  %v1272_v56 = vmul.f32 %v1271_v26, %v3233_v41  ;;  %v1320_v46 = vadd.f32 0.112945676, %v1319_v33 }
 0x11c   : > { %v3344_v47 = vmul.f32 %v1462_v27, %v3259_v17  ;;  %v1309_v49 = vadd.f32 0.05243302, %v1308_v32  ;;  %v1344_v50 = vmul.f32 2.1237322e-06, %v3337_v36  ;;  %v1355_v51 = vmul.f32 3.8918573e-05, %v3337_v36  ;;  %vm1252_vm13 = vmor %vm1250_vm10, %vm1251_vm12 }
 0x11d   : > { %v2577_v52 = vclamps-f32 %v1219_v29, 1.0  ;;  %v1249_v53 = vadd.f32 %v2783_v20, %v1248_v43  ;;  %v1321_v55 = vmul.f32 %v1320_v46, %v3278_v42  ;;  %v3350_v30 = vmul.f32 0.70710677, %v3340_v37 }
 0x11e   : > { %v2785_v40 = vpop.eup %2784  ;;  %v1257_v41 = vor.u32 1.1754944e-38, %v1256_v28  ;;  %v1345_v57 = vadd.f32 0.00028619796, %v1344_v50  ;;  %v1356_v17 = vadd.f32 0.001143296, %v1355_v51  ;;  %v3355_v59 = vadd.f32 %v1116_v38, %v3189_v39 }
 0x11f   : > { %v1253_v60 = vsel %vm1252_vm13, %v2783_v20, %v1249_v53  ;;  %v1273_v62 = vadd.f32 1.1283791, %v1272_v56  ;;  %v1286_v63 = vmul.f32 %v2785_v40, %v3321_v18  ;;  %v1296_v0 = vand.u32 2147483648, %v3321_v18 }
 0x120   : > { %v1310_v1 = vmul.f32 %v1309_v49, %v3278_v42  ;;  %v1322_v3 = vadd.f32 0.4994258, %v1321_v55  ;;  %v1346_v54 = vmul.f32 %v1345_v57, %v3337_v36  ;;  %v1357_v44 = vmul.f32 %v1356_v17, %v3337_v36 }
 0x121   : > { %v1463_v4 = vadd.f32 1.0, %v2577_v52  ;;  %v1258_v5 = vsel %vm3333_vm11, %v1257_v41, %v1253_v60  ;;  %v1287_v6 = vsub.f32 1.0, %v1286_v63  ;;  %v1382_v39 = vmul.f32 %v3350_v30, %v3350_v30 }
 0x122   : > { %v1323_v7 = vmul.f32 %v1322_v3, %v3278_v42  ;;  %v1347_v8 = vadd.f32 0.0036580483, %v1346_v54  ;;  %v1358_v9 = vadd.f32 0.014752088, %v1357_v44  ;;  %v3368_v12 = vmul.f32 0.70710677, %v3355_v59 }
 0x123   : > { %v1288_v14 = vmul.f32 %v2785_v40, %v1287_v6  ;;  %vm1291_vm14 = vweird.f32 %v2785_v40  ;;  %v1294_v20 = vand.u32 2147483647, %v3321_v18  ;;  %v3371_v19 = vmin.f32 %v1382_v39, 16.0 }
 0x124   : > { %v1259_v22 = vmul.f32 %v1258_v5, %v1234_v34  ;;  %v1311_v23 = vadd.f32 0.18741608, %v1310_v1  ;;  %v3373_v24 = vadd.f32 1.0, %v1323_v7  ;;  %v1359_v25 = vmul.f32 %v1358_v9, %v3337_v36 }
 0x125   : > { %v1289_v45 = vadd.f32 %v2785_v40, %v1288_v14  ;;  %vm1290_vm15 = vweird.f32 %v3321_v18  ;;  %v1297_v26 = vor.u32 1.1754944e-38, %v1296_v0  ;;  %v1348_v35 = vmul.f32 %v1347_v8, %v3337_v36 }
 0x126   : > { %v1471_v27 = vmul.f32 %v1463_v4, %v3316_v11  ;;  %vm1292_vm1 = vmor %vm1290_vm15, %vm1291_vm14  ;;  %2786 = vrcp.f32 %v3373_v24  ;;  %v1384_v28 = vmul.f32 2.1237322e-06, %v3371_v19  ;;  %v1422_v34 = vmul.f32 %v3368_v12, %v3368_v12 }
 0x127   : > { %v1274_v29 = vmul.f32 %v1273_v62, %v3224_v21  ;;  %v1293_v31 = vsel %vm1292_vm1, %v2785_v40, %v1289_v45  ;;  %vm1295_vm2 = vcmp.eq.f32.partialorder %v1294_v20, 8.507059e+37  ;;  %v1360_v32 = vadd.f32 0.112945676, %v1359_v25 }
 0x128   : > { %v2578_v33 = vclamps-f32 %v1259_v22, 1.0  ;;  %v1298_v18 = vsel %vm1295_vm2, %v1297_v26, %v1293_v31  ;;  %v1312_v48 = vmul.f32 %v1311_v23, %v3278_v42  ;;  %v1349_v38 = vadd.f32 0.05243302, %v1348_v35 }
 0x129   : > { %v1299_v2 = vmul.f32 %v1298_v18, %v1274_v29  ;;  %v1361_v11 = vmul.f32 %v1360_v32, %v3337_v36  ;;  %v1395_v43 = vmul.f32 3.8918573e-05, %v3371_v19  ;;  %v1128_v56 = vmul.f32 0.5, %v3202_v58 }
 0x12a   : > { %v1385_v46 = vadd.f32 0.00028619796, %v1384_v28  ;;  %v3388_v49 = vmin.f32 %v1422_v34, 16.0  ;;  %v1479_v50 = vpack.c.bf16 %v1471_v27, %v1471_v27  ;;  %v1129_v21 = vmul.f32 0.5, %v3216_v15 }
 0x12b   : > { %v2579_v51 = vclamps-f32 %v1299_v2, 1.0  ;;  %v1362_v52 = vadd.f32 0.4994258, %v1361_v11  ;;  %v1478_v53 = vpack.c.bf16 %v3344_v47, %v3344_v47  ;;  %v1313_v55 = vadd.f32 1.1283791, %v1312_v48 }
 0x12c   : > { %v2787_v42 = vpop.eup %2786  ;;  %v1396_v40 = vadd.f32 0.001143296, %v1395_v43  ;;  %v1424_v41 = vmul.f32 2.1237322e-06, %v3388_v49  ;;  %v1464_v57 = vadd.f32 1.0, %v2578_v33  ;;  %v1350_v58 = vmul.f32 %v1349_v38, %v3337_v36 }
 0x12d   : > { %v1326_v17 = vmul.f32 %v2787_v42, %v3373_v24  ;;  %v1503_v60 = vunpack.c.l.b16 %v1479_v50  ;;  %v1363_v62 = vmul.f32 %v1362_v52, %v3337_v36  ;;  %v1386_v15 = vmul.f32 %v1385_v46, %v3371_v19 }
 0x12e   : > { %v1397_v63 = vmul.f32 %v1396_v40, %v3371_v19  ;;  %v1425_v0 = vadd.f32 0.00028619796, %v1424_v41  ;;  %v1465_v1 = vadd.f32 1.0, %v2579_v51  ;;  %v1435_v3 = vmul.f32 3.8918573e-05, %v3388_v49 }
 0x12f   : > { %v1327_v47 = vsub.f32 1.0, %v1326_v17  ;;  %v1502_v54 = vunpack.c.l.b16 %v1478_v53  ;;  %v1334_v44 = vand.u32 2147483647, %v3373_v24  ;;  %v1336_v4 = vand.u32 2147483648, %v3373_v24 }
 0x130   : > { %v3402_v5 = vadd.f32 1.0, %v1363_v62  ;;  %v1398_v6 = vadd.f32 0.014752088, %v1397_v63  ;;  %vm1331_vm3 = vweird.f32 %v2787_v42  ;;  %v1436_v7 = vadd.f32 0.001143296, %v1435_v3 }
 0x131   : > { %v1328_v39 = vmul.f32 %v2787_v42, %v1327_v47  ;;  %v1510_v8 = vpack.c.b16 %v1503_v60, %v1502_v54  ;;  %vm1330_vm4 = vweird.f32 %v3373_v24  ;;  %v1387_v9 = vadd.f32 0.0036580483, %v1386_v15 }
 0x132   : > { %2788 = vrcp.f32 %v3402_v5  ;;  %v1426_v14 = vmul.f32 %v1425_v0, %v3388_v49  ;;  %v1473_v20 = vmul.f32 %v1465_v1, %v1129_v21  ;;  %v1351_v23 = vadd.f32 0.18741608, %v1350_v58  ;;  %vm1332_vm5 = vmor %vm1330_vm4, %vm1331_vm3 }
 0x133   : > { %v1329_v22 = vadd.f32 %v2787_v42, %v1328_v39  ;;  %v1399_v25 = vmul.f32 %v1398_v6, %v3371_v19  ;;  %2592 = vmatmul.msk.bf16.vlgmr.msra.gmra.mxu3 %vm913_vm0, %v1510_v8  ;;  %v1337_v45 = vor.u32 1.1754944e-38, %v1336_v4  ;;  %v1437_v26 = vmul.f32 %v1436_v7, %v3388_v49 }
 0x134   : > { %v1472_v35 = vmul.f32 %v1464_v57, %v1128_v56  ;;  %vm1335_vm6 = vcmp.eq.f32.partialorder %v1334_v44, 8.507059e+37  ;;  %v1388_v34 = vmul.f32 %v1387_v9, %v3371_v19  ;;  %v1427_v29 = vadd.f32 0.0036580483, %v1426_v14 }
 0x135   : > { %v1333_v27 = vsel %vm1332_vm5, %v2787_v42, %v1329_v22  ;;  %v1400_v24 = vadd.f32 0.112945676, %v1399_v25  ;;  %v1438_v31 = vadd.f32 0.014752088, %v1437_v26  ;;  %v1314_v32 = vmul.f32 %v1313_v55, %v3256_v16 }
 0x136   : > { %v1338_v28 = vsel %vm1335_vm6, %v1337_v45, %v1333_v27  ;;  %v1352_v33 = vmul.f32 %v1351_v23, %v3337_v36  ;;  %v1481_v48 = vpack.c.bf16 %v1473_v20, %v1473_v20  ;;  %v1480_v56 = vpack.c.bf16 %v1472_v35, %v1472_v35 }
 0x137   : > { %v1401_v18 = vmul.f32 %v1400_v24, %v3371_v19  ;;  %v1439_v38 = vmul.f32 %v1438_v31, %v3388_v49  ;;  %v1339_v11 = vmul.f32 %v1338_v28, %v1314_v32  ;;  %v1389_v46 = vadd.f32 0.05243302, %v1388_v34 }
 0x138   : > { %v2789_v2 = vpop.eup %2788  ;;  %v1428_v21 = vmul.f32 %v1427_v29, %v3388_v49  ;;  %v1353_v52 = vadd.f32 1.1283791, %v1352_v33  ;;  %v1505_v16 = vunpack.c.l.b16 %v1481_v48  ;;  %v1374_v36 = vand.u32 2147483647, %v3402_v5 }
 0x139   : > { %v1366_v43 = vmul.f32 %v2789_v2, %v3402_v5  ;;  %v1402_v50 = vadd.f32 0.4994258, %v1401_v18  ;;  %v1440_v51 = vadd.f32 0.112945676, %v1439_v38  ;;  %v1376_v42 = vand.u32 2147483648, %v3402_v5 }
 0x13a   : > { %v2580_v41 = vclamps-f32 %v1339_v11, 1.0  ;;  %vm1371_vm7 = vweird.f32 %v2789_v2  ;;  %v1504_v17 = vunpack.c.l.b16 %v1480_v56  ;;  %v1390_v58 = vmul.f32 %v1389_v46, %v3371_v19 }
 0x13b   : > { %v1367_v53 = vsub.f32 1.0, %v1366_v43  ;;  %v1403_v55 = vmul.f32 %v1402_v50, %v3371_v19  ;;  %v1441_v40 = vmul.f32 %v1440_v51, %v3388_v49  ;;  %v1429_v62 = vadd.f32 0.05243302, %v1428_v21 }
 0x13c   : > { %vm1370_vm8 = vweird.f32 %v3402_v5  ;;  %v1511_v0 = vpack.c.b16 %v1505_v16, %v1504_v17  ;;  %v1354_v1 = vmul.f32 %v1353_v52, %v3313_v10  ;;  %v1377_v47 = vor.u32 1.1754944e-38, %v1376_v42 }
 0x13d   : > { %v1368_v57 = vmul.f32 %v2789_v2, %v1367_v53  ;;  %v1404_v60 = vadd.f32 1.0, %v1403_v55  ;;  %v1442_v15 = vadd.f32 0.4994258, %v1441_v40  ;;  %vm1372_vm9 = vmor %vm1370_vm8, %vm1371_vm7  ;;  %v1466_v3 = vadd.f32 1.0, %v2580_v41 }
 0x13e   : > { %vm1375_vm10 = vcmp.eq.f32.partialorder %v1374_v36, 8.507059e+37  ;;  %v1391_v6 = vadd.f32 0.18741608, %v1390_v58  ;;  %v1430_v39 = vmul.f32 %v1429_v62, %v3388_v49  ;;  %v1130_v7 = vmul.f32 0.5, %v3246_v61 }
 0x13f   : > { %v1369_v63 = vadd.f32 %v2789_v2, %v1368_v57  ;;  %2790 = vrcp.f32 %v1404_v60  ;;  %v1443_v44 = vmul.f32 %v1442_v15, %v3388_v49  ;;  %v1131_v23 = vmul.f32 0.5, %v3291_v13 }
 0x140   : > { %v1474_v5 = vmul.f32 %v1466_v3, %v1130_v7  ;;  %v1392_v20 = vmul.f32 %v1391_v6, %v3371_v19  ;;  %v1431_v22 = vadd.f32 0.18741608, %v1430_v39  ;;  %v1416_v61 = vand.u32 2147483648, %v1404_v60 }
 0x141   : > { %v1373_v54 = vsel %vm1372_vm9, %v2789_v2, %v1369_v63  ;;  %v1444_v9 = vadd.f32 1.0, %v1443_v44  ;;  %v1414_v31 = vand.u32 2147483647, %v1404_v60  ;;  %vm1410_vm12 = vweird.f32 %v1404_v60 }
 0x142   : > { %v1378_v4 = vsel %vm1375_vm10, %v1377_v47, %v1373_v54  ;;  %v1482_v27 = vpack.c.bf16 %v1474_v5, %v1474_v5  ;;  %v1393_v24 = vadd.f32 1.1283791, %v1392_v20  ;;  %v1432_v28 = vmul.f32 %v1431_v22, %v3388_v49 }
 0x143   : > { %v1379_v8 = vmul.f32 %v1378_v4, %v1354_v1  ;;  %2593 = vmatmul.msk.bf16.gmra.mxu3 %vm913_vm0, %v1511_v0  ;;  %2792 = vrcp.f32 %v1444_v9  ;;  %v1417_v2 = vor.u32 1.1754944e-38, %v1416_v61  ;;  %vm1415_vm14 = vcmp.eq.f32.partialorder %v1414_v31, 8.507059e+37 }
 0x144   : > { %v1506_v19 = vunpack.c.l.b16 %v1482_v27  ;;  %v1394_v13 = vmul.f32 %v1393_v24, %v3350_v30  ;;  %v1433_v38 = vadd.f32 1.1283791, %v1432_v28  ;;  %v1456_v56 = vand.u32 2147483648, %v1444_v9 }
 0x145   : > { %v2581_v10 = vclamps-f32 %v1379_v8, 1.0  ;;  %v2791_v14 = vpop.eup %2790  ;;  %v1454_v21 = vand.u32 2147483647, %v1444_v9  ;;  %vm1450_vm1 = vweird.f32 %v1444_v9  ;;  %v1132_v40 = vmul.f32 0.5, %v3340_v37 }
 0x146   : > { %v1406_v45 = vmul.f32 %v2791_v14, %v1404_v60  ;;  %vm1411_vm11 = vweird.f32 %v2791_v14  ;;  %v1457_v16 = vor.u32 1.1754944e-38, %v1456_v56  ;;  %v1434_v30 = vmul.f32 %v1433_v38, %v3368_v12  ;;  %v3440_v12 = vld [vmem:[%s3977_s9] ss:$0 sm:$0xff] }
 0x147   : > { %v1467_v25 = vadd.f32 1.0, %v2581_v10  ;;  %vm1412_vm13 = vmor %vm1410_vm12, %vm1411_vm11  ;;  %vm1455_vm3 = vcmp.eq.f32.partialorder %v1454_v21, 8.507059e+37  ;;  %v1133_v58 = vmul.f32 0.5, %v3355_v59 }
 0x148   : > { %v1407_v35 = vsub.f32 1.0, %v1406_v45 }
 0x149   : > { %v1475_v26 = vmul.f32 %v1467_v25, %v1131_v23  ;;  %v2793_v34 = vpop.eup %2792 }
 0x14a   : > { %v1408_v29 = vmul.f32 %v2791_v14, %v1407_v35  ;;  %v1446_v33 = vmul.f32 %v2793_v34, %v1444_v9  ;;  %vm1451_vm15 = vweird.f32 %v2793_v34 }
 0x14b   : > { %v1483_v32 = vpack.c.bf16 %v1475_v26, %v1475_v26  ;;  %vm1452_vm2 = vmor %vm1450_vm1, %vm1451_vm15 }
 0x14c   : > { %v1409_v18 = vadd.f32 %v2791_v14, %v1408_v29  ;;  %v1447_v11 = vsub.f32 1.0, %v1446_v33 }
 0x14d   : > { %v1507_v48 = vunpack.c.l.b16 %v1483_v32 }
 0x14e   : > { %v1413_v43 = vsel %vm1412_vm13, %v2791_v14, %v1409_v18  ;;  %v1448_v50 = vmul.f32 %v2793_v34, %v1447_v11 }
 0x14f   : > { %v1512_v49 = vpack.c.b16 %v1507_v48, %v1506_v19  ;;  %v1418_v46 = vsel %vm1415_vm14, %v1417_v2, %v1413_v43 }
 0x150   : > { %v1419_v51 = vmul.f32 %v1418_v46, %v1394_v13  ;;  %v1449_v52 = vadd.f32 %v2793_v34, %v1448_v50 }
 0x152   : > { %v2582_v53 = vclamps-f32 %v1419_v51, 1.0  ;;  %v1453_v36 = vsel %vm1452_vm2, %v2793_v34, %v1449_v52 }
 0x153   : > { %2594 = vmatmul.msk.bf16.gmra.mxu3 %vm913_vm0, %v1512_v49  ;;  %v1458_v55 = vsel %vm1455_vm3, %v1457_v16, %v1453_v36 }
 0x154   : > { %v1468_v42 = vadd.f32 1.0, %v2582_v53  ;;  %v1459_v41 = vmul.f32 %v1458_v55, %v1434_v30 }
 0x156   : > { %v1476_v57 = vmul.f32 %v1468_v42, %v1132_v40  ;;  %v2583_v17 = vclamps-f32 %v1459_v41, 1.0 }
 0x158   : > { %v1469_v60 = vadd.f32 1.0, %v2583_v17  ;;  %v1484_v15 = vpack.c.bf16 %v1476_v57, %v1476_v57 }
 0x15a   : > { %v1477_v62 = vmul.f32 %v1469_v60, %v1133_v58  ;;  %v1508_v0 = vunpack.c.l.b16 %v1484_v15 }
 0x15c   : > { %v1485_v63 = vpack.c.bf16 %v1477_v62, %v1477_v62 }
 0x15e   : > { %v1509_v1 = vunpack.c.l.b16 %v1485_v63 }
 0x160   : > { %v1513_v47 = vpack.c.b16 %v1509_v1, %v1508_v0 }
 0x163   : > { %2595 = vmatmul.msk.bf16.gmra.mxu3 %vm913_vm0, %v1513_v47 }
 0x1b6   : > { %v1547_v37 = vpop.f32.mrf.mxu3 }
 0x1b7   : > { %v3443_v3 = vadd.f32 %v3440_v12, %v1547_v37 }
 0x1b9   : > { %v3446_v59 = vmul.f32 0.70710677, %v3443_v3 }
 0x1bb   : > { %v1583_v54 = vmul.f32 %v3446_v59, %v3446_v59 }
 0x1bd   : > { %v3450_v44 = vmin.f32 %v1583_v54, 16.0 }
 0x1be   : > { %v1549_v4 = vpop.f32.mrf.mxu3 }
 0x1bf   : > { %v3453_v6 = vadd.f32 %v3440_v12, %v1549_v4  ;;  %v1596_v39 = vmul.f32 3.8918573e-05, %v3450_v44  ;;  %v1585_v28 = vmul.f32 2.1237322e-06, %v3450_v44 }
 0x1c1   : > { %v3457_v7 = vmul.f32 0.70710677, %v3453_v6  ;;  %v1597_v8 = vadd.f32 0.001143296, %v1596_v39  ;;  %v1586_v33 = vadd.f32 0.00028619796, %v1585_v28 }
 0x1c3   : > { %v1623_v9 = vmul.f32 %v3457_v7, %v3457_v7  ;;  %v1598_v14 = vmul.f32 %v1597_v8, %v3450_v44  ;;  %v1587_v11 = vmul.f32 %v1586_v33, %v3450_v44 }
 0x1c5   : > { %v3465_v20 = vmin.f32 %v1623_v9, 16.0  ;;  %v1599_v23 = vadd.f32 0.014752088, %v1598_v14  ;;  %v1588_v53 = vadd.f32 0.0036580483, %v1587_v11 }
 0x1c6   : > { %v1552_v5 = vpop.f32.mrf.mxu3 }
 0x1c7   : > { %v3462_v10 = vadd.f32 %v3440_v12, %v1552_v5  ;;  %v1636_v25 = vmul.f32 3.8918573e-05, %v3465_v20  ;;  %v1600_v24 = vmul.f32 %v1599_v23, %v3450_v44  ;;  %v1625_v18 = vmul.f32 2.1237322e-06, %v3465_v20 }
 0x1c8   : > { %v1589_v57 = vmul.f32 %v1588_v53, %v3450_v44 }
 0x1c9   : > { %v3468_v22 = vmul.f32 0.70710677, %v3462_v10  ;;  %v1637_v61 = vadd.f32 0.001143296, %v1636_v25  ;;  %v1601_v31 = vadd.f32 0.112945676, %v1600_v24 }
 0x1ca   : > { %v1626_v43 = vadd.f32 0.00028619796, %v1625_v18  ;;  %v1590_v47 = vadd.f32 0.05243302, %v1589_v57 }
 0x1cb   : > { %v1663_v45 = vmul.f32 %v3468_v22, %v3468_v22  ;;  %v1638_v32 = vmul.f32 %v1637_v61, %v3465_v20  ;;  %v1602_v2 = vmul.f32 %v1601_v31, %v3450_v44 }
 0x1cc   : > { %v1627_v16 = vmul.f32 %v1626_v43, %v3465_v20  ;;  %v1591_v23 = vmul.f32 %v1590_v47, %v3450_v44 }
 0x1cd   : > { %v3473_v26 = vmin.f32 %v1663_v45, 16.0  ;;  %v1639_v38 = vadd.f32 0.014752088, %v1638_v32  ;;  %v1603_v21 = vadd.f32 0.4994258, %v1602_v2 }
 0x1ce   : > { %v1554_v35 = vpop.f32.mrf.mxu3  ;;  %v1628_v17 = vadd.f32 0.0036580483, %v1627_v16  ;;  %v1592_v33 = vadd.f32 0.18741608, %v1591_v23 }
 0x1cf   : > { %v3476_v27 = vadd.f32 %v3440_v12, %v1554_v35  ;;  %v1676_v34 = vmul.f32 3.8918573e-05, %v3473_v26  ;;  %v1640_v51 = vmul.f32 %v1639_v38, %v3465_v20  ;;  %v1665_v42 = vmul.f32 2.1237322e-06, %v3473_v26 }
 0x1d0   : > { %v1604_v55 = vmul.f32 %v1603_v21, %v3450_v44  ;;  %v1629_v37 = vmul.f32 %v1628_v17, %v3465_v20  ;;  %v1593_v21 = vmul.f32 %v1592_v33, %v3450_v44 }
 0x1d1   : > { %v3482_v29 = vmul.f32 0.70710677, %v3476_v27  ;;  %v1677_v19 = vadd.f32 0.001143296, %v1676_v34  ;;  %v1641_v40 = vadd.f32 0.112945676, %v1640_v51 }
 0x1d2   : > { %v1666_v15 = vadd.f32 0.00028619796, %v1665_v42  ;;  %v3509_v0 = vadd.f32 1.0, %v1604_v55  ;;  %v1630_v25 = vadd.f32 0.05243302, %v1629_v37 }
 0x1d3   : > { %v1703_v48 = vmul.f32 %v3482_v29, %v3482_v29  ;;  %v1678_v56 = vmul.f32 %v1677_v19, %v3473_v26  ;;  %v1642_v1 = vmul.f32 %v1641_v40, %v3465_v20 }
 0x1d4   : > { %v1667_v9 = vmul.f32 %v1666_v15, %v3473_v26  ;;  %2794 = vrcp.f32 %v3509_v0  ;;  %v1631_v2 = vmul.f32 %v1630_v25, %v3465_v20  ;;  %vm1611_vm4 = vweird.f32 %v3509_v0 }
 0x1d5   : > { %v3488_v13 = vmin.f32 %v1703_v48, 16.0  ;;  %v1679_v30 = vadd.f32 0.014752088, %v1678_v56  ;;  %v1643_v14 = vadd.f32 0.4994258, %v1642_v1 }
 0x1d6   : > { %v1557_v46 = vpop.f32.mrf.mxu3  ;;  %v1668_v28 = vadd.f32 0.0036580483, %v1667_v9  ;;  %v1615_v1 = vand.u32 2147483647, %v3509_v0 }
 0x1d7   : > { %v1716_v49 = vmul.f32 3.8918573e-05, %v3488_v13  ;;  %v3496_v52 = vadd.f32 %v3440_v12, %v1557_v46  ;;  %v1680_v58 = vmul.f32 %v1679_v30, %v3473_v26  ;;  %v1644_v34 = vmul.f32 %v1643_v14, %v3465_v20 }
 0x1d8   : > { %v1705_v31 = vmul.f32 2.1237322e-06, %v3488_v13  ;;  %v1669_v56 = vmul.f32 %v1668_v28, %v3473_v26  ;;  %v1632_v30 = vadd.f32 0.18741608, %v1631_v2  ;;  %vm3583_vm5 = vcmp.eq.f32.partialorder %v1615_v1, 8.507059e+37 }
 0x1d9   : > { %v1717_v50 = vadd.f32 0.001143296, %v1716_v49  ;;  %v3503_v41 = vmul.f32 0.70710677, %v3496_v52  ;;  %v1681_v54 = vadd.f32 0.112945676, %v1680_v58 }
 0x1da   : > { %v3530_v48 = vpop.eup %2794  ;;  %v3537_v49 = vadd.f32 1.0, %v1644_v34  ;;  %v1706_v46 = vadd.f32 0.00028619796, %v1705_v31  ;;  %v1670_v55 = vadd.f32 0.05243302, %v1669_v56  ;;  %v1633_v9 = vmul.f32 %v1632_v30, %v3465_v20 }
 0x1db   : > { %v1718_v36 = vmul.f32 %v1717_v50, %v3488_v13  ;;  %v1743_v62 = vmul.f32 %v3503_v41, %v3503_v41  ;;  %v1682_v45 = vmul.f32 %v1681_v54, %v3473_v26  ;;  %v1607_v51 = vmul.f32 %v3530_v48, %v3509_v0 }
 0x1dc   : > { %2796 = vrcp.f32 %v3537_v49  ;;  %v1707_v17 = vmul.f32 %v1706_v46, %v3488_v13  ;;  %v1671_v25 = vmul.f32 %v1670_v55, %v3473_v26  ;;  %vm1612_vm6 = vweird.f32 %v3530_v48 }
 0x1dd   : > { %v1719_v60 = vadd.f32 0.014752088, %v1718_v36  ;;  %v3513_v4 = vmin.f32 %v1743_v62, 16.0  ;;  %v1683_v18 = vadd.f32 0.4994258, %v1682_v45  ;;  %v1608_v62 = vsub.f32 1.0, %v1607_v51  ;;  %vm3609_vm7 = vmor %vm1611_vm4, %vm1612_vm6 }
 0x1de   : > { %v1559_v63 = vpop.f32.mrf.mxu3  ;;  %v1708_v45 = vadd.f32 0.0036580483, %v1707_v17  ;;  %v1672_v56 = vadd.f32 0.18741608, %v1671_v25  ;;  %vm1651_vm8 = vweird.f32 %v3537_v49 }
 0x1df   : > { %v1720_v39 = vmul.f32 %v1719_v60, %v3488_v13  ;;  %v3517_v8 = vadd.f32 %v3440_v12, %v1559_v63  ;;  %v1756_v5 = vmul.f32 3.8918573e-05, %v3513_v4  ;;  %v1684_v53 = vmul.f32 %v1683_v18, %v3473_v26 }
 0x1e0   : > { %v1745_v40 = vmul.f32 2.1237322e-06, %v3513_v4  ;;  %v1594_v60 = vadd.f32 1.1283791, %v1593_v21  ;;  %v1609_v34 = vmul.f32 %v3530_v48, %v1608_v62  ;;  %v1709_v46 = vmul.f32 %v1708_v45, %v3488_v13 }
 0x1e1   : > { %v1721_v35 = vadd.f32 0.112945676, %v1720_v39  ;;  %v1757_v24 = vadd.f32 0.001143296, %v1756_v5  ;;  %v3525_v61 = vmul.f32 0.70710677, %v3517_v8  ;;  %v1673_v1 = vmul.f32 %v1672_v56, %v3473_v26 }
 0x1e2   : > { %v3556_v15 = vadd.f32 1.0, %v1684_v53  ;;  %v1617_v39 = vand.u32 2147483648, %v3509_v0  ;;  %v1746_v5 = vadd.f32 0.00028619796, %v1745_v40  ;;  %v3569_v28 = vmul.f32 %v1594_v60, %v3446_v59  ;;  %v3575_v20 = vpop.eup %2796 }
 0x1e3   : > { %v1758_v32 = vmul.f32 %v1757_v24, %v3513_v4  ;;  %v1722_v38 = vmul.f32 %v1721_v35, %v3488_v13  ;;  %v1783_v43 = vmul.f32 %v3525_v61, %v3525_v61  ;;  %v1610_v51 = vadd.f32 %v3530_v48, %v1609_v34 }
 0x1e4   : > { %2798 = vrcp.f32 %v3556_v15  ;;  %v1618_v59 = vor.u32 1.1754944e-38, %v1617_v39  ;;  %v1747_v2 = vmul.f32 %v1746_v5, %v3513_v4  ;;  %vm1652_vm9 = vweird.f32 %v3575_v20 }
 0x1e5   : > { %v1759_v11 = vadd.f32 0.014752088, %v1758_v32  ;;  %v1723_v36 = vadd.f32 0.4994258, %v1722_v38  ;;  %v3547_v42 = vmin.f32 %v1783_v43, 16.0  ;;  %vm3668_vm10 = vmor %vm1651_vm8, %vm1652_vm9  ;;  %vm1691_vm12 = vweird.f32 %v3556_v15 }
 0x1e6   : > { %v1562_v19 = vpop.f32.mrf.mxu3  ;;  %v1634_v43 = vadd.f32 1.1283791, %v1633_v9  ;;  %v1748_v40 = vadd.f32 0.0036580483, %v1747_v2  ;;  %v1674_v2 = vadd.f32 1.1283791, %v1673_v1 }
 0x1e7   : > { %v3540_v50 = vadd.f32 %v3440_v12, %v1562_v19  ;;  %v1760_v16 = vmul.f32 %v1759_v11, %v3513_v4  ;;  %v1796_v44 = vmul.f32 3.8918573e-05, %v3547_v42  ;;  %v1724_v47 = vmul.f32 %v1723_v36, %v3488_v13 }
 0x1e8   : > { %v1785_v14 = vmul.f32 2.1237322e-06, %v3547_v42  ;;  %v3614_v62 = vmul.f32 %v1634_v43, %v3457_v7  ;;  %v1749_v26 = vmul.f32 %v1748_v40, %v3513_v4 }
 0x1e9   : > { %v1761_v57 = vadd.f32 0.112945676, %v1760_v16  ;;  %v3554_v58 = vmul.f32 0.70710677, %v3540_v50  ;;  %v1797_v37 = vadd.f32 0.001143296, %v1796_v44 }
 0x1ea   : > { %v3578_v32 = vadd.f32 1.0, %v1724_v47  ;;  %v1786_v11 = vadd.f32 0.00028619796, %v1785_v14  ;;  %v1657_v16 = vand.u32 2147483648, %v3537_v49  ;;  %v3602_v55 = vpop.eup %2798  ;;  %v1710_v47 = vadd.f32 0.05243302, %v1709_v46 }
 0x1eb   : > { %v1762_v63 = vmul.f32 %v1761_v57, %v3513_v4  ;;  %v1823_v54 = vmul.f32 %v3554_v58, %v3554_v58  ;;  %v1798_v24 = vmul.f32 %v1797_v37, %v3547_v42  ;;  %v1614_v37 = vsel %vm3609_vm7, %v3530_v48, %v1610_v51 }
 0x1ec   : > { %2800 = vrcp.f32 %v3578_v32  ;;  %v1787_v17 = vmul.f32 %v1786_v11, %v3547_v42  ;;  %v3622_v9 = vor.u32 1.1754944e-38, %v1657_v16  ;;  %v1687_v5 = vmul.f32 %v3602_v55, %v3556_v15 }
 0x1ed   : > { %v1763_v35 = vadd.f32 0.4994258, %v1762_v63  ;;  %v3573_v31 = vmin.f32 %v1823_v54, 16.0  ;;  %v1799_v33 = vadd.f32 0.014752088, %v1798_v24  ;;  %v3635_v45 = vsel %vm3583_vm5, %v1618_v59, %v1614_v37 }
 0x1ee   : > { %v1564_v23 = vpop.f32.mrf.mxu3  ;;  %v1655_v63 = vand.u32 2147483647, %v3537_v49  ;;  %v1788_v48 = vadd.f32 0.0036580483, %v1787_v17  ;;  %v1688_v11 = vsub.f32 1.0, %v1687_v5  ;;  %vm1692_vm13 = vweird.f32 %v3602_v55 }
 0x1ef   : > { %v3581_v18 = vadd.f32 %v3440_v12, %v1564_v23  ;;  %v1764_v38 = vmul.f32 %v1763_v35, %v3513_v4  ;;  %v1800_v21 = vmul.f32 %v1799_v33, %v3547_v42  ;;  %v1647_v12 = vmul.f32 %v3575_v20, %v3537_v49  ;;  %vm3700_vm15 = vmor %vm1691_vm12, %vm1692_vm13 }
 0x1f0   : > { %v1825_v53 = vmul.f32 2.1237322e-06, %v3573_v31  ;;  %v1836_v30 = vmul.f32 3.8918573e-05, %v3573_v31  ;;  %v1711_v35 = vmul.f32 %v1710_v47, %v3488_v13  ;;  %v1750_v46 = vadd.f32 0.05243302, %v1749_v26 }
 0x1f1   : > { %v3600_v36 = vmul.f32 0.70710677, %v3581_v18  ;;  %v3604_v57 = vadd.f32 1.0, %v1764_v38  ;;  %v1801_v44 = vadd.f32 0.112945676, %v1800_v21  ;;  %v1648_v54 = vsub.f32 1.0, %v1647_v12 }
 0x1f2   : > { %v1826_v0 = vadd.f32 0.00028619796, %v1825_v53  ;;  %v1837_v7 = vadd.f32 0.001143296, %v1836_v30  ;;  %v3631_v25 = vpop.eup %2800  ;;  %v1789_v21 = vmul.f32 %v1788_v48, %v3547_v42  ;;  %v1712_v12 = vadd.f32 0.18741608, %v1711_v35 }
 0x1f3   : > { %v1802_v39 = vmul.f32 %v1801_v44, %v3547_v42  ;;  %v1863_v14 = vmul.f32 %v3600_v36, %v3600_v36  ;;  %2802 = vrcp.f32 %v3604_v57  ;;  %v1649_v33 = vmul.f32 %v3575_v20, %v1648_v54 }
 0x1f4   : > { %v1838_v24 = vmul.f32 %v1837_v7, %v3573_v31  ;;  %v1827_v38 = vmul.f32 %v1826_v0, %v3573_v31  ;;  %v1727_v59 = vmul.f32 %v3631_v25, %v3578_v32  ;;  %v3657_v44 = vmul.f32 %v1674_v2, %v3468_v22 }
 0x1f5   : > { %v1803_v23 = vadd.f32 0.4994258, %v1802_v39  ;;  %v3639_v34 = vmin.f32 %v1863_v14, 16.0  ;;  %v1650_v17 = vadd.f32 %v3575_v20, %v1649_v33  ;;  %v1689_v47 = vmul.f32 %v3602_v55, %v1688_v11 }
 0x1f6   : > { %v1839_v56 = vadd.f32 0.014752088, %v1838_v24  ;;  %v1828_v60 = vadd.f32 0.0036580483, %v1827_v38  ;;  %v1695_v37 = vand.u32 2147483647, %v3556_v15  ;;  %v1751_v0 = vmul.f32 %v1750_v46, %v3513_v4 }
 0x1f7   : > { %v1804_v43 = vmul.f32 %v1803_v23, %v3547_v42  ;;  %v1865_v19 = vmul.f32 2.1237322e-06, %v3639_v34  ;;  %v1876_v51 = vmul.f32 3.8918573e-05, %v3639_v34  ;;  %v1697_v54 = vand.u32 2147483648, %v3556_v15 }
 0x1f8   : > { %v1840_v16 = vmul.f32 %v1839_v56, %v3573_v31  ;;  %v1728_v39 = vsub.f32 1.0, %v1727_v59  ;;  %v1790_v5 = vadd.f32 0.05243302, %v1789_v21  ;;  %vm3672_vm11 = vcmp.eq.f32.partialorder %v1655_v63, 8.507059e+37 }
 0x1f9   : > { %v3650_v53 = vadd.f32 1.0, %v1804_v43  ;;  %v1866_v30 = vadd.f32 0.00028619796, %v1865_v19  ;;  %v3653_v40 = vpop.eup %2802  ;;  %v1877_v1 = vadd.f32 0.001143296, %v1876_v51  ;;  %v1713_v26 = vmul.f32 %v1712_v12, %v3488_v13 }
 0x1fa   : > { %v1841_v7 = vadd.f32 0.112945676, %v1840_v16  ;;  %v1767_v48 = vmul.f32 %v3653_v40, %v3604_v57  ;;  %v1654_v49 = vsel %vm3668_vm10, %v3575_v20, %v1650_v17  ;;  %v1829_v63 = vmul.f32 %v1828_v60, %v3573_v31 }
 0x1fb   : > { %2804 = vrcp.f32 %v3650_v53  ;;  %v1867_v23 = vmul.f32 %v1866_v30, %v3639_v34  ;;  %v1878_v35 = vmul.f32 %v1877_v1, %v3639_v34  ;;  %v1690_v33 = vadd.f32 %v3602_v55, %v1689_v47 }
 0x1fc   : > { %v1842_v24 = vmul.f32 %v1841_v7, %v3573_v31  ;;  %vm3689_vm14 = vcmp.eq.f32.partialorder %v1695_v37, 8.507059e+37  ;;  %v1698_v2 = vor.u32 1.1754944e-38, %v1697_v54  ;;  %v1729_v11 = vmul.f32 %v3631_v25, %v1728_v39 }
 0x1fd   : > { %v1879_v38 = vadd.f32 0.014752088, %v1878_v35  ;;  %v1752_v43 = vadd.f32 0.18741608, %v1751_v0  ;;  %v1791_v20 = vmul.f32 %v1790_v5, %v3547_v42  ;;  %v1714_v59 = vadd.f32 1.1283791, %v1713_v26 }
 0x1fe   : > { %v1843_v56 = vadd.f32 0.4994258, %v1842_v24  ;;  %v1768_v46 = vsub.f32 1.0, %v1767_v48  ;;  %v1868_v21 = vadd.f32 0.0036580483, %v1867_v23  ;;  %v1737_v30 = vand.u32 2147483648, %v3578_v32 }
 0x1ff   : > { %v1880_v51 = vmul.f32 %v1879_v38, %v3639_v34  ;;  %v1735_v16 = vand.u32 2147483647, %v3578_v32  ;;  %v1830_v60 = vadd.f32 0.05243302, %v1829_v63  ;;  %v1694_v1 = vsel %vm3700_vm15, %v3602_v55, %v1690_v33  ;;  %v2681_v5 = vld [vmem:[%s3978_s10 + $0x8] sm:$0xff]  ;;  %v2680_v33 = vld [vmem:[%s3978_s10] sm:$0xff] }
 0x200   : > { %vm1732_vm1 = vweird.f32 %v3631_v25  ;;  %v1844_v15 = vmul.f32 %v1843_v56, %v3573_v31  ;;  %v1730_v37 = vadd.f32 %v3631_v25, %v1729_v11  ;;  %v1753_v54 = vmul.f32 %v1752_v43, %v3513_v4  ;;  %1963 = vmatpush.bf16.msrb.mxu0 %v2681_v5 }
 0x201   : > { %v3695_v19 = vpop.eup %2804  ;;  %v1881_v47 = vadd.f32 0.112945676, %v1880_v51  ;;  %v1792_v39 = vadd.f32 0.18741608, %v1791_v20  ;;  %v1769_v7 = vmul.f32 %v3653_v40, %v1768_v46  ;;  %v1869_v55 = vmul.f32 %v1868_v21, %v3639_v34 }
 0x202   : > { %v1807_v17 = vmul.f32 %v3695_v19, %v3650_v53  ;;  %v3719_v22 = vadd.f32 1.0, %v1844_v15  ;;  %v1659_v48 = vsel %vm3672_vm11, %v3622_v9, %v1654_v49  ;;  %v1715_v4 = vmul.f32 %v1714_v59, %v3482_v29 }
 0x203   : > { %v1882_v26 = vmul.f32 %v1881_v47, %v3639_v34  ;;  %v1831_v35 = vmul.f32 %v1830_v60, %v3573_v31  ;;  %vm1731_vm2 = vweird.f32 %v3578_v32  ;;  %vm3730_vm3 = vcmp.eq.f32.partialorder %v1735_v16, 8.507059e+37 }
 0x204   : > { %v1808_v0 = vsub.f32 1.0, %v1807_v17  ;;  %v1738_v24 = vor.u32 1.1754944e-38, %v1737_v30  ;;  %2806 = vrcp.f32 %v3719_v22  ;;  %v1699_v14 = vsel %vm3689_vm14, %v1698_v2, %v1694_v1  ;;  %vm3739_vm4 = vmor %vm1731_vm2, %vm1732_vm1  ;;  %1964 = vmatpush.bf16.msrb.mxu0 %v2680_v33 }
 0x205   : > { %v1754_v9 = vadd.f32 1.1283791, %v1753_v54  ;;  %v1793_v49 = vmul.f32 %v1792_v39, %v3547_v42  ;;  %v1883_v32 = vadd.f32 0.4994258, %v1882_v26  ;;  %v1734_v38 = vsel %vm3739_vm4, %v3631_v25, %v1730_v37 }
 0x206   : > { %v1809_v23 = vmul.f32 %v3695_v19, %v1808_v0  ;;  %v1770_v13 = vadd.f32 %v3653_v40, %v1769_v7  ;;  %vm1772_vm5 = vweird.f32 %v3653_v40  ;;  %v1870_v2 = vadd.f32 0.05243302, %v1869_v55 }
 0x207   : > { %vm1812_vm6 = vweird.f32 %v3695_v19  ;;  %v1832_v43 = vadd.f32 0.18741608, %v1831_v35  ;;  %v1884_v42 = vmul.f32 %v1883_v32, %v3639_v34  ;;  %vm1771_vm7 = vweird.f32 %v3604_v57 }
 0x208   : > { %v1810_v11 = vadd.f32 %v3695_v19, %v1809_v23  ;;  %v1775_v20 = vand.u32 2147483647, %v3604_v57  ;;  %v1777_v56 = vand.u32 2147483648, %v3604_v57  ;;  %v1817_v25 = vand.u32 2147483648, %v3650_v53  ;;  %vm3759_vm8 = vmor %vm1771_vm7, %vm1772_vm5 }
 0x209   : > { %v1794_v46 = vadd.f32 1.1283791, %v1793_v49  ;;  %vm1811_vm9 = vweird.f32 %v3650_v53  ;;  %v1815_v21 = vand.u32 2147483647, %v3650_v53  ;;  %v3765_v51 = vadd.f32 1.0, %v1884_v42 }
 0x20a   : > { %v2807_v12 = vpop.eup %2806  ;;  %v1700_v16 = vmul.f32 %v1699_v14, %v3657_v44  ;;  %v1739_v30 = vsel %vm3730_vm3, %v1738_v24, %v1734_v38  ;;  %v1755_v57 = vmul.f32 %v1754_v9, %v3503_v41  ;;  %vm3773_vm10 = vmor %vm1811_vm9, %vm1812_vm6  ;;  %v1871_v60 = vmul.f32 %v1870_v2, %v3639_v34 }
 0x20b   : > { %v1774_v53 = vsel %vm3759_vm8, %v3653_v40, %v1770_v13  ;;  %v1814_v44 = vsel %vm3773_vm10, %v3695_v19, %v1810_v11  ;;  %v1833_v1 = vmul.f32 %v1832_v43, %v3573_v31  ;;  %v1847_v41 = vmul.f32 %v2807_v12, %v3719_v22 }
 0x20c   : > { %vm1776_vm11 = vcmp.eq.f32.partialorder %v1775_v20, 8.507059e+37  ;;  %v1778_v15 = vor.u32 1.1754944e-38, %v1777_v56  ;;  %v1818_v47 = vor.u32 1.1754944e-38, %v1817_v25  ;;  %2808 = vrcp.f32 %v3765_v51 }
 0x20d   : > { %v1740_v37 = vmul.f32 %v1739_v30, %v1715_v4  ;;  %v1795_v54 = vmul.f32 %v1794_v46, %v3525_v61  ;;  %vm1816_vm12 = vcmp.eq.f32.partialorder %v1815_v21, 8.507059e+37  ;;  %v1848_v39 = vsub.f32 1.0, %v1847_v41 }
 0x20e   : > { %v1779_v0 = vsel %vm1776_vm11, %v1778_v15, %v1774_v53  ;;  %v1819_v40 = vsel %vm1816_vm12, %v1818_v47, %v1814_v44  ;;  %v1857_v5 = vand.u32 2147483648, %v3719_v22  ;;  %v1872_v7 = vadd.f32 0.18741608, %v1871_v60 }
 0x20f   : > { %v1834_v19 = vadd.f32 1.1283791, %v1833_v1  ;;  %v1849_v55 = vmul.f32 %v2807_v12, %v1848_v39  ;;  %vm1852_vm13 = vweird.f32 %v2807_v12  ;;  %v1855_v31 = vand.u32 2147483647, %v3719_v22 }
 0x210   : > { %v1567_v26 = vmul.f32 0.5, %v3443_v3  ;;  %v1620_v23 = vmul.f32 %v3635_v45, %v3569_v28  ;;  %v1568_v4 = vmul.f32 0.5, %v3453_v6  ;;  %v1660_v61 = vmul.f32 %v1659_v48, %v3614_v62 }
 0x211   : > { %v1780_v35 = vmul.f32 %v1779_v0, %v1755_v57  ;;  %v1820_v63 = vmul.f32 %v1819_v40, %v1795_v54  ;;  %v1850_v24 = vadd.f32 %v2807_v12, %v1849_v55  ;;  %vm1851_vm14 = vweird.f32 %v3719_v22 }
 0x212   : > { %v2809_v14 = vpop.eup %2808  ;;  %v2598_v29 = vclamps-f32 %v1700_v16, 1.0  ;;  %v2599_v9 = vclamps-f32 %v1740_v37, 1.0  ;;  %vm1853_vm15 = vmor %vm1851_vm14, %vm1852_vm13  ;;  %v1858_v49 = vor.u32 1.1754944e-38, %v1857_v5  ;;  %v1873_v32 = vmul.f32 %v1872_v7, %v3639_v34 }
 0x213   : > { %v1835_v3 = vmul.f32 %v1834_v19, %v3554_v58  ;;  %v1854_v33 = vsel %vm1853_vm15, %v2807_v12, %v1850_v24  ;;  %vm1856_vm1 = vcmp.eq.f32.partialorder %v1855_v31, 8.507059e+37  ;;  %v1887_v6 = vmul.f32 %v2809_v14, %v3765_v51 }
 0x214   : > { %v2596_v28 = vclamps-f32 %v1620_v23, 1.0  ;;  %v2597_v62 = vclamps-f32 %v1660_v61, 1.0  ;;  %v1569_v45 = vmul.f32 0.5, %v3462_v10  ;;  %v1859_v48 = vsel %vm1856_vm1, %v1858_v49, %v1854_v33  ;;  %v2824_v49 = vld [vmem:[%s3164_s0] sm:$0xff] }
 0x215   : > { %v2600_v38 = vclamps-f32 %v1780_v35, 1.0  ;;  %v2601_v22 = vclamps-f32 %v1820_v63, 1.0  ;;  %v1860_v13 = vmul.f32 %v1859_v48, %v1835_v3  ;;  %v1888_v2 = vsub.f32 1.0, %v1887_v6 }
 0x216   : > { %v1905_v11 = vadd.f32 1.0, %v2598_v29  ;;  %v1906_v43 = vadd.f32 1.0, %v2599_v9  ;;  %v1874_v42 = vadd.f32 1.1283791, %v1873_v32  ;;  %v1897_v34 = vand.u32 2147483648, %v3765_v51 }
 0x217   : > { %v2602_v20 = vclamps-f32 %v1860_v13, 1.0  ;;  %v1889_v58 = vmul.f32 %v2809_v14, %v1888_v2  ;;  %vm1892_vm2 = vweird.f32 %v2809_v14  ;;  %v1895_v56 = vand.u32 2147483647, %v3765_v51 }
 0x218   : > { %v1903_v25 = vadd.f32 1.0, %v2596_v28  ;;  %v1904_v59 = vadd.f32 1.0, %v2597_v62  ;;  %v1570_v46 = vmul.f32 0.5, %v3476_v27  ;;  %v1571_v10 = vmul.f32 0.5, %v3496_v52  ;;  %v2825_v28 = vld [vmem:[%s3164_s0 + $0x8] sm:$0xff] }
 0x219   : > { %v1907_v21 = vadd.f32 1.0, %v2600_v38  ;;  %v1908_v12 = vadd.f32 1.0, %v2601_v22  ;;  %v1890_v16 = vadd.f32 %v2809_v14, %v1889_v58  ;;  %vm1891_vm3 = vweird.f32 %v3765_v51 }
 0x21a   : > { %v1913_v30 = vmul.f32 %v1905_v11, %v1569_v45  ;;  %v1914_v57 = vmul.f32 %v1906_v43, %v1570_v46  ;;  %v1572_v17 = vmul.f32 0.5, %v3517_v8  ;;  %vm1893_vm4 = vmor %vm1891_vm3, %vm1892_vm2  ;;  %v1898_v60 = vor.u32 1.1754944e-38, %v1897_v34 }
 0x21b   : > { %v1909_v53 = vadd.f32 1.0, %v2602_v20  ;;  %v1875_v44 = vmul.f32 %v1874_v42, %v3600_v36  ;;  %v1894_v1 = vsel %vm1893_vm4, %v2809_v14, %v1890_v16  ;;  %vm1896_vm5 = vcmp.eq.f32.partialorder %v1895_v56, 8.507059e+37 }
 0x21c   : > { %v1911_v41 = vmul.f32 %v1903_v25, %v1567_v26  ;;  %v1912_v27 = vmul.f32 %v1904_v59, %v1568_v4  ;;  %v1899_v15 = vsel %vm1896_vm5, %v1898_v60, %v1894_v1  ;;  %v1915_v52 = vmul.f32 %v1907_v21, %v1571_v10 }
 0x21d   : > { %v1916_v47 = vmul.f32 %v1908_v12, %v1572_v17  ;;  %v1573_v37 = vmul.f32 0.5, %v3540_v50  ;;  %v1900_v54 = vmul.f32 %v1899_v15, %v1875_v44  ;;  %v1920_v51 = vsel %vm913_vm0, %v1913_v30, 0.0  ;;  %v2683_v12 = vld [vmem:[%s3980_s12 + $0x8] sm:$0xff] }
 0x21e   : > { %v1927_v39 = vsel %vm913_vm0, %v1914_v57, 0.0  ;;  %v1919_v40 = vsel %vm913_vm0, %v1911_v41, 0.0  ;;  %v1926_v36 = vsel %vm913_vm0, %v1912_v27, 0.0  ;;  %v1922_v5 = vsel %vm913_vm0, %v1915_v52, 0.0  ;;  %2066 = vmatpush.bf16.msra.mxu0 %v2683_v12  ;;  %v2682_v57 = vld [vmem:[%s3980_s12] sm:$0xff] }
 0x21f   : > { %v1917_v8 = vmul.f32 %v1909_v53, %v1573_v37  ;;  %v2603_v0 = vclamps-f32 %v1900_v54, 1.0  ;;  %v1929_v7 = vsel %vm913_vm0, %v1916_v47, 0.0  ;;  %v1574_v19 = vmul.f32 0.5, %v3581_v18  ;;  %v2771_v18 = vld [vmem:[%s3979_s11] ss:$0 sm:$0xff] }
 0x220   : > { %v1921_v50 = vadd.f32 %v1920_v51, %v1919_v40  ;;  %v1928_v31 = vadd.f32 %v1927_v39, %v1926_v36  ;;  %v2922_v48 = vmov 32.0   ;;  %v2772_v40 = vld [vmem:[%s3984_s16] ss:$0 sm:$0xff] }
 0x221   : > { %v1910_v55 = vadd.f32 1.0, %v2603_v0  ;;  %v1924_v26 = vsel %vm913_vm0, %v1917_v8, 0.0  ;;  %2810 = vrcp.f32 %v2922_v48 }
 0x222   : > { %v1923_v4 = vadd.f32 %v1922_v5, %v1921_v50  ;;  %v1930_v61 = vadd.f32 %v1929_v7, %v1928_v31  ;;  %2067 = vmatpush.bf16.msra.mxu0 %v2682_v57 }
 0x223   : > { %v1918_v23 = vmul.f32 %v1910_v55, %v1574_v19  ;;  %v2773_v19 = vld [vmem:[%s3985_s17] ss:$0 sm:$0xff] }
 0x224   : > { %v1925_v63 = vadd.f32 %v1924_v26, %v1923_v4 }
 0x225   : > { %v1931_v35 = vsel %vm913_vm0, %v1918_v23, 0.0 }
 0x226   : > { %v1932_v24 = vadd.f32 %v1931_v35, %v1930_v61  ;;  %v2774_v61 = vld [vmem:[%s3981_s13] ss:$0 sm:$0xff] }
 0x227   : > { %v2811_v38 = vpop.eup %2810 }
 0x228   : > { %v1933_v14 = vpack.c.bf16 %v1932_v24, %v1925_v63  ;;  %v1982_v22 = vmul.f32 32.0, %v2811_v38  ;;  %vm1986_vm6 = vweird.f32 %v2811_v38  ;;  %v2691_v24 = vld [vmem:[%s3982_s14 + $0x38] sm:$0xff] }
 0x22a   : > { %2612 = vmatmul.msk.bf16.vlgmr.msrb.gmra.mxu0 %vm913_vm0, %v1933_v14  ;;  %v1983_v13 = vsub.f32 1.0, %v1982_v22 }
 0x22b   : > { %2227 = vmatpush.bf16.msrb.mxu0 %v2691_v24 }
 0x22c   : > { %v1984_v2 = vmul.f32 %v2811_v38, %v1983_v13 }
 0x22e   : > { %v1985_v11 = vadd.f32 %v2811_v38, %v1984_v2 }
 0x230   : > { %v3825_v43 = vsel %vm1986_vm6, %v2811_v38, %v1985_v11  ;;  %v2688_v38 = vld [vmem:[%s3982_s14 + $0x20] sm:$0xff] }
 0x2a7   : > { %v1966_v29 = vpop.f32.mrf.mxu0 }
 0x2a8   : > { %v1967_v9 = vadd.f32 %v2771_v18, %v1966_v29  ;;  %v2690_v29 = vld [vmem:[%s3982_s14 + $0x30] sm:$0xff] }
 0x2a9   : > { %2228 = vmatpush.bf16.msrb.mxu0 %v2690_v29 }
 0x2aa   : > { %v1971_v32 = vadd.f32 %v2824_v49, %v1967_v9 }
 0x2ac   : > { %v1975_v3 = vsel %vm913_vm0, %v1971_v32, 0.0 }
 0x2ad   : > { %1976 = vadd.xlane.f32.xlu0 %v1975_v3 }
 0x2af   : > { %v1968_v33 = vpop.f32.mrf.mxu0 }
 0x2b0   : > { %v1969_v6 = vadd.f32 %v2771_v18, %v1968_v33 }
 0x2b2   : > { %v1972_v62 = vadd.f32 %v2825_v28, %v1969_v6  ;;  %v2689_v6 = vld [vmem:[%s3982_s14 + $0x28] sm:$0xff] }
 0x2b3   : > { %2229 = vmatpush.bf16.msrb.mxu0 %v2689_v6 }
 0x2b4   : > { %v1978_v45 = vsel %vm913_vm0, %v1972_v62, 0.0 }
 0x2b5   : > { %1979 = vadd.xlane.f32.xlu0 %v1978_v45 }
 0x2b7   : > { %2230 = vmatpush.bf16.msrb.mxu0 %v2688_v38 }
 0x320   : > { %v1977_v42 = vpop.xlane.xlu0 %1976 }
 0x321   : > { %v1988_v34 = vmul.f32 %v3825_v43, %v1977_v42 }
 0x323   : > { %v1990_v20 = vsub.f32 %v1971_v32, %v1988_v34  ;;  %v2687_v34 = vld [vmem:[%s3982_s14 + $0x18] sm:$0xff] }
 0x324   : > { %2231 = vmatpush.bf16.msrb.mxu0 %v2687_v34 }
 0x325   : > { %v1992_v58 = vmul.f32 %v1990_v20, %v1990_v20 }
 0x327   : > { %v1994_v56 = vsel %vm913_vm0, %v1992_v58, 0.0 }
 0x328   : > { %1995 = vadd.xlane.f32.xlu1 %v1994_v56  ;;  %v1980_v25 = vpop.xlane.xlu0 %1979 }
 0x329   : > { %v1989_v59 = vmul.f32 %v3825_v43, %v1980_v25 }
 0x32b   : > { %v1991_v46 = vsub.f32 %v1972_v62, %v1989_v59 }
 0x32d   : > { %v1993_v10 = vmul.f32 %v1991_v46, %v1991_v46 }
 0x32f   : > { %v1997_v21 = vsel %vm913_vm0, %v1993_v10, 0.0 }
 0x330   : > { %1998 = vadd.xlane.f32.xlu1 %v1997_v21  ;;  %v2686_v21 = vld [vmem:[%s3982_s14 + $0x10] sm:$0xff] }
 0x331   : > { %2232 = vmatpush.bf16.msrb.mxu0 %v2686_v21 }
 0x39b   : > { %v1996_v16 = vpop.xlane.xlu1 %1995 }
 0x39c   : > { %v2000_v30 = vmul.f32 %v1996_v16, %v3825_v43 }
 0x39e   : > { %v2002_v17 = vadd.f32 1e-05, %v2000_v30 }
 0x3a0   : > { %2812 = vrsqrt.f32 %v2002_v17  ;;  %vm2010_vm8 = vweird.f32 %v2002_v17 }
 0x3a3   : > { %v1999_v60 = vpop.xlane.xlu1 %1998 }
 0x3a4   : > { %v2001_v53 = vmul.f32 %v1999_v60, %v3825_v43 }
 0x3a6   : > { %v2813_v44 = vpop.eup %2812  ;;  %v2003_v1 = vadd.f32 1e-05, %v2001_v53 }
 0x3a7   : > { %v2005_v41 = vmul.f32 %v2813_v44, %v2002_v17  ;;  %vm2011_vm7 = vweird.f32 %v2813_v44 }
 0x3a8   : > { %2814 = vrsqrt.f32 %v2003_v1  ;;  %vm2012_vm9 = vmor %vm2010_vm8, %vm2011_vm7  ;;  %vm2020_vm11 = vweird.f32 %v2003_v1 }
 0x3a9   : > { %v2006_v27 = vmul.f32 %v2813_v44, %v2005_v41 }
 0x3ab   : > { %v2007_v15 = vmul.f32 0.5, %v2006_v27 }
 0x3ad   : > { %v2008_v52 = vsub.f32 1.5, %v2007_v15 }
 0x3ae   : > { %v2815_v47 = vpop.eup %2814 }
 0x3af   : > { %v2009_v37 = vmul.f32 %v2813_v44, %v2008_v52  ;;  %v2015_v54 = vmul.f32 %v2815_v47, %v2003_v1  ;;  %vm2021_vm10 = vweird.f32 %v2815_v47 }
 0x3b0   : > { %vm2022_vm12 = vmor %vm2020_vm11, %vm2021_vm10 }
 0x3b1   : > { %v2016_v51 = vmul.f32 %v2815_v47, %v2015_v54  ;;  %v2013_v39 = vsel %vm2012_vm9, %v2813_v44, %v2009_v37  ;;  %v2685_v44 = vld [vmem:[%s3982_s14 + $0x8] sm:$0xff] }
 0x3b2   : > { %v2024_v36 = vmul.f32 %v2013_v39, %v1990_v20  ;;  %2233 = vmatpush.bf16.msrb.mxu0 %v2685_v44 }
 0x3b3   : > { %v2017_v8 = vmul.f32 0.5, %v2016_v51 }
 0x3b4   : > { %v2029_v55 = vmul.f32 %v2772_v40, %v2024_v36 }
 0x3b5   : > { %v2018_v0 = vsub.f32 1.5, %v2017_v8 }
 0x3b6   : > { %v3845_v26 = vadd.f32 %v2773_v19, %v2029_v55 }
 0x3b7   : > { %v2019_v5 = vmul.f32 %v2815_v47, %v2018_v0 }
 0x3b9   : > { %v2023_v7 = vsel %vm2022_vm12, %v2815_v47, %v2019_v5  ;;  %v2684_v47 = vld [vmem:[%s3982_s14] sm:$0xff] }
 0x3ba   : > { %v2025_v50 = vmul.f32 %v2023_v7, %v1991_v46  ;;  %2234 = vmatpush.bf16.msrb.mxu0 %v2684_v47 }
 0x3bc   : > { %v2030_v31 = vmul.f32 %v2772_v40, %v2025_v50 }
 0x3be   : > { %v3847_v23 = vadd.f32 %v2773_v19, %v2030_v31 }
 0x3c0   : > { %v2036_v4 = vpack.c.bf16 %v3847_v23, %v3845_v26 }
 0x3c2   : > { %2621 = vmatmul.msk.bf16.vlgmr.msra.gmra.mxu0 %vm913_vm0, %v2036_v4 }
 0x43f   : > { %v2069_v35 = vpop.f32.mrf.mxu0 }
 0x440   : > { %v3855_v63 = vadd.f32 %v2774_v61, %v2069_v35 }
 0x442   : > { %v3861_v14 = vmul.f32 0.70710677, %v3855_v63 }
 0x444   : > { %v2078_v18 = vmul.f32 %v3861_v14, %v3861_v14 }
 0x446   : > { %v2079_v9 = vmin.f32 %v2078_v18, 16.0 }
 0x447   : > { %v2071_v49 = vpop.f32.mrf.mxu0 }
 0x448   : > { %v2080_v32 = vmul.f32 2.1237322e-06, %v2079_v9  ;;  %v2091_v3 = vmul.f32 3.8918573e-05, %v2079_v9  ;;  %v3868_v33 = vadd.f32 %v2774_v61, %v2071_v49 }
 0x44a   : > { %v2081_v28 = vadd.f32 0.00028619796, %v2080_v32  ;;  %v2092_v62 = vadd.f32 0.001143296, %v2091_v3  ;;  %v3874_v45 = vmul.f32 0.70710677, %v3868_v33 }
 0x44c   : > { %v2093_v48 = vmul.f32 %v2092_v62, %v2079_v9  ;;  %v2118_v22 = vmul.f32 %v3874_v45, %v3874_v45  ;;  %v2082_v13 = vmul.f32 %v2081_v28, %v2079_v9 }
 0x44e   : > { %v2094_v2 = vadd.f32 0.014752088, %v2093_v48  ;;  %v2119_v11 = vmin.f32 %v2118_v22, 16.0  ;;  %v2083_v56 = vadd.f32 0.0036580483, %v2082_v13 }
 0x450   : > { %v2095_v42 = vmul.f32 %v2094_v2, %v2079_v9  ;;  %v2120_v20 = vmul.f32 2.1237322e-06, %v2119_v11  ;;  %v2131_v58 = vmul.f32 3.8918573e-05, %v2119_v11  ;;  %v2084_v30 = vmul.f32 %v2083_v56, %v2079_v9 }
 0x452   : > { %v2096_v25 = vadd.f32 0.112945676, %v2095_v42  ;;  %v2121_v59 = vadd.f32 0.00028619796, %v2120_v20  ;;  %v2132_v46 = vadd.f32 0.001143296, %v2131_v58 }
 0x453   : > { %v2085_v41 = vadd.f32 0.05243302, %v2084_v30 }
 0x454   : > { %v2097_v10 = vmul.f32 %v2096_v25, %v2079_v9  ;;  %v2122_v12 = vmul.f32 %v2121_v59, %v2119_v11  ;;  %v2133_v16 = vmul.f32 %v2132_v46, %v2119_v11  ;;  %v2074_v59 = vmul.f32 0.5, %v3855_v63 }
 0x455   : > { %v2086_v54 = vmul.f32 %v2085_v41, %v2079_v9  ;;  %v2075_v46 = vmul.f32 0.5, %v3868_v33 }
 0x456   : > { %v2098_v57 = vadd.f32 0.4994258, %v2097_v10  ;;  %v2123_v17 = vadd.f32 0.0036580483, %v2122_v12  ;;  %v2134_v60 = vadd.f32 0.014752088, %v2133_v16 }
 0x457   : > { %v2087_v40 = vadd.f32 0.18741608, %v2086_v54 }
 0x458   : > { %v2099_v53 = vmul.f32 %v2098_v57, %v2079_v9  ;;  %v2135_v1 = vmul.f32 %v2134_v60, %v2119_v11  ;;  %v2124_v15 = vmul.f32 %v2123_v17, %v2119_v11 }
 0x459   : > { %v2088_v55 = vmul.f32 %v2087_v40, %v2079_v9 }
 0x45a   : > { %v2100_v27 = vadd.f32 1.0, %v2099_v53  ;;  %v2136_v52 = vadd.f32 0.112945676, %v2135_v1  ;;  %v2125_v51 = vadd.f32 0.05243302, %v2124_v15  ;;  %v2923_v1 = vmov 0  }
 0x45b   : > { %v2089_v24 = vadd.f32 1.1283791, %v2088_v55  ;;  %2768 = vset.pattern.permute.xlu0 %v2923_v1  ;;  %2767 = vset.pattern.permute.xlu2 %v2923_v1 }
 0x45c   : > { %2816 = vrcp.f32 %v2100_v27  ;;  %v2137_v37 = vmul.f32 %v2136_v52, %v2119_v11  ;;  %v2126_v5 = vmul.f32 %v2125_v51, %v2119_v11  ;;  %v2112_v31 = vand.u32 2147483648, %v2100_v27 }
 0x45d   : > { %v2110_v61 = vand.u32 2147483647, %v2100_v27  ;;  %vm2106_vm14 = vweird.f32 %v2100_v27  ;;  %v2090_v28 = vmul.f32 %v2089_v24, %v3861_v14 }
 0x45e   : > { %v2138_v39 = vadd.f32 0.4994258, %v2137_v37  ;;  %v2127_v4 = vadd.f32 0.18741608, %v2126_v5  ;;  %v2113_v49 = vor.u32 1.1754944e-38, %v2112_v31 }
 0x45f   : > { %vm2111_vm1 = vcmp.eq.f32.partialorder %v2110_v61, 8.507059e+37 }
 0x460   : > { %v2139_v8 = vmul.f32 %v2138_v39, %v2119_v11  ;;  %v2128_v32 = vmul.f32 %v2127_v4, %v2119_v11 }
 0x462   : > { %v2817_v0 = vpop.eup %2816  ;;  %v2140_v7 = vadd.f32 1.0, %v2139_v8  ;;  %v2129_v9 = vadd.f32 1.1283791, %v2128_v32  ;;  %v2306_v8 = vld [vmem:[%s886_s27 + $0x8] sm:$0xff] }
 0x463   : > { %v2102_v36 = vmul.f32 %v2817_v0, %v2100_v27  ;;  %vm2107_vm13 = vweird.f32 %v2817_v0 }
 0x464   : > { %2818 = vrcp.f32 %v2140_v7  ;;  %vm2108_vm15 = vmor %vm2106_vm14, %vm2107_vm13  ;;  %v2152_v48 = vand.u32 2147483648, %v2140_v7  ;;  %v2150_v13 = vand.u32 2147483647, %v2140_v7  ;;  %vm2146_vm3 = vweird.f32 %v2140_v7 }
 0x465   : > { %v2103_v19 = vsub.f32 1.0, %v2102_v36  ;;  %v2130_v20 = vmul.f32 %v2129_v9, %v3874_v45  ;;  %v2775_v45 = vld [vmem:[%s4053_s24] ss:$0 sm:$0xff]  ;;  %s2333_s24 = sadd.s32 %s2658_s19, %s3131_s28 }
 0x466   : > { %v2153_v42 = vor.u32 1.1754944e-38, %v2152_v48  ;;  %vm2151_vm5 = vcmp.eq.f32.partialorder %v2150_v13, 8.507059e+37  ;;  %s2659_s0 = sshll.u32 %s2333_s24, 3 }
 0x467   : > { %v2104_v50 = vmul.f32 %v2817_v0, %v2103_v19 }
 0x469   : > { %v2105_v35 = vadd.f32 %v2817_v0, %v2104_v50 }
 0x46a   : > { %v2819_v18 = vpop.eup %2818 }
 0x46b   : > { %v2109_v29 = vsel %vm2108_vm15, %v2817_v0, %v2105_v35  ;;  %v2142_v3 = vmul.f32 %v2819_v18, %v2140_v7  ;;  %vm2147_vm2 = vweird.f32 %v2819_v18 }
 0x46c   : > { %v2114_v6 = vsel %vm2111_vm1, %v2113_v49, %v2109_v29  ;;  %vm2148_vm4 = vmor %vm2146_vm3, %vm2147_vm2  ;;  %v2776_v29 = vld [vmem:[%s4055_s4] ss:$0 sm:$0xff]  ;;  %s2336_s4 = sshll.u32 %s865_s15, 4  ;;  %s2337_s4 = int_to_ptr.vmem [resolvable:$true] %s2336_s4 }
 0x46d   : > { %v2143_v62 = vsub.f32 1.0, %v2142_v3  ;;  %v2115_v38 = vmul.f32 %v2114_v6, %v2090_v28  ;;  %v2777_v3 = vld [vmem:[%s4056_s18] ss:$0 sm:$0xff] }
 0x46f   : > { %v2144_v22 = vmul.f32 %v2819_v18, %v2143_v62  ;;  %v2622_v34 = vclamps-f32 %v2115_v38, 1.0 }
 0x471   : > { %v2145_v2 = vadd.f32 %v2819_v18, %v2144_v22  ;;  %v2158_v25 = vadd.f32 1.0, %v2622_v34 }
 0x473   : > { %v2149_v11 = vsel %vm2148_vm4, %v2819_v18, %v2145_v2  ;;  %v2160_v21 = vmul.f32 %v2158_v25, %v2074_v59 }
 0x474   : > { %v2154_v58 = vsel %vm2151_vm5, %v2153_v42, %v2149_v11 }
 0x475   : > { %v2155_v56 = vmul.f32 %v2154_v58, %v2130_v20 }
 0x477   : > { %v2623_v14 = vclamps-f32 %v2155_v56, 1.0 }
 0x479   : > { %v2159_v10 = vadd.f32 1.0, %v2623_v14 }
 0x47b   : > { %v2161_v12 = vmul.f32 %v2159_v10, %v2075_v46 }
 0x47d   : > { %v2162_v16 = vpack.c.bf16 %v2161_v12, %v2160_v21 }
 0x47f   : > { %2235 = vmatmul.bf16.vlgmr.msrb.gmra.mxu0 %v2162_v16 }
 0x4fc   : > { %v2236_v30 = vpop.f32.mrf.mxu0 }
 0x4fd   : > { %v2241_v57 = vadd.f32 %v2236_v30, %v3845_v26  ;;  %v2305_v26 = vld [vmem:[%s886_s27] sm:$0xff]  ;;  %s4057_s27 = sld [smem:[#allocation24_spill]] }
 0x4ff   : > { %v2247_v17 = vadd.f32 %v2775_v45, %v2241_v57 }
 0x501   : > { %v2251_v60 = vsel %vm913_vm0, %v2247_v17, 0.0 }
 0x502   : > { %2252 = vadd.xlane.f32.xlu2 %v2251_v60 }
 0x503   : > { %s2335_s3 = scalar_lea.hbm %s4057_s27, %s2659_s0  ;;  %s2846_s0 = scalar_lea.hbm %s4057_s27, 64 }
 0x504   : > { %v2238_v63 = vpop.f32.mrf.mxu0  ;;  %s2338_s19 = sshll.u32 %s2335_s3, 4  ;;  %s2339_s19 = int_to_ptr.hbm [resolvable:$true] %s2338_s19 }
 0x505   : > { %v2242_v33 = vadd.f32 %v2238_v63, %v3847_v23  ;;  %s2840_s30 = sshra.s32 %s2339_s19, 4  ;;  %s2841_s30 = int_to_ptr.hbm [resolvable:$true] %s2840_s30 }
 0x506   : > { %s2842_s18 = scalar_lea.hbm %s2841_s30, 16  ;;  %p2847_p6 = scmp.lt.s32.totalorder %s2841_s30, %s4057_s27 }
 0x507   : > { %v2248_v53 = vadd.f32 %v2775_v45, %v2242_v33  ;;  %p2843_p3 = scmp.ne.s32.totalorder %s2841_s30, %s2842_s18  ;;  %p2848_p7 = scmp.lt.s32.totalorder %s2846_s0, %s2842_s18 }
 0x509   : > { %v2254_v44 = vsel %vm913_vm0, %v2248_v53, 0.0  ;;  %p2844_p4 = pnand %p2843_p3, %p3091_p8  ;;  %p2849_p10 = por %p2848_p7, %p2847_p6 }
 0x50a   : > { %2255 = vadd.xlane.f32.xlu2 %v2254_v44 }
 0x50b   : > { %p2845_p5 = pneg %p2844_p4 }
 0x50d   : > { %p2850_p11 = pnand %p2849_p10, %p2845_p5 }
 0x522   : > { %2309 = vperm.xlu2 %2767, %v2305_v26  }
 0x575   : > { %v2253_v41 = vpop.xlane.xlu2 %2252 }
 0x576   : > { %v2257_v27 = vmul.f32 %v2253_v41, %v3825_v43 }
 0x578   : > { %v2259_v15 = vsub.f32 %v2247_v17, %v2257_v27 }
 0x57a   : > { %v2261_v52 = vmul.f32 %v2259_v15, %v2259_v15 }
 0x57c   : > { %v2263_v23 = vsel %vm913_vm0, %v2261_v52, 0.0 }
 0x57d   : > { %2264 = vadd.xlane.f32.xlu0 %v2263_v23  ;;  %v2256_v47 = vpop.xlane.xlu2 %2255 }
 0x57e   : > { %v2258_v37 = vmul.f32 %v2256_v47, %v3825_v43 }
 0x580   : > { %v2260_v54 = vsub.f32 %v2248_v53, %v2258_v37 }
 0x582   : > { %v2262_v51 = vmul.f32 %v2260_v54, %v2260_v54 }
 0x584   : > { %v2266_v39 = vsel %vm913_vm0, %v2262_v51, 0.0 }
 0x585   : > { %2267 = vadd.xlane.f32.xlu1 %v2266_v39  ;;  %v2310_v9 = vpop.permute.xlu2 %2309 }
 0x591   : > { %2314 = vperm.xlu0 %2768, %v2306_v8  }
 0x5f0   : > { %v2265_v0 = vpop.xlane.xlu0 %2264 }
 0x5f1   : > { %v2269_v40 = vmul.f32 %v2265_v0, %v3825_v43 }
 0x5f3   : > { %v2271_v36 = vadd.f32 1e-05, %v2269_v40 }
 0x5f5   : > { %2820 = vrsqrt.f32 %v2271_v36  ;;  %vm2279_vm7 = vweird.f32 %v2271_v36 }
 0x5f8   : > { %v2268_v5 = vpop.xlane.xlu1 %2267 }
 0x5f9   : > { %v2270_v7 = vmul.f32 %v2268_v5, %v3825_v43 }
 0x5fb   : > { %v2821_v19 = vpop.eup %2820  ;;  %v2272_v55 = vadd.f32 1e-05, %v2270_v7 }
 0x5fc   : > { %v2274_v50 = vmul.f32 %v2821_v19, %v2271_v36  ;;  %vm2280_vm6 = vweird.f32 %v2821_v19 }
 0x5fd   : > { %2822 = vrsqrt.f32 %v2272_v55  ;;  %vm2281_vm8 = vmor %vm2279_vm7, %vm2280_vm6  ;;  %vm2289_vm10 = vweird.f32 %v2272_v55 }
 0x5fe   : > { %v2275_v31 = vmul.f32 %v2821_v19, %v2274_v50 }
 0x600   : > { %v2276_v4 = vmul.f32 0.5, %v2275_v31 }
 0x602   : > { %v2277_v61 = vsub.f32 1.5, %v2276_v4 }
 0x603   : > { %v2823_v35 = vpop.eup %2822  ;;  %v2315_v34 = vpop.permute.xlu0 %2314 }
 0x604   : > { %v2278_v24 = vmul.f32 %v2821_v19, %v2277_v61  ;;  %v2284_v18 = vmul.f32 %v2823_v35, %v2272_v55  ;;  %vm2290_vm9 = vweird.f32 %v2823_v35 }
 0x605   : > { %vm2291_vm11 = vmor %vm2289_vm10, %vm2290_vm9 }
 0x606   : > { %v2285_v43 = vmul.f32 %v2823_v35, %v2284_v18  ;;  %v2282_v49 = vsel %vm2281_vm8, %v2821_v19, %v2278_v24 }
 0x607   : > { %v2293_v32 = vmul.f32 %v2282_v49, %v2259_v15 }
 0x608   : > { %v2286_v6 = vmul.f32 0.5, %v2285_v43 }
 0x609   : > { %v2298_v28 = vmul.f32 %v2776_v29, %v2293_v32 }
 0x60a   : > { %v2287_v62 = vsub.f32 1.5, %v2286_v6 }
 0x60b   : > { %v2303_v48 = vadd.f32 %v2777_v3, %v2298_v28 }
 0x60c   : > { %v2288_v38 = vmul.f32 %v2823_v35, %v2287_v62 }
 0x60d   : > { %v2317_v22 = vmul.f32 %v2310_v9, %v2303_v48 }
 0x60e   : > { %v2292_v13 = vsel %vm2291_vm11, %v2823_v35, %v2288_v38 }
 0x60f   : > { %2319 = vst.msk [vmem:[%s865_s15] sm:$0xff] %vm913_vm0, %v2317_v22  ;;  %v2294_v2 = vmul.f32 %v2292_v13, %v2260_v54 }
 0x611   : > { %v2299_v42 = vmul.f32 %v2776_v29, %v2294_v2 }
 0x613   : > { %v2304_v20 = vadd.f32 %v2777_v3, %v2299_v42 }
 0x615   : > { %v2318_v11 = vmul.f32 %v2315_v34, %v2304_v20 }
 0x617   : > { %2320 = vst.msk [vmem:[%s865_s15 + $0x8] sm:$0xff] %vm913_vm0, %v2318_v11 }
 0x618   : > { %2853 = shalt.err (!%p2850_p11)
}
 0x619   : > { %s2924_s1 = smov 128   ;;  %s2925_s3 = smov 8  }
 0x61a   : > { %2692 = dma.vmem_to_hbm [thread:$0]  (%p3091_p8), %s2337_s4, 256, %s2339_s19, %s2322_s6, %s2924_s1, %s2924_s1, %s2925_s3  }
 0x61b PF: > { %s4059_s15 = sld [smem:[#allocation7_spill]]  ;;  %p2698_p12 = scmp.ge.s32.totalorder %s2920_s26, 2 }
 0x61d   : > { %p2695_p13 = pnand %p2698_p12, %p3095_p9 }
 0x61f   : > { %p2696_p0 = pneg %p2695_p13 }
 0x621   : > { %s2353_s24 = sand.u32 1, %s4059_s15  }
 0x622   : > { %s2354_s20 = scalar_lea.sflag [#allocation5], %s2353_s24 }
 0x623   : > { %2887 = dma.done.wait (%p2696_p0), %s2354_s20, 256  }
 0x624   : > { %2889 = vsyncadd (%p2696_p0), %s2354_s20, 4294967040  ;;  %s33_s26 = sadd.s32 1, %s2920_s26   ;;  %s4061_s30 = sld [smem:[#allocation13_spill]] }
 0x625   : > { %p30_p1 = scmp.ge.s32.totalorder %s33_s26, 6   ;;  %s4062_s2 = sld [smem:[#allocation8_spill]] }
 0x626   : > { %s4063_s28 = sld [smem:[#allocation9_spill]]  ;;  %s4065_s1 = smov %s2896_s22 }
 0x627   : > { %s4064_s3 = sld [smem:[#allocation10_spill]]  ;;  %s4066_s22 = smov %s2900_s23 }
 0x628   : > { %s4068_s24 = smov %s2912_s25  ;;  %32 = sbr.rel (!%p30_p1) target bundleno = 17 (0x11), region = 236 }
 0x62a   : > { %s4067_s23 = smov %s4061_s30 }
 0x62c   : > { %s4069_s25 = smov %s4063_s28 }
 0x62d   :  { %2360 = vsyncpa [#allocation5], 1 }
 0x62e   :  { %2362 = vsyncpa [#allocation5 + $0x1], 1 }

</bundles_post_ra>
